<compile_context>
chip_gen: v7x
topology: tpu7x:2x2x1
jax: 0.10.0
libtpu: 0.0.40
codegen_flags: <defaults>
</compile_context>

<pallas_src>
import functools

import jax
import jax.numpy as jnp
from jax import lax
from jax.experimental import pallas as pl
from jax.experimental.pallas import tpu as pltpu

_PAD = 8  # sublane-aligned interior column offset in the padded scratch


def _bottleneck_kernel(x_ref, w1_ref, b1_ref, w2_ref, b2_ref, w3_ref, b3_ref,
                       o_ref, hp_ref, c2_ref, *, use_im2col):
    # x_ref block: (1, H, W, Cin) -- one image per grid step.
    H, W, Cin = x_ref.shape[1], x_ref.shape[2], x_ref.shape[3]
    width = w1_ref.shape[-1]
    Cout = w3_ref.shape[1]
    bf16 = jnp.bfloat16

    # --- conv1 (1x1, BN folded into w1) + bias + ReLU, cast ONCE to bf16 ---
    # (reshapes are free when W % 8 == 0)
    xb = x_ref[0].reshape(H * W, Cin).astype(bf16)
    h1 = jnp.dot(xb, w1_ref[...], preferred_element_type=jnp.float32)
    h1 = jnp.maximum(h1 + b1_ref[...], 0.0)

    # --- padded-activation scratch (bf16) ----------------------------------
    # Interior lives at rows 1..H, cols _PAD.._PAD+W-1 (aligned full-width
    # store).  Only the 1-pixel border the 3x3 taps read is zeroed, every
    # step (cheap; safe under "parallel" batch sharding).  The interior is
    # fully rewritten every step, so no stale data can be read.
    hp_w = hp_ref.shape[1]
    hp_ref[0:1, :, :] = jnp.zeros((1, hp_w, width), bf16)
    hp_ref[H + 1:H + 2, :, :] = jnp.zeros((1, hp_w, width), bf16)
    hp_ref[:, _PAD - 1:_PAD, :] = jnp.zeros((H + 2, 1, width), bf16)
    hp_ref[:, _PAD + W:_PAD + W + 1, :] = jnp.zeros((H + 2, 1, width), bf16)
    hp_ref[1:H + 1, _PAD:_PAD + W, :] = h1.reshape(H, W, width).astype(bf16)

    # --- conv2 (3x3, stride 1, pad 1, BN folded) + bias + ReLU --------------
    # Tap order t = dy*3 + dx MUST stay in sync with fold_params' reshape of
    # the HWIO [3,3,width,width] kernel to (9, width, width) / (9*width, width).
    taps = tuple((dy, dx) for dy in range(3) for dx in range(3))
    if use_im2col:
        # Single im2col matmul, K = 9*width (v5e/v6e path).
        for t, (dy, dx) in enumerate(taps):
            c2_ref[:, :, t * width:(t + 1) * width] = \
                hp_ref[dy:dy + H, _PAD - 1 + dx:_PAD - 1 + dx + W, :]
        h2 = jnp.dot(c2_ref[...].reshape(H * W, 9 * width), w2_ref[...],
                     preferred_element_type=jnp.float32)
    else:
        # Per-tap accumulation into an f32 VMEM accumulator; no im2col
        # buffer and no im2col stores (v7x path).
        for t, (dy, dx) in enumerate(taps):
            win = hp_ref[dy:dy + H, _PAD - 1 + dx:_PAD - 1 + dx + W, :]
            part = jnp.dot(win.reshape(H * W, width), w2_ref[t],
                           preferred_element_type=jnp.float32)
            if t == 0:
                c2_ref[...] = part
            else:
                c2_ref[...] += part
        h2 = c2_ref[...]
    h2 = jnp.maximum(h2 + b2_ref[...], 0.0)

    # --- conv3 (1x1, BN folded) + bias ---
    h3 = jnp.dot(h2.astype(bf16), w3_ref[...],
                 preferred_element_type=jnp.float32)
    h3 = h3 + b3_ref[...]

    # --- residual add (f32) + ReLU; re-read the VMEM-resident input block ---
    ident = x_ref[0].reshape(H * W, Cout).astype(jnp.float32)
    out = jnp.maximum(h3 + ident, 0.0)
    o_ref[0] = out.reshape(H, W, Cout).astype(o_ref.dtype)


def _vmem_limit_bytes():
    """Per-generation VMEM budget: ~3/4 of physical VMEM, clamped to [32, 96] MiB."""
    mib = 1024 * 1024
    try:
        cap = pltpu.get_tpu_info().vmem_capacity_bytes
    except Exception:  # query unavailable -> conservative default (safe on v7x)
        cap = 64 * mib
    return int(min(max(cap * 3 // 4, 32 * mib), 96 * mib))


def bottleneck_forward_nhwc(x_nhwc, params, *, use_im2col=True):
    """Primary entry. x_nhwc: [N, H, W, Cin] (f32 or bf16) -> same dtype/layout."""
    (w1, b1, w2, b2, w3, b3) = params        # w2: (9, width, width) bf16, tap-major
    N, H, W, Cin = x_nhwc.shape
    width = w1.shape[1]
    Cout = w3.shape[1]
    assert Cin == Cout, "downsample=None requires inplanes == planes * expansion"

    if use_im2col:
        w2_call = w2.reshape(9 * width, width)                      # im2col layout
        conv2_scratch = pltpu.VMEM((H, W, 9 * width), jnp.bfloat16)  # im2col buffer
    else:
        w2_call = w2                                                 # (9, width, width)
        conv2_scratch = pltpu.VMEM((H * W, width), jnp.float32)      # f32 accumulator

    kernel = functools.partial(_bottleneck_kernel, use_im2col=use_im2col)

    def full(a):
        return pl.BlockSpec(a.shape, lambda n: (0,) * a.ndim)

    return pl.pallas_call(
        kernel,
        out_shape=jax.ShapeDtypeStruct((N, H, W, Cout), x_nhwc.dtype),
        grid_spec=pltpu.PrefetchScalarGridSpec(
            num_scalar_prefetch=0,
            grid=(N,),
            in_specs=[
                pl.BlockSpec((1, H, W, Cin), lambda n: (n, 0, 0, 0)),
                full(w1), full(b1), full(w2_call), full(b2), full(w3), full(b3),
            ],
            out_specs=pl.BlockSpec((1, H, W, Cout), lambda n: (n, 0, 0, 0)),
            scratch_shapes=[
                pltpu.VMEM((H + 2, W + 2 * _PAD, width), jnp.bfloat16),  # padded act
                conv2_scratch,
            ],
        ),
        compiler_params=pltpu.CompilerParams(
            dimension_semantics=("parallel",),      # batch axis shards across TCs
            vmem_limit_bytes=_vmem_limit_bytes(),
        ),
    )(x_nhwc, w1, b1, w2_call, b2, w3, b3)


def bottleneck_forward(x_nchw, params, *, use_im2col=True):
    """PyTorch-layout convenience wrapper: [N, C, H, W] -> [N, C, H, W].

    Prefer bottleneck_forward_nhwc in an NHWC pipeline: each transpose here is
    a full HBM round trip executed by XLA outside the kernel.
    """
    x_nhwc = jnp.transpose(x_nchw, (0, 2, 3, 1))
    out = bottleneck_forward_nhwc(x_nhwc, params, use_im2col=use_im2col)
    return jnp.transpose(out, (0, 3, 1, 2))


def fold_params(w1, bn1, w2_hwio, bn2, w3, bn3, eps=1e-5):
    """Fold inference-mode BN into conv weights; weights -> bf16, biases -> f32."""
    def fold(w, bn):
        gamma, beta, mean, var = bn
        scale = gamma / jnp.sqrt(var + eps)           # per output channel
        bias = beta - mean * scale
        return (w * scale).astype(jnp.bfloat16), bias.reshape(1, -1).astype(jnp.float32)

    w1f, b1 = fold(w1, bn1)                           # [Cin, width]
    w2f, b2 = fold(w2_hwio, bn2)                      # [3, 3, width, width] (HWIO)
    w3f, b3 = fold(w3, bn3)                           # [width, Cout]
    width = w1f.shape[1]
    # Tap-major layout t = dy*3 + dx; MUST match the kernel's tap loop.
    w2f = w2f.reshape(9, width, width)
    return (w1f, b1, w2f, b2, w3f, b3)


def make_params(key, inplanes, planes, base_width=64, groups=1, expansion=4,
                eps=1e-5):
    width = int(planes * (base_width / 64.0)) * groups
    cout = planes * expansion
    ks = jax.random.split(key, 15)

    def bn(kg, kb, km, kv, c):
        gamma = 1.0 + 0.1 * jax.random.normal(kg, (c,), jnp.float32)
        beta = 0.1 * jax.random.normal(kb, (c,), jnp.float32)
        mean = 0.1 * jax.random.normal(km, (c,), jnp.float32)
        var = jnp.abs(jax.random.normal(kv, (c,), jnp.float32)) + 0.5
        return gamma, beta, mean, var

    # conv weights, channels-last: w1 [Cin,width], w2 HWIO [3,3,width,width], w3 [width,Cout]
    w1 = 0.1 * jax.random.normal(ks[0], (inplanes, width), jnp.float32)
    w2 = 0.1 * jax.random.normal(ks[1], (3, 3, width, width), jnp.float32)
    w3 = 0.1 * jax.random.normal(ks[2], (width, cout), jnp.float32)
    bn1 = bn(ks[3], ks[4], ks[5], ks[6], width)
    bn2 = bn(ks[7], ks[8], ks[9], ks[10], width)
    bn3 = bn(ks[11], ks[12], ks[13], ks[14], cout)
    return fold_params(w1, bn1, w2, bn2, w3, bn3, eps=eps)


def reference_forward_nhwc(x_nhwc, params):
    """Pure-JAX reference with the same folded bf16 weights / f32-accum math."""
    (w1, b1, w2, b2, w3, b3) = params
    width = w1.shape[1]
    w2_hwio = w2.reshape(3, 3, width, width)
    x = x_nhwc.astype(jnp.float32)

    h = jnp.einsum('nhwc,cd->nhwd', x.astype(jnp.bfloat16), w1,
                   preferred_element_type=jnp.float32)
    h = jnp.maximum(h + b1[0], 0.0)

    h = lax.conv_general_dilated(
        h.astype(jnp.bfloat16), w2_hwio, window_strides=(1, 1), padding='SAME',
        dimension_numbers=('NHWC', 'HWIO', 'NHWC'),
        preferred_element_type=jnp.float32)
    h = jnp.maximum(h + b2[0], 0.0)

    h = jnp.einsum('nhwc,cd->nhwd', h.astype(jnp.bfloat16), w3,
                   preferred_element_type=jnp.float32)
    h = h + b3[0]
    return jnp.maximum(h + x, 0.0)


def reference_forward(x_nchw, params):
    x_nhwc = jnp.transpose(x_nchw, (0, 2, 3, 1))
    out = reference_forward_nhwc(x_nhwc, params)
    return jnp.transpose(out, (0, 3, 1, 2))


if __name__ == "__main__":
    key = jax.random.PRNGKey(0)
    kx, kp = jax.random.split(key)

    # Bottleneck(inplanes=16, planes=4): width=4, out channels = 4*4 = 16,
    # stride=1, downsample=None -> residual add is valid.
    N, Cin, H, W = 2, 16, 16, 16
    planes = 4

    x = jax.random.normal(kx, (N, Cin, H, W), jnp.float32)
    params = make_params(kp, Cin, planes)

    ref = reference_forward(x, params)

    # Exercise both conv2 paths (im2col: v5e/v6e-style; per-tap: v7x-style).
    for use_im2col in (True, False):
        out = bottleneck_forward(x, params, use_im2col=use_im2col)
        out = jax.block_until_ready(out)
        assert out.shape == (N, planes * 4, H, W)
        err = float(jnp.max(jnp.abs(out.astype(jnp.float32) - ref)))
        # bf16 matmul inputs (same quantization points as the reference).
        assert err < 2e-2, f"use_im2col={use_im2col}: max abs err {err}"

    print("KERNEL_OK")
</pallas_src>

<mosaic_0001>
module attributes {stable_mosaic.version = 11 : i64} {
  func.func @_bottleneck_kernel(%arg0: i32, %arg1: memref<1x16x16x16xf32, #tpu.memory_space<vmem>>, %arg2: memref<16x4xbf16, #tpu.memory_space<vmem>>, %arg3: memref<1x4xf32, #tpu.memory_space<vmem>>, %arg4: memref<36x4xbf16, #tpu.memory_space<vmem>>, %arg5: memref<1x4xf32, #tpu.memory_space<vmem>>, %arg6: memref<4x16xbf16, #tpu.memory_space<vmem>>, %arg7: memref<1x16xf32, #tpu.memory_space<vmem>>, %arg8: memref<1x16x16x16xf32, #tpu.memory_space<vmem>>, %arg9: memref<18x32x4xbf16, #tpu.memory_space<vmem>>, %arg10: memref<16x16x36xbf16, #tpu.memory_space<vmem>>) attributes {dimension_semantics = [#tpu.dimension_semantics<parallel>], iteration_bounds = array<i64: 2>, scalar_prefetch = 0 : i64, scratch_operands = 2 : i64, tpu.core_type = #tpu.core_type<tc>, window_params = [{transform_indices = @transform_0, window_bounds = array<i64: 1, 16, 16, 16>}, {pipeline_mode = #tpu.pipeline_mode<synchronous>, transform_indices = @transform_1, window_bounds = array<i64: 16, 4>}, {pipeline_mode = #tpu.pipeline_mode<synchronous>, transform_indices = @transform_2, window_bounds = array<i64: 1, 4>}, {pipeline_mode = #tpu.pipeline_mode<synchronous>, transform_indices = @transform_3, window_bounds = array<i64: 36, 4>}, {pipeline_mode = #tpu.pipeline_mode<synchronous>, transform_indices = @transform_4, window_bounds = array<i64: 1, 4>}, {pipeline_mode = #tpu.pipeline_mode<synchronous>, transform_indices = @transform_5, window_bounds = array<i64: 4, 16>}, {pipeline_mode = #tpu.pipeline_mode<synchronous>, transform_indices = @transform_6, window_bounds = array<i64: 1, 16>}, {transform_indices = @transform_7, window_bounds = array<i64: 1, 16, 16, 16>}]} {
    %c0 = arith.constant 0 : index
    %c0_0 = arith.constant 0 : index
    %c0_1 = arith.constant 0 : index
    %c0_2 = arith.constant 0 : index
    %0 = vector.load %arg1[%c0, %c0_0, %c0_1, %c0_2] : memref<1x16x16x16xf32, #tpu.memory_space<vmem>>, vector<1x16x16x16xf32>
    %1 = vector.shape_cast %0 : vector<1x16x16x16xf32> to vector<16x16x16xf32>
    %2 = vector.shape_cast %1 : vector<16x16x16xf32> to vector<256x16xf32>
    %3 = arith.truncf %2 : vector<256x16xf32> to vector<256x16xbf16>
    %c0_3 = arith.constant 0 : index
    %c0_4 = arith.constant 0 : index
    %4 = vector.load %arg2[%c0_3, %c0_4] : memref<16x4xbf16, #tpu.memory_space<vmem>>, vector<16x4xbf16>
    %cst = arith.constant dense<0.000000e+00> : vector<256x4xf32>
    %5 = tpu.matmul %3, %4, %cst {dimension_numbers = #tpu.dot_dimension_numbers<[1], [0], [0], [1], [0, 0, 1, 1], [], []>} : vector<256x16xbf16>, vector<16x4xbf16>, vector<256x4xf32> -> vector<256x4xf32>
    %c0_5 = arith.constant 0 : index
    %c0_6 = arith.constant 0 : index
    %6 = vector.load %arg3[%c0_5, %c0_6] : memref<1x4xf32, #tpu.memory_space<vmem>>, vector<1x4xf32>
    %7 = vector.broadcast %6 : vector<1x4xf32> to vector<256x4xf32>
    %8 = arith.addf %5, %7 : vector<256x4xf32>
    %cst_7 = arith.constant 0.000000e+00 : f32
    %9 = vector.broadcast %cst_7 : f32 to vector<256x4xf32>
    %10 = arith.maximumf %8, %9 : vector<256x4xf32>
    %cst_8 = arith.constant 0.000000e+00 : bf16
    %11 = vector.broadcast %cst_8 : bf16 to vector<1x32x4xbf16>
    %c0_9 = arith.constant 0 : index
    %c0_10 = arith.constant 0 : index
    %c0_11 = arith.constant 0 : index
    %12 = vector.load %arg9[%c0_9, %c0_10, %c0_11] : memref<18x32x4xbf16, #tpu.memory_space<vmem>>, vector<1x32x4xbf16>
    tpu.vector_store %arg9[%c0_9, %c0_10, %c0_11], %11 {strides = array<i32>} : memref<18x32x4xbf16, #tpu.memory_space<vmem>>, vector<1x32x4xbf16>,
    %cst_12 = arith.constant 0.000000e+00 : bf16
    %13 = vector.broadcast %cst_12 : bf16 to vector<1x32x4xbf16>
    %c17 = arith.constant 17 : index
    %c0_13 = arith.constant 0 : index
    %c0_14 = arith.constant 0 : index
    %14 = vector.load %arg9[%c17, %c0_13, %c0_14] : memref<18x32x4xbf16, #tpu.memory_space<vmem>>, vector<1x32x4xbf16>
    tpu.vector_store %arg9[%c17, %c0_13, %c0_14], %13 {strides = array<i32>} : memref<18x32x4xbf16, #tpu.memory_space<vmem>>, vector<1x32x4xbf16>,
    %cst_15 = arith.constant 0.000000e+00 : bf16
    %15 = vector.broadcast %cst_15 : bf16 to vector<18x1x4xbf16>
    %c0_16 = arith.constant 0 : index
    %c7 = arith.constant 7 : index
    %c0_17 = arith.constant 0 : index
    %16 = vector.load %arg9[%c0_16, %c7, %c0_17] : memref<18x32x4xbf16, #tpu.memory_space<vmem>>, vector<18x1x4xbf16>
    tpu.vector_store %arg9[%c0_16, %c7, %c0_17], %15 {strides = array<i32>} : memref<18x32x4xbf16, #tpu.memory_space<vmem>>, vector<18x1x4xbf16>,
    %cst_18 = arith.constant 0.000000e+00 : bf16
    %17 = vector.broadcast %cst_18 : bf16 to vector<18x1x4xbf16>
    %c0_19 = arith.constant 0 : index
    %c24 = arith.constant 24 : index
    %c0_20 = arith.constant 0 : index
    %18 = vector.load %arg9[%c0_19, %c24, %c0_20] : memref<18x32x4xbf16, #tpu.memory_space<vmem>>, vector<18x1x4xbf16>
    tpu.vector_store %arg9[%c0_19, %c24, %c0_20], %17 {strides = array<i32>} : memref<18x32x4xbf16, #tpu.memory_space<vmem>>, vector<18x1x4xbf16>,
    %19 = vector.shape_cast %10 : vector<256x4xf32> to vector<16x16x4xf32>
    %20 = arith.truncf %19 : vector<16x16x4xf32> to vector<16x16x4xbf16>
    %c1 = arith.constant 1 : index
    %c8 = arith.constant 8 : index
    %c0_21 = arith.constant 0 : index
    %21 = vector.load %arg9[%c1, %c8, %c0_21] : memref<18x32x4xbf16, #tpu.memory_space<vmem>>, vector<16x16x4xbf16>
    tpu.vector_store %arg9[%c1, %c8, %c0_21], %20 {strides = array<i32>} : memref<18x32x4xbf16, #tpu.memory_space<vmem>>, vector<16x16x4xbf16>,
    %c0_22 = arith.constant 0 : index
    %c7_23 = arith.constant 7 : index
    %c0_24 = arith.constant 0 : index
    %22 = vector.load %arg9[%c0_22, %c7_23, %c0_24] : memref<18x32x4xbf16, #tpu.memory_space<vmem>>, vector<16x16x4xbf16>
    %c0_25 = arith.constant 0 : index
    %c0_26 = arith.constant 0 : index
    %c0_27 = arith.constant 0 : index
    %23 = vector.load %arg10[%c0_25, %c0_26, %c0_27] : memref<16x16x36xbf16, #tpu.memory_space<vmem>>, vector<16x16x4xbf16>
    tpu.vector_store %arg10[%c0_25, %c0_26, %c0_27], %22 {strides = array<i32>} : memref<16x16x36xbf16, #tpu.memory_space<vmem>>, vector<16x16x4xbf16>,
    %c0_28 = arith.constant 0 : index
    %c8_29 = arith.constant 8 : index
    %c0_30 = arith.constant 0 : index
    %24 = vector.load %arg9[%c0_28, %c8_29, %c0_30] : memref<18x32x4xbf16, #tpu.memory_space<vmem>>, vector<16x16x4xbf16>
    %c0_31 = arith.constant 0 : index
    %c0_32 = arith.constant 0 : index
    %c4 = arith.constant 4 : index
    %25 = vector.load %arg10[%c0_31, %c0_32, %c4] : memref<16x16x36xbf16, #tpu.memory_space<vmem>>, vector<16x16x4xbf16>
    tpu.vector_store %arg10[%c0_31, %c0_32, %c4], %24 {strides = array<i32>} : memref<16x16x36xbf16, #tpu.memory_space<vmem>>, vector<16x16x4xbf16>,
    %c0_33 = arith.constant 0 : index
    %c9 = arith.constant 9 : index
    %c0_34 = arith.constant 0 : index
    %26 = vector.load %arg9[%c0_33, %c9, %c0_34] : memref<18x32x4xbf16, #tpu.memory_space<vmem>>, vector<16x16x4xbf16>
    %c0_35 = arith.constant 0 : index
    %c0_36 = arith.constant 0 : index
    %c8_37 = arith.constant 8 : index
    %27 = vector.load %arg10[%c0_35, %c0_36, %c8_37] : memref<16x16x36xbf16, #tpu.memory_space<vmem>>, vector<16x16x4xbf16>
    tpu.vector_store %arg10[%c0_35, %c0_36, %c8_37], %26 {strides = array<i32>} : memref<16x16x36xbf16, #tpu.memory_space<vmem>>, vector<16x16x4xbf16>,
    %c1_38 = arith.constant 1 : index
    %c7_39 = arith.constant 7 : index
    %c0_40 = arith.constant 0 : index
    %28 = vector.load %arg9[%c1_38, %c7_39, %c0_40] : memref<18x32x4xbf16, #tpu.memory_space<vmem>>, vector<16x16x4xbf16>
    %c0_41 = arith.constant 0 : index
    %c0_42 = arith.constant 0 : index
    %c12 = arith.constant 12 : index
    %29 = vector.load %arg10[%c0_41, %c0_42, %c12] : memref<16x16x36xbf16, #tpu.memory_space<vmem>>, vector<16x16x4xbf16>
    tpu.vector_store %arg10[%c0_41, %c0_42, %c12], %28 {strides = array<i32>} : memref<16x16x36xbf16, #tpu.memory_space<vmem>>, vector<16x16x4xbf16>,
    %c1_43 = arith.constant 1 : index
    %c8_44 = arith.constant 8 : index
    %c0_45 = arith.constant 0 : index
    %30 = vector.load %arg9[%c1_43, %c8_44, %c0_45] : memref<18x32x4xbf16, #tpu.memory_space<vmem>>, vector<16x16x4xbf16>
    %c0_46 = arith.constant 0 : index
    %c0_47 = arith.constant 0 : index
    %c16 = arith.constant 16 : index
    %31 = vector.load %arg10[%c0_46, %c0_47, %c16] : memref<16x16x36xbf16, #tpu.memory_space<vmem>>, vector<16x16x4xbf16>
    tpu.vector_store %arg10[%c0_46, %c0_47, %c16], %30 {strides = array<i32>} : memref<16x16x36xbf16, #tpu.memory_space<vmem>>, vector<16x16x4xbf16>,
    %c1_48 = arith.constant 1 : index
    %c9_49 = arith.constant 9 : index
    %c0_50 = arith.constant 0 : index
    %32 = vector.load %arg9[%c1_48, %c9_49, %c0_50] : memref<18x32x4xbf16, #tpu.memory_space<vmem>>, vector<16x16x4xbf16>
    %c0_51 = arith.constant 0 : index
    %c0_52 = arith.constant 0 : index
    %c20 = arith.constant 20 : index
    %33 = vector.load %arg10[%c0_51, %c0_52, %c20] : memref<16x16x36xbf16, #tpu.memory_space<vmem>>, vector<16x16x4xbf16>
    tpu.vector_store %arg10[%c0_51, %c0_52, %c20], %32 {strides = array<i32>} : memref<16x16x36xbf16, #tpu.memory_space<vmem>>, vector<16x16x4xbf16>,
    %c2 = arith.constant 2 : index
    %c7_53 = arith.constant 7 : index
    %c0_54 = arith.constant 0 : index
    %34 = vector.load %arg9[%c2, %c7_53, %c0_54] : memref<18x32x4xbf16, #tpu.memory_space<vmem>>, vector<16x16x4xbf16>
    %c0_55 = arith.constant 0 : index
    %c0_56 = arith.constant 0 : index
    %c24_57 = arith.constant 24 : index
    %35 = vector.load %arg10[%c0_55, %c0_56, %c24_57] : memref<16x16x36xbf16, #tpu.memory_space<vmem>>, vector<16x16x4xbf16>
    tpu.vector_store %arg10[%c0_55, %c0_56, %c24_57], %34 {strides = array<i32>} : memref<16x16x36xbf16, #tpu.memory_space<vmem>>, vector<16x16x4xbf16>,
    %c2_58 = arith.constant 2 : index
    %c8_59 = arith.constant 8 : index
    %c0_60 = arith.constant 0 : index
    %36 = vector.load %arg9[%c2_58, %c8_59, %c0_60] : memref<18x32x4xbf16, #tpu.memory_space<vmem>>, vector<16x16x4xbf16>
    %c0_61 = arith.constant 0 : index
    %c0_62 = arith.constant 0 : index
    %c28 = arith.constant 28 : index
    %37 = vector.load %arg10[%c0_61, %c0_62, %c28] : memref<16x16x36xbf16, #tpu.memory_space<vmem>>, vector<16x16x4xbf16>
    tpu.vector_store %arg10[%c0_61, %c0_62, %c28], %36 {strides = array<i32>} : memref<16x16x36xbf16, #tpu.memory_space<vmem>>, vector<16x16x4xbf16>,
    %c2_63 = arith.constant 2 : index
    %c9_64 = arith.constant 9 : index
    %c0_65 = arith.constant 0 : index
    %38 = vector.load %arg9[%c2_63, %c9_64, %c0_65] : memref<18x32x4xbf16, #tpu.memory_space<vmem>>, vector<16x16x4xbf16>
    %c0_66 = arith.constant 0 : index
    %c0_67 = arith.constant 0 : index
    %c32 = arith.constant 32 : index
    %39 = vector.load %arg10[%c0_66, %c0_67, %c32] : memref<16x16x36xbf16, #tpu.memory_space<vmem>>, vector<16x16x4xbf16>
    tpu.vector_store %arg10[%c0_66, %c0_67, %c32], %38 {strides = array<i32>} : memref<16x16x36xbf16, #tpu.memory_space<vmem>>, vector<16x16x4xbf16>,
    %c0_68 = arith.constant 0 : index
    %c0_69 = arith.constant 0 : index
    %c0_70 = arith.constant 0 : index
    %40 = vector.load %arg10[%c0_68, %c0_69, %c0_70] : memref<16x16x36xbf16, #tpu.memory_space<vmem>>, vector<16x16x36xbf16>
    %41 = vector.shape_cast %40 : vector<16x16x36xbf16> to vector<256x36xbf16>
    %c0_71 = arith.constant 0 : index
    %c0_72 = arith.constant 0 : index
    %42 = vector.load %arg4[%c0_71, %c0_72] : memref<36x4xbf16, #tpu.memory_space<vmem>>, vector<36x4xbf16>
    %cst_73 = arith.constant dense<0.000000e+00> : vector<256x4xf32>
    %43 = tpu.matmul %41, %42, %cst_73 {dimension_numbers = #tpu.dot_dimension_numbers<[1], [0], [0], [1], [0, 0, 1, 1], [], []>} : vector<256x36xbf16>, vector<36x4xbf16>, vector<256x4xf32> -> vector<256x4xf32>
    %c0_74 = arith.constant 0 : index
    %c0_75 = arith.constant 0 : index
    %44 = vector.load %arg5[%c0_74, %c0_75] : memref<1x4xf32, #tpu.memory_space<vmem>>, vector<1x4xf32>
    %45 = vector.broadcast %44 : vector<1x4xf32> to vector<256x4xf32>
    %46 = arith.addf %43, %45 : vector<256x4xf32>
    %cst_76 = arith.constant 0.000000e+00 : f32
    %47 = vector.broadcast %cst_76 : f32 to vector<256x4xf32>
    %48 = arith.maximumf %46, %47 : vector<256x4xf32>
    %49 = arith.truncf %48 : vector<256x4xf32> to vector<256x4xbf16>
    %c0_77 = arith.constant 0 : index
    %c0_78 = arith.constant 0 : index
    %50 = vector.load %arg6[%c0_77, %c0_78] : memref<4x16xbf16, #tpu.memory_space<vmem>>, vector<4x16xbf16>
    %cst_79 = arith.constant dense<0.000000e+00> : vector<256x16xf32>
    %51 = tpu.matmul %49, %50, %cst_79 {dimension_numbers = #tpu.dot_dimension_numbers<[1], [0], [0], [1], [0, 0, 1, 1], [], []>} : vector<256x4xbf16>, vector<4x16xbf16>, vector<256x16xf32> -> vector<256x16xf32>
    %c0_80 = arith.constant 0 : index
    %c0_81 = arith.constant 0 : index
    %52 = vector.load %arg7[%c0_80, %c0_81] : memref<1x16xf32, #tpu.memory_space<vmem>>, vector<1x16xf32>
    %53 = vector.broadcast %52 : vector<1x16xf32> to vector<256x16xf32>
    %54 = arith.addf %51, %53 : vector<256x16xf32>
    %c0_82 = arith.constant 0 : index
    %c0_83 = arith.constant 0 : index
    %c0_84 = arith.constant 0 : index
    %c0_85 = arith.constant 0 : index
    %55 = vector.load %arg1[%c0_82, %c0_83, %c0_84, %c0_85] : memref<1x16x16x16xf32, #tpu.memory_space<vmem>>, vector<1x16x16x16xf32>
    %56 = vector.shape_cast %55 : vector<1x16x16x16xf32> to vector<16x16x16xf32>
    %57 = vector.shape_cast %56 : vector<16x16x16xf32> to vector<256x16xf32>
    %58 = arith.addf %54, %57 : vector<256x16xf32>
    %cst_86 = arith.constant 0.000000e+00 : f32
    %59 = vector.broadcast %cst_86 : f32 to vector<256x16xf32>
    %60 = arith.maximumf %58, %59 : vector<256x16xf32>
    %61 = vector.shape_cast %60 : vector<256x16xf32> to vector<16x16x16xf32>
    %c0_87 = arith.constant 0 : index
    %c0_88 = arith.constant 0 : index
    %c0_89 = arith.constant 0 : index
    %c0_90 = arith.constant 0 : index
    %62 = vector.load %arg8[%c0_87, %c0_88, %c0_89, %c0_90] : memref<1x16x16x16xf32, #tpu.memory_space<vmem>>, vector<1x16x16x16xf32>
    %63 = vector.shape_cast %62 : vector<1x16x16x16xf32> to vector<16x16x16xf32>
    %64 = vector.shape_cast %61 : vector<16x16x16xf32> to vector<1x16x16x16xf32>
    tpu.vector_store %arg8[%c0_87, %c0_88, %c0_89, %c0_90], %64 {strides = array<i32>} : memref<1x16x16x16xf32, #tpu.memory_space<vmem>>, vector<1x16x16x16xf32>,
    return
  }
  func.func @transform_0(%arg0: i32) -> (i32, i32, i32, i32) {
    %c0_i32 = arith.constant 0 : i32
    %c0_i32_0 = arith.constant 0 : i32
    %c0_i32_1 = arith.constant 0 : i32
    %c0_i32_2 = arith.constant 0 : i32
    return %arg0, %c0_i32, %c0_i32_0, %c0_i32_1 : i32, i32, i32, i32
  }
  func.func @transform_1(%arg0: i32) -> (i32, i32) {
    %c0_i32 = arith.constant 0 : i32
    %c0_i32_0 = arith.constant 0 : i32
    %c0_i32_1 = arith.constant 0 : i32
    return %c0_i32, %c0_i32_0 : i32, i32
  }
  func.func @transform_2(%arg0: i32) -> (i32, i32) {
    %c0_i32 = arith.constant 0 : i32
    %c0_i32_0 = arith.constant 0 : i32
    %c0_i32_1 = arith.constant 0 : i32
    return %c0_i32, %c0_i32_0 : i32, i32
  }
  func.func @transform_3(%arg0: i32) -> (i32, i32) {
    %c0_i32 = arith.constant 0 : i32
    %c0_i32_0 = arith.constant 0 : i32
    %c0_i32_1 = arith.constant 0 : i32
    return %c0_i32, %c0_i32_0 : i32, i32
  }
  func.func @transform_4(%arg0: i32) -> (i32, i32) {
    %c0_i32 = arith.constant 0 : i32
    %c0_i32_0 = arith.constant 0 : i32
    %c0_i32_1 = arith.constant 0 : i32
    return %c0_i32, %c0_i32_0 : i32, i32
  }
  func.func @transform_5(%arg0: i32) -> (i32, i32) {
    %c0_i32 = arith.constant 0 : i32
    %c0_i32_0 = arith.constant 0 : i32
    %c0_i32_1 = arith.constant 0 : i32
    return %c0_i32, %c0_i32_0 : i32, i32
  }
  func.func @transform_6(%arg0: i32) -> (i32, i32) {
    %c0_i32 = arith.constant 0 : i32
    %c0_i32_0 = arith.constant 0 : i32
    %c0_i32_1 = arith.constant 0 : i32
    return %c0_i32, %c0_i32_0 : i32, i32
  }
  func.func @transform_7(%arg0: i32) -> (i32, i32, i32, i32) {
    %c0_i32 = arith.constant 0 : i32
    %c0_i32_0 = arith.constant 0 : i32
    %c0_i32_1 = arith.constant 0 : i32
    %c0_i32_2 = arith.constant 0 : i32
    return %arg0, %c0_i32, %c0_i32_0, %c0_i32_1 : i32, i32, i32, i32
  }
}

</mosaic_0001>

<bundles_post_ra>
// kernel: tpu_custom_call.1
= control target key start
LH: loop header
LB: loop body
LE: loop exit
PB: predicated region body
PF: predicated region fallthrough
CT: control target
= control target key end

     0   :  { %12 = vsyncpa [#allocation5], 0  ;;  %s6231_s0 = inlined_call_operand.hbm [shape: f32[2,16,16,16], index: 0, kind: input, shape index: {}]   ;;  %s6232_s1 = inlined_call_operand.vmem [shape: bf16[16,4], index: 1, kind: input, shape index: {}]   ;;  %s6233_s2 = inlined_call_operand.vmem [shape: f32[1,4], index: 2, kind: input, shape index: {}]   ;;  %s6234_s3 = inlined_call_operand.vmem [shape: bf16[36,4], index: 3, kind: input, shape index: {}]   ;;  %s6235_s4 = inlined_call_operand.vmem [shape: f32[1,4], index: 4, kind: input, shape index: {}]   ;;  %s6236_s5 = inlined_call_operand.vmem [shape: bf16[4,16], index: 5, kind: input, shape index: {}]   ;;  %s6237_s6 = inlined_call_operand.vmem [shape: f32[1,16], index: 6, kind: input, shape index: {}]   ;;  %s6238_s7 = inlined_call_operand.hbm [shape: f32[2,16,16,16], index: 7, kind: output, shape index: {}]  }
   0x1   :  { %14 = vsyncpa [#allocation5 + $0x1], 0 }
   0x2   :  { %15 = vsyncpa [#allocation6], 0 }
   0x3   :  { %17 = vsyncpa [#allocation6 + $0x1], 0  ;;  %s4727_s24 = smov 0   ;;  %s4729_s25 = smov 0  }
   0x4   :  { %s4731_s26 = smov 0   ;;  %s4733_s27 = smov 0  }
   0x5 LB: > { %s4748_s28 = sadd.s32 4294967295, %s4671_s27   ;;  %s4277_s29 = sadd.s32 4294967294, %s4671_s27   ;;  %s4671_s27 = sphi %s4733_s27, %s6300_s27   ;;  %s4667_s26 = sphi %s4731_s26, %s6299_s26   ;;  %s4663_s25 = sphi %s4729_s25, %s6298_s25   ;;  %s4659_s24 = sphi %s4727_s24, %s6297_s24  }
   0x6   : > { %s4752_s30 = sadd.s32 1, %s4671_s27   ;;  %s30_s8 = sadd.s32 1, %s4667_s26 }
   0x7   : > { %s27_s9 = ssub.s32 %s4671_s27, %s4752_s30  ;;  %p37_p0 = scmp.ne.s32.totalorder %s4667_s26, %s4663_s25 }
   0x8   : > { %p28_p1 = scmp.eq.s32.totalorder %s27_s9, 0  ;;  %p38_p2 = scmp.eq.s32.totalorder %s4671_s27, 0 }
   0x9   : > { %p43_p3 = scmp.ne.s32.totalorder %s4663_s25, %s4659_s24  ;;  %p44_p4 = scmp.eq.s32.totalorder %s4748_s28, 0 }
   0xa   : > { %s4764_s10 = scalar_select %p28_p1, %s4667_s26, %s30_s8  }
   0xb   : > { %p4766_p5 = por %p38_p2, %p37_p0  ;;  %p4770_p6 = por %p44_p4, %p43_p3 }
   0xc   : > { %p193_p7 = scmp.eq.s32.totalorder %s4748_s28, 1  ;;  %p199_p8 = scmp.eq.s32.totalorder %s4277_s29, 1 }
   0xd   : > { %p4523_p10 = scmp.lt.s32.totalorder %s4671_s27, 2  ;;  %s237_s15 = sand.u32 1, %s4667_s26  }
   0xe   : > { %p4777_p11 = por %p193_p7, %p37_p0  ;;  %p4781_p12 = por %p199_p8, %p43_p3 }
   0xf   : > { %s4346_s16 = sshll.u32 %s4671_s27, 12  ;;  %s4280_s17 = sshll.u32 %s237_s15, 8 }
  0x10   : > { %s6244_s13 = scalar_select %p4777_p11, 1, 0 }
  0x11   : > { %s6245_s14 = scalar_select %p4781_p12, 1, 0 }
  0x12   : > { %s4790_s20 = scalar_lea.hbm %s6231_s0, %s4346_s16  ;;  %s241_s21 = scalar_lea.vmem [#allocation4], %s4280_s17 }
  0x13   : > { %s248_s22 = sshll.u32 %s241_s21, 4  ;;  %p4794_p13 = pnand %p4523_p10, %p4766_p5  ;;  %s4798_s22 = int_to_ptr.vmem [resolvable:$true] %s248_s22 }
  0x14   : > { %s4800_s29 = scalar_lea.sflag [#allocation5], %s237_s15  ;;  %s4575_s8 = scalar_lea.hbm %s4790_s20, 4096 }
  0x15   : > { %p4576_p0 = scmp.ne.s32.totalorder %s4790_s20, %s4575_s8  ;;  %p4577_p1 = pneg %p4794_p13 }
  0x16   : > { %s4580_s16 = scalar_lea.hbm %s6231_s0, 8192  ;;  %p4581_p4 = scmp.lt.u32.totalorder %s4790_s20, %s6231_s0 }
  0x17   : > { %p4578_p2 = pnand %p4577_p1, %p4576_p0  ;;  %p4582_p5 = scmp.lt.u32.totalorder %s4580_s16, %s4575_s8 }
  0x18   : > { %p4584_p8 = scmp.lt.u32.totalorder %s4575_s8, %s4790_s20 }
  0x19   : > { %p4579_p3 = pneg %p4578_p2  ;;  %p4583_p7 = por %p4582_p5, %p4581_p4 }
  0x1b   : > { %p4585_p10 = por %p4584_p8, %p4583_p7 }
  0x1d   : > { %p4586_p9 = pnand %p4585_p10, %p4579_p3 }
  0x1f   : > { %4589 = shalt.err (!%p4586_p9)
}
  0x20   : > { %s4590_s15 = scalar_lea.vmem %s4798_s22, 4096  ;;  %s4673_s19 = smov [#allocation4]  }
  0x21   : > { %p4591_p0 = scmp.ne.s32.totalorder %s4798_s22, %s4590_s15  ;;  %s4595_s21 = sshll.u32 %s4673_s19, 4  ;;  %s4596_s21 = int_to_ptr.vmem [resolvable:$false] %s4595_s21 }
  0x22   : > { %s4597_s9 = scalar_lea.vmem %s4596_s21, 8192  ;;  %p4598_p11 = scmp.lt.s32.totalorder %s4798_s22, %s4596_s21 }
  0x23   : > { %p4593_p2 = pnand %p4591_p0, %p4577_p1  ;;  %p4599_p4 = scmp.lt.s32.totalorder %s4597_s9, %s4590_s15 }
  0x25   : > { %p4594_p12 = pneg %p4593_p2  ;;  %p4600_p5 = por %p4599_p4, %p4598_p11 }
  0x27   : > { %p4601_p7 = pnand %p4600_p5, %p4594_p12 }
  0x29   : > { %4604 = shalt.err (!%p4601_p7)
}
  0x2a   : > { %s4674_s8 = smov 128   ;;  %s4675_s11 = smov 8  }
  0x2b   : > { %4518 = dma.hbm_to_vmem [thread:$0]  (!%p4794_p13), %s4790_s20, 4096, %s4798_s22, %s4800_s29, %s4674_s8, %s4674_s8, %s4675_s11  }
  0x2c   : > { %p4283_p9 = scmp.ge.s32.totalorder %s4671_s27, 1  ;;  %p256_p1 = scmp.lt.s32.totalorder %s4671_s27, 3 }
  0x2e   : > { %p257_p3 = pnand %p4283_p9, %p256_p1 }
  0x2f   : > { %s4831_s16 = sand.u32 (!%p257_p3), 1, %s4663_s25  }
  0x30   : > { %260 = sbr.rel (%p257_p3) target bundleno = 1191 (0x4a7), region = 48  ;;  %s4284_s17 = sshll.u32 (!%p257_p3), %s4831_s16, 8 }
  0x31   : > { %s263_s18 = scalar_lea.sflag (!%p257_p3), [#allocation5], %s4831_s16  ;;  %s4837_s15 = scalar_lea.vmem (!%p257_p3), [#allocation4], %s4284_s17 }
  0x37   : > { %4650 = dma.done.wait (%p4770_p6), %s263_s18, 4096  }
  0x38   : > { %4652 = vsyncadd (%p4770_p6), %s263_s18, 4294963200  ;;  %v4569_v0 = vld [vmem:[%s6232_s1] sm:$0xff]   ;;  %v299_v2 = vld [vmem:[%s4837_s15 + $0x8] sm:$0xff]  ;;  %vm6240_vm0 = vcmask 130048   ;;  %vm603_vm1 = vcmask 31744   ;;  %v4676_v49 = vmov 0  }
  0x39   : > { %v298_v1 = vld [vmem:[%s4837_s15] sm:$0xff]  ;;  %v300_v3 = vld [vmem:[%s4837_s15 + $0x10] sm:$0xff]  ;;  %4401 = vmatprep.subr.bf16.mxu0 %v4569_v0  ;;  %4507 = vmatprep.subr.bf16.mxu1 %v4569_v0  ;;  %v301_v5 = vld [vmem:[%s4837_s15 + $0x18] sm:$0xff]  ;;  %604 = vst.msk [vmem:[#allocation2] sm:$0xff] %vm603_vm1, %v4676_v49  ;;  %vm666_vm2 = vcmask 28676   ;;  %vm609_vm5 = vcmask 27651  }
  0x3a   : > { %v330_v4 = vpack.c.bf16 %v299_v2, %v298_v1  ;;  %v314_v6 = vld [vmem:[%s4837_s15 + $0x80] sm:$0xff]  ;;  %v315_v7 = vld [vmem:[%s4837_s15 + $0x88] sm:$0xff]  ;;  %4402 = vmatpush3.bf16.msra.mxu0 %v4569_v0  ;;  %4508 = vmatpush3.bf16.msra.mxu1 %v4569_v0  ;;  %v331_v8 = vpack.c.bf16 %v301_v5, %v300_v3  ;;  %v316_v10 = vld [vmem:[%s4837_s15 + $0x90] sm:$0xff]  ;;  %605 = vst.msk [vmem:[#allocation2 + $0x8] sm:$0xff] %vm603_vm1, %v4676_v49  ;;  %vm667_vm3 = vsmask.f32 4352 }
  0x3b   : > { %v338_v9 = vpack.c.bf16 %v315_v7, %v314_v6  ;;  %v317_v11 = vld [vmem:[%s4837_s15 + $0x98] sm:$0xff]  ;;  %v302_v12 = vld [vmem:[%s4837_s15 + $0x20] sm:$0xff]  ;;  %v303_v14 = vld [vmem:[%s4837_s15 + $0x28] sm:$0xff]  ;;  %607 = vst.msk [vmem:[#allocation2 + $0x110] sm:$0xff] %vm603_vm1, %v4676_v49  ;;  %vm610_vm6 = vsmask.f32 7950 }
  0x3c   : > { %4403 = vmatprep.mubr.msk.bf16.mxu0 %vm6240_vm0, %v330_v4  ;;  %v339_v13 = vpack.c.bf16 %v317_v11, %v316_v10  ;;  %v332_v15 = vpack.c.bf16 %v303_v14, %v302_v12  ;;  %v318_v16 = vld [vmem:[%s4837_s15 + $0xa0] sm:$0xff]  ;;  %v319_v17 = vld [vmem:[%s4837_s15 + $0xa8] sm:$0xff]  ;;  %v304_v18 = vld [vmem:[%s4837_s15 + $0x30] sm:$0xff]  ;;  %608 = vst.msk [vmem:[#allocation2 + $0x118] sm:$0xff] %vm603_vm1, %v4676_v49  ;;  %vm1368_vm7 = vsmask.f32 3328 }
  0x3d   : > { %4419 = vmatprep.mubr.msk.bf16.mxu1 %vm6240_vm0, %v338_v9  ;;  %4404 = vmatmul.mubr.msk.bf16.vlgmr.msra.gmra.mrb[0].mxu0 %vm6240_vm0, %v331_v8  ;;  %v305_v19 = vld [vmem:[%s4837_s15 + $0x38] sm:$0xff]  ;;  %v340_v20 = vpack.c.bf16 %v319_v17, %v318_v16  ;;  %v320_v21 = vld [vmem:[%s4837_s15 + $0xb0] sm:$0xff]  ;;  %v306_v23 = vld [vmem:[%s4837_s15 + $0x40] sm:$0xff]  ;;  %vm1222_vm9 = vcmask 1043456   ;;  %s4677_s12 = smov 8   ;;  %s4678_s23 = smov 4  }
  0x3e   : > { %4420 = vmatmul.mubr.msk.bf16.vlgmr.msra.gmra.mrb[0].mxu1 %vm6240_vm0, %v339_v13  ;;  %4407 = vmatprep.mubr.msk.bf16.mxu0 %vm6240_vm0, %v332_v15  ;;  %v321_v22 = vld [vmem:[%s4837_s15 + $0xb8] sm:$0xff]  ;;  %v307_v24 = vld [vmem:[%s4837_s15 + $0x48] sm:$0xff]  ;;  %v322_v25 = vld [vmem:[%s4837_s15 + $0xc0] sm:$0xff]  ;;  %v333_v27 = vpack.c.bf16 %v305_v19, %v304_v18  ;;  %vm788_vm10 = vcmask 31748   ;;  %vm790_vm11 = vcmask 27648   ;;  %s4679_s21 = smov 28  }
  0x3f   : > { %4423 = vmatprep.mubr.msk.bf16.mxu1 %vm6240_vm0, %v340_v20  ;;  %v323_v26 = vld [vmem:[%s4837_s15 + $0xc8] sm:$0xff]  ;;  %v341_v28 = vpack.c.bf16 %v321_v22, %v320_v21  ;;  %v334_v29 = vpack.c.bf16 %v307_v24, %v306_v23  ;;  %v308_v31 = vld [vmem:[%s4837_s15 + $0x50] sm:$0xff]  ;;  %v309_v32 = vld [vmem:[%s4837_s15 + $0x58] sm:$0xff]  ;;  %s4680_s9 = smov 16   ;;  %s4681_s8 = smov 24   ;;  %vm1319_vm12 = vcmask 64544  }
  0x40   : > { %v342_v30 = vpack.c.bf16 %v323_v26, %v322_v25  ;;  %v324_v33 = vld [vmem:[%s4837_s15 + $0xd0] sm:$0xff]  ;;  %v325_v34 = vld [vmem:[%s4837_s15 + $0xd8] sm:$0xff]  ;;  %v310_v35 = vld [vmem:[%s4837_s15 + $0x60] sm:$0xff]  ;;  %v335_v39 = vpack.c.bf16 %v309_v32, %v308_v31  ;;  %s4682_s11 = smov 32   ;;  %s4683_s18 = smov 12   ;;  %vm1689_vm13 = vcmask 97344  }
  0x41   : > { %v311_v36 = vld [vmem:[%s4837_s15 + $0x68] sm:$0xff]  ;;  %v326_v37 = vld [vmem:[%s4837_s15 + $0xe0] sm:$0xff]  ;;  %v343_v40 = vpack.c.bf16 %v325_v34, %v324_v33  ;;  %v312_v43 = vld [vmem:[%s4837_s15 + $0x70] sm:$0xff]  ;;  %s4684_s20 = smov 20   ;;  %vm2058_vm14 = vcmask 130144   ;;  %vm2235_vm15 = vcmask 162944  }
  0x42   : > { %v327_v38 = vld [vmem:[%s4837_s15 + $0xe8] sm:$0xff]  ;;  %v336_v41 = vpack.c.bf16 %v311_v36, %v310_v35  ;;  %v313_v44 = vld [vmem:[%s4837_s15 + $0x78] sm:$0xff]  ;;  %v328_v45 = vld [vmem:[%s4837_s15 + $0xf0] sm:$0xff]  ;;  %p6294_p11 = scmp.ne.s32.totalorder %s6244_s13, 0 }
  0x43   : > { %v344_v42 = vpack.c.bf16 %v327_v38, %v326_v37  ;;  %v329_v46 = vld [vmem:[%s4837_s15 + $0xf8] sm:$0xff]  ;;  %v337_v47 = vpack.c.bf16 %v313_v44, %v312_v43  ;;  %vm4899_vm4 = vmand %vm666_vm2, %vm667_vm3  ;;  %v669_v51 = vld [vmem:[#allocation2 + $0x8] sm:$0x10]  ;;  %vm6241_vm2 = vcmask 195744  }
  0x44   : > { %v345_v48 = vpack.c.bf16 %v329_v46, %v328_v45  ;;  %v670_v52 = vsel %vm4899_vm4, 0, %v669_v51  ;;  %v1336_v53 = vld [vmem:[#allocation2] sm:$0xf0]  ;;  %v612_v59 = vld [vmem:[#allocation2] sm:$0x8]  ;;  %vm4905_vm8 = vmand %vm609_vm5, %vm610_vm6  ;;  %vm2974_vm5 = vcmask 228544  }
  0x45   : > { %4408 = vmatmul.mubr.msk.bf16.gmra.mrb[4].mxu0 %vm6240_vm0, %v333_v27  ;;  %671 = vst [vmem:[#allocation2 + $0x8] sm:$0x10] %v670_v52  ;;  %v1370_v55 = vshrl.u32 %v1336_v53, 16  ;;  %v1373_v56 = vshll.u32 %v1336_v53, 16  ;;  %v1158_v1 = vld [vmem:[#allocation2] sm:$0xf0] }
  0x46   : > { %4424 = vmatmul.mubr.msk.bf16.gmra.mrb[4].mxu1 %vm6240_vm0, %v341_v28  ;;  %4411 = vmatprep.mubr.msk.bf16.mxu0 %vm6240_vm0, %v334_v29  ;;  %v613_v2 = vsel %vm4905_vm8, 0, %v612_v59  ;;  %v1159_v3 = vld [vmem:[#allocation2 + $0x8] sm:$0xf]  ;;  %v1223_v4 = vrot.slane %v1158_v1, 4  ;;  %v618_v10 = vld [vmem:[#allocation2 + $0x20] sm:$0x8] }
  0x47   : > { %4427 = vmatprep.mubr.msk.bf16.mxu1 %vm6240_vm0, %v342_v30  ;;  %v1372_v61 = vrot.slane %v1370_v55, 4  ;;  %v1375_v62 = vrot.slane %v1373_v56, 5  ;;  %614 = vst [vmem:[#allocation2] sm:$0x8] %v613_v2  ;;  %v1224_v7 = vrot.slane %v1159_v3, 4  ;;  %v619_v11 = vsel %vm4905_vm8, 0, %v618_v10 }
  0x48   : > { %620 = vst [vmem:[#allocation2 + $0x20] sm:$0x8] %v619_v11  ;;  %v675_v12 = vld [vmem:[#allocation2 + $0x28] sm:$0x10]  ;;  %v642_v14 = vld [vmem:[#allocation2 + $0xa0] sm:$0x8] }
  0x49   : > { %v1376_v5 = vor.u32 %v1375_v62, %v1372_v61  ;;  %v1225_v9 = vsel %vm1222_vm9, %v1223_v4, %v1224_v7  ;;  %v676_v13 = vsel %vm4899_vm4, 0, %v675_v12  ;;  %v643_v15 = vsel %vm4905_vm8, 0, %v642_v14  ;;  %v699_v16 = vld [vmem:[#allocation2 + $0xa8] sm:$0x10]  ;;  %v672_v18 = vld [vmem:[#allocation2 + $0x18] sm:$0x10] }
  0x4a   : > { %1271 = vrot.lane.b32.xlu0 %v1225_v9, %s4678_s23  ;;  %677 = vst [vmem:[#allocation2 + $0x28] sm:$0x10] %v676_v13  ;;  %644 = vst [vmem:[#allocation2 + $0xa0] sm:$0x8] %v643_v15  ;;  %v700_v17 = vsel %vm4899_vm4, 0, %v699_v16  ;;  %v673_v19 = vsel %vm4899_vm4, 0, %v672_v18 }
  0x4b   : > { %701 = vst [vmem:[#allocation2 + $0xa8] sm:$0x10] %v700_v17  ;;  %674 = vst [vmem:[#allocation2 + $0x18] sm:$0x10] %v673_v19  ;;  %v639_v20 = vld [vmem:[#allocation2 + $0x90] sm:$0x8] }
  0x4c   : > { %v1337_v54 = vld [vmem:[#allocation2 + $0x8] sm:$0x1f]  ;;  %v640_v21 = vsel %vm4905_vm8, 0, %v639_v20  ;;  %v615_v22 = vld [vmem:[#allocation2 + $0x10] sm:$0x8]  ;;  %vm3151_vm6 = vcmask 261344  }
  0x4d   : > { %4412 = vmatmul.mubr.msk.bf16.gmra.mrb[8].mxu0 %vm6240_vm0, %v335_v39  ;;  %v1378_v57 = vshrl.u32 %v1337_v54, 16  ;;  %v1381_v58 = vshll.u32 %v1337_v54, 16  ;;  %641 = vst [vmem:[#allocation2 + $0x90] sm:$0x8] %v640_v21  ;;  %v616_v23 = vsel %vm4905_vm8, 0, %v615_v22 }
  0x4e   : > { %4428 = vmatmul.mubr.msk.bf16.gmra.mrb[8].mxu1 %vm6240_vm0, %v343_v40  ;;  %4415 = vmatprep.mubr.msk.bf16.mxu0 %vm6240_vm0, %v336_v41  ;;  %617 = vst [vmem:[#allocation2 + $0x10] sm:$0x8] %v616_v23  ;;  %v696_v24 = vld [vmem:[#allocation2 + $0x98] sm:$0x10]  ;;  %v624_v26 = vld [vmem:[#allocation2 + $0x40] sm:$0x8] }
  0x4f   : > { %4431 = vmatprep.mubr.msk.bf16.mxu1 %vm6240_vm0, %v344_v42  ;;  %v1380_v63 = vrot.slane %v1378_v57, 4  ;;  %v1383_v0 = vrot.slane %v1381_v58, 5  ;;  %v697_v25 = vsel %vm4899_vm4, 0, %v696_v24  ;;  %v625_v27 = vsel %vm4905_vm8, 0, %v624_v26  ;;  %v681_v28 = vld [vmem:[#allocation2 + $0x48] sm:$0x10] }
  0x50   : > { %698 = vst [vmem:[#allocation2 + $0x98] sm:$0x10] %v697_v25  ;;  %626 = vst [vmem:[#allocation2 + $0x40] sm:$0x8] %v625_v27  ;;  %v682_v29 = vsel %vm4899_vm4, 0, %v681_v28 }
  0x51   : > { %v1384_v6 = vor.u32 %v1383_v0, %v1380_v63  ;;  %683 = vst [vmem:[#allocation2 + $0x48] sm:$0x10] %v682_v29  ;;  %v648_v30 = vld [vmem:[#allocation2 + $0xc0] sm:$0x8]  ;;  %v621_v32 = vld [vmem:[#allocation2 + $0x30] sm:$0x8] }
  0x52   : > { %v649_v31 = vsel %vm4905_vm8, 0, %v648_v30  ;;  %v678_v33 = vld [vmem:[#allocation2 + $0x38] sm:$0x10]  ;;  %v705_v34 = vld [vmem:[#allocation2 + $0xc8] sm:$0x10]  ;;  %v622_v35 = vsel %vm4905_vm8, 0, %v621_v32 }
  0x53   : > { %v1385_v8 = vsel %vm1368_vm7, %v1376_v5, %v1384_v6  ;;  %650 = vst [vmem:[#allocation2 + $0xc0] sm:$0x8] %v649_v31  ;;  %v679_v36 = vsel %vm4899_vm4, 0, %v678_v33  ;;  %v706_v37 = vsel %vm4899_vm4, 0, %v705_v34  ;;  %623 = vst [vmem:[#allocation2 + $0x30] sm:$0x8] %v622_v35 }
  0x54   : > { %1641 = vrot.lane.b32.xlu1 %v1385_v8, %s4677_s12  ;;  %680 = vst [vmem:[#allocation2 + $0x38] sm:$0x10] %v679_v36  ;;  %707 = vst [vmem:[#allocation2 + $0xc8] sm:$0x10] %v706_v37  ;;  %v4946_v38 = vld [vmem:[%s6233_s2] ss:$0 sm:$0xff] }
  0x55   : > { %4416 = vmatmul.mubr.msk.bf16.gmra.mrb[12].mxu0 %vm6240_vm0, %v337_v47  ;;  %v645_v39 = vld [vmem:[#allocation2 + $0xb0] sm:$0x8]  ;;  %v702_v52 = vld [vmem:[#allocation2 + $0xb8] sm:$0x10]  ;;  %v823_v29 = vld [vmem:[#allocation2 + $0x8] sm:$0xf] }
  0x56   : > { %4432 = vmatmul.mubr.msk.bf16.gmra.mrb[12].mxu1 %vm6240_vm0, %v345_v48  ;;  %v646_v40 = vsel %vm4905_vm8, 0, %v645_v39  ;;  %v703_v1 = vsel %vm4899_vm4, 0, %v702_v52  ;;  %v4976_v34 = vld [vmem:[#allocation2] sm:$0xf8]  ;;  %v863_v37 = vshrl.u32 %v823_v29, 16  ;;  %v866_v39 = vshll.u32 %v823_v29, 16 }
  0x57   : > { %647 = vst [vmem:[#allocation2 + $0xb0] sm:$0x8] %v646_v40  ;;  %704 = vst [vmem:[#allocation2 + $0xb8] sm:$0x10] %v703_v1  ;;  %vm3520_vm0 = vcmask 294144  }
 0x110   : > { %v4405_v41 = vpop.f32.mrb[0].mxu0 }
 0x111   : > { %v4421_v42 = vpop.f32.mrb[0].mxu1  ;;  %v453_v43 = vadd.f32 %v4405_v41, %v4946_v38  ;;  %v444_v44 = vpop.f32.mrb[1].mxu0 }
 0x112   : > { %v517_v45 = vadd.f32 %v4421_v42, %v4946_v38  ;;  %v508_v46 = vpop.f32.mrb[1].mxu1  ;;  %v445_v47 = vadd.f32 %v4946_v38, %v444_v44  ;;  %v4406_v48 = vpop.f32.mrb[2].mxu0  ;;  %v855_v42 = vshrl.u32 %v4976_v34, 16 }
 0x113   : > { %v509_v49 = vadd.f32 %v4946_v38, %v508_v46  ;;  %v4422_v51 = vpop.f32.mrb[2].mxu1  ;;  %v456_v54 = vadd.f32 %v4406_v48, %v4946_v38  ;;  %v447_v55 = vpop.f32.mrb[3].mxu0  ;;  %v573_v62 = vmax.f32 %v453_v43, 0.0 }
 0x114   : > { %v589_v53 = vmax.f32 %v517_v45, 0.0  ;;  %v520_v56 = vadd.f32 %v4422_v51, %v4946_v38  ;;  %v511_v57 = vpop.f32.mrb[3].mxu1  ;;  %v448_v59 = vadd.f32 %v4946_v38, %v447_v55  ;;  %v571_v2 = vmax.f32 %v445_v47, 0.0 }
 0x115   : > { %v587_v58 = vmax.f32 %v509_v49, 0.0  ;;  %v512_v61 = vadd.f32 %v4946_v38, %v511_v57  ;;  %v574_v63 = vmax.f32 %v456_v54, 0.0  ;;  %v4979_v49 = vrot.slane %v863_v37, 3 }
 0x116   : > { %v590_v0 = vmax.f32 %v520_v56, 0.0  ;;  %v572_v3 = vmax.f32 %v448_v59, 0.0  ;;  %v4981_v51 = vrot.slane %v866_v39, 4  ;;  %v4983_v56 = vrot.slane %v855_v42, 3 }
 0x117   : > { %v588_v4 = vmax.f32 %v512_v61, 0.0  ;;  %v724_v5 = vpack.c.bf16 %v574_v63, %v573_v62  ;;  %v858_v57 = vshll.u32 %v4976_v34, 16 }
 0x118   : > { %v732_v6 = vpack.c.bf16 %v590_v0, %v589_v53  ;;  %v723_v7 = vpack.c.bf16 %v572_v3, %v571_v2  ;;  %v4409_v9 = vpop.f32.mrb[4].mxu0 }
 0x119   : > { %v731_v8 = vpack.c.bf16 %v588_v4, %v587_v58  ;;  %v4425_v10 = vpop.f32.mrb[4].mxu1  ;;  %v756_v11 = vrot.slane %v724_v5, 4  ;;  %v469_v13 = vadd.f32 %v4409_v9, %v4946_v38  ;;  %v460_v14 = vpop.f32.mrb[5].mxu0 }
 0x11a   : > { %v764_v12 = vrot.slane %v732_v6, 4  ;;  %v533_v15 = vadd.f32 %v4425_v10, %v4946_v38  ;;  %v524_v16 = vpop.f32.mrb[5].mxu1  ;;  %v755_v17 = vrot.slane %v723_v7, 4  ;;  %v461_v19 = vadd.f32 %v4946_v38, %v460_v14  ;;  %v4410_v20 = vpop.f32.mrb[6].mxu0 }
 0x11b   : > { %v763_v18 = vrot.slane %v731_v8, 4  ;;  %v525_v21 = vadd.f32 %v4946_v38, %v524_v16  ;;  %v4426_v22 = vpop.f32.mrb[6].mxu1  ;;  %792 = vst.msk [vmem:[#allocation2 + $0x20] sm:$0xf0] %vm788_vm10, %v756_v11  ;;  %v577_v23 = vmax.f32 %v469_v13, 0.0  ;;  %v472_v24 = vadd.f32 %v4410_v20, %v4946_v38  ;;  %v463_v25 = vpop.f32.mrb[7].mxu0 }
 0x11c   : > { %793 = vst.msk [vmem:[#allocation2 + $0x28] sm:$0xf] %vm790_vm11, %v756_v11  ;;  %809 = vst.msk [vmem:[#allocation2 + $0xa8] sm:$0xf] %vm790_vm11, %v764_v12  ;;  %v593_v26 = vmax.f32 %v533_v15, 0.0  ;;  %v536_v27 = vadd.f32 %v4426_v22, %v4946_v38  ;;  %v527_v28 = vpop.f32.mrb[7].mxu1  ;;  %v464_v31 = vadd.f32 %v4946_v38, %v463_v25 }
 0x11d   : > { %808 = vst.msk [vmem:[#allocation2 + $0xa0] sm:$0xf0] %vm788_vm10, %v764_v12  ;;  %789 = vst.msk [vmem:[#allocation2 + $0x10] sm:$0xf0] %vm788_vm10, %v755_v17  ;;  %v575_v30 = vmax.f32 %v461_v19, 0.0  ;;  %v591_v32 = vmax.f32 %v525_v21, 0.0  ;;  %v528_v33 = vadd.f32 %v4946_v38, %v527_v28 }
 0x11e   : > { %791 = vst.msk [vmem:[#allocation2 + $0x18] sm:$0xf] %vm790_vm11, %v755_v17  ;;  %807 = vst.msk [vmem:[#allocation2 + $0x98] sm:$0xf] %vm790_vm11, %v763_v18  ;;  %v578_v35 = vmax.f32 %v472_v24, 0.0  ;;  %v594_v36 = vmax.f32 %v536_v27, 0.0 }
 0x11f   : > { %806 = vst.msk [vmem:[#allocation2 + $0x90] sm:$0xf0] %vm788_vm10, %v763_v18  ;;  %v576_v40 = vmax.f32 %v464_v31, 0.0  ;;  %v592_v41 = vmax.f32 %v528_v33, 0.0 }
 0x120   : > { %v726_v43 = vpack.c.bf16 %v578_v35, %v577_v23  ;;  %v734_v44 = vpack.c.bf16 %v594_v36, %v593_v26  ;;  %v4413_v47 = vpop.f32.mrb[8].mxu0 }
 0x121   : > { %v725_v45 = vpack.c.bf16 %v576_v40, %v575_v30  ;;  %v733_v46 = vpack.c.bf16 %v592_v41, %v591_v32  ;;  %v4429_v48 = vpop.f32.mrb[8].mxu1  ;;  %v476_v54 = vpop.f32.mrb[9].mxu0  ;;  %v4999_v25 = vadd.f32 %v4413_v47, %v4946_v38 }
 0x122   : > { %v758_v52 = vrot.slane %v726_v43, 4  ;;  %v766_v53 = vrot.slane %v734_v44, 4  ;;  %v540_v55 = vpop.f32.mrb[9].mxu1  ;;  %v2991_v58 = vld [vmem:[#allocation2 + $0x20] sm:$0xf0]  ;;  %v5002_v26 = vadd.f32 %v4429_v48, %v4946_v38  ;;  %v5006_v32 = vadd.f32 %v4946_v38, %v476_v54 }
 0x123   : > { %v2992_v59 = vld [vmem:[#allocation2 + $0x28] sm:$0xf]  ;;  %v2077_v61 = vld [vmem:[#allocation2 + $0x20] sm:$0xf0]  ;;  %v3055_v62 = vrot.slane %v2991_v58, 4  ;;  %v757_v2 = vrot.slane %v725_v45, 4  ;;  %v5011_v40 = vadd.f32 %v4946_v38, %v540_v55 }
 0x124   : > { %v3056_v63 = vrot.slane %v2992_v59, 4  ;;  %v2078_v0 = vld [vmem:[#allocation2 + $0x28] sm:$0xf]  ;;  %v2142_v1 = vrot.slane %v2077_v61, 4  ;;  %796 = vst.msk [vmem:[#allocation2 + $0x40] sm:$0xf0] %vm788_vm10, %v758_v52 }
 0x125   : > { %797 = vst.msk [vmem:[#allocation2 + $0x48] sm:$0xf] %vm790_vm11, %v758_v52  ;;  %813 = vst.msk [vmem:[#allocation2 + $0xc8] sm:$0xf] %vm790_vm11, %v766_v53  ;;  %v2143_v3 = vrot.slane %v2078_v0, 4  ;;  %v765_v6 = vrot.slane %v733_v46, 4  ;;  %v869_v46 = vor.u32 %v4981_v51, %v4979_v49 }
 0x126   : > { %812 = vst.msk [vmem:[#allocation2 + $0xc0] sm:$0xf0] %vm788_vm10, %v766_v53  ;;  %v3007_v4 = vld [vmem:[#allocation2 + $0xa0] sm:$0xf0]  ;;  %v3008_v5 = vld [vmem:[#allocation2 + $0xa8] sm:$0xf]  ;;  %v3057_v7 = vsel %vm1222_vm9, %v3055_v62, %v3056_v63 }
 0x127   : > { %v3079_v8 = vrot.slane %v3007_v4, 4  ;;  %v3080_v9 = vrot.slane %v3008_v5, 4  ;;  %v1162_v10 = vld [vmem:[#allocation2 + $0x20] sm:$0xf0]  ;;  %v1163_v11 = vld [vmem:[#allocation2 + $0x28] sm:$0xf]  ;;  %3103 = vrot.lane.b32.xlu0 %v3057_v7, %s4679_s21  ;;  %v2144_v12 = vsel %vm1222_vm9, %v2142_v1, %v2143_v3 }
 0x128   : > { %794 = vst.msk [vmem:[#allocation2 + $0x30] sm:$0xf0] %vm788_vm10, %v757_v2  ;;  %v1229_v13 = vrot.slane %v1162_v10, 4  ;;  %v1230_v14 = vrot.slane %v1163_v11, 4  ;;  %v2093_v15 = vld [vmem:[#allocation2 + $0xa0] sm:$0xf0]  ;;  %2189 = vrot.lane.b32.xlu1 %v2144_v12, %s4680_s9 }
 0x129   : > { %795 = vst.msk [vmem:[#allocation2 + $0x38] sm:$0xf] %vm790_vm11, %v757_v2  ;;  %v2094_v16 = vld [vmem:[#allocation2 + $0xa8] sm:$0xf]  ;;  %811 = vst.msk [vmem:[#allocation2 + $0xb8] sm:$0xf] %vm790_vm11, %v765_v6  ;;  %v3081_v27 = vsel %vm1222_vm9, %v3079_v8, %v3080_v9 }
 0x12a   : > { %810 = vst.msk [vmem:[#allocation2 + $0xb0] sm:$0xf0] %vm788_vm10, %v765_v6  ;;  %v2166_v17 = vrot.slane %v2093_v15, 4  ;;  %v2167_v18 = vrot.slane %v2094_v16, 4  ;;  %v1160_v19 = vld [vmem:[#allocation2 + $0x10] sm:$0xf0]  ;;  %v1231_v33 = vsel %vm1222_vm9, %v1229_v13, %v1230_v14 }
 0x12b   : > { %v1161_v20 = vld [vmem:[#allocation2 + $0x18] sm:$0xf]  ;;  %v1226_v21 = vrot.slane %v1160_v19, 4  ;;  %v1178_v23 = vld [vmem:[#allocation2 + $0xa0] sm:$0xf0]  ;;  %3119 = vrot.lane.b32.xlu0 %v3081_v27, %s4679_s21  ;;  %v5023_v5 = vpop.f32.mrb[10].mxu0 }
 0x12c   : > { %v1227_v22 = vrot.slane %v1161_v20, 4  ;;  %v1179_v24 = vld [vmem:[#allocation2 + $0xa8] sm:$0xf]  ;;  %v1253_v28 = vrot.slane %v1178_v23, 4  ;;  %v2075_v30 = vld [vmem:[#allocation2 + $0x10] sm:$0xf0]  ;;  %1275 = vrot.lane.b32.xlu1 %v1231_v33, %s4678_s23  ;;  %v2168_v41 = vsel %vm1222_vm9, %v2166_v17, %v2167_v18 }
 0x12d   : > { %v1254_v29 = vrot.slane %v1179_v24, 4  ;;  %v2076_v31 = vld [vmem:[#allocation2 + $0x18] sm:$0xf]  ;;  %v2139_v35 = vrot.slane %v2075_v30, 4  ;;  %v3005_v37 = vld [vmem:[#allocation2 + $0x90] sm:$0xf0] }
 0x12e   : > { %v2140_v36 = vrot.slane %v2076_v31, 4  ;;  %v3006_v39 = vld [vmem:[#allocation2 + $0x98] sm:$0xf]  ;;  %v3076_v42 = vrot.slane %v3005_v37, 4  ;;  %v2091_v44 = vld [vmem:[#allocation2 + $0x90] sm:$0xf0]  ;;  %v1228_v47 = vsel %vm1222_vm9, %v1226_v21, %v1227_v22 }
 0x12f   : > { %v3077_v43 = vrot.slane %v3006_v39, 4  ;;  %v2092_v45 = vld [vmem:[#allocation2 + $0x98] sm:$0xf]  ;;  %v1255_v48 = vsel %vm1222_vm9, %v1253_v28, %v1254_v29  ;;  %v2163_v52 = vrot.slane %v2091_v44, 4  ;;  %v1176_v54 = vld [vmem:[#allocation2 + $0x90] sm:$0xf0]  ;;  %1273 = vrot.lane.b32.xlu0 %v1228_v47, %s4678_s23 }
 0x130   : > { %v2164_v53 = vrot.slane %v2092_v45, 4  ;;  %v1177_v38 = vld [vmem:[#allocation2 + $0x98] sm:$0xf]  ;;  %v2141_v55 = vsel %vm1222_vm9, %v2139_v35, %v2140_v36  ;;  %v1250_v59 = vrot.slane %v1176_v54, 4  ;;  %v2622_v62 = vld [vmem:[#allocation2 + $0x20] sm:$0xf8]  ;;  %2205 = vrot.lane.b32.xlu1 %v2168_v41, %s4680_s9 }
 0x131   : > { %v3078_v58 = vsel %vm1222_vm9, %v3076_v42, %v3077_v43  ;;  %v1251_v61 = vrot.slane %v1177_v38, 4  ;;  %v2623_v63 = vld [vmem:[#allocation2 + $0x28] sm:$0xf]  ;;  %v2655_v1 = vshrl.u32 %v2622_v62, 16  ;;  %v2658_v2 = vshll.u32 %v2622_v62, 16  ;;  %v5029_v11 = vpop.f32.mrb[11].mxu0 }
 0x132   : > { %v2165_v0 = vsel %vm1222_vm9, %v2163_v52, %v2164_v53  ;;  %v2663_v3 = vshrl.u32 %v2623_v63, 16  ;;  %v1708_v4 = vld [vmem:[#allocation2 + $0x20] sm:$0xf8]  ;;  %v2666_v7 = vshll.u32 %v2623_v63, 16  ;;  %v1709_v8 = vld [vmem:[#allocation2 + $0x28] sm:$0xf] }
 0x133   : > { %v5027_v6 = vsel %vm1222_vm9, %v1250_v59, %v1251_v61  ;;  %v1756_v9 = vshrl.u32 %v1708_v4, 16  ;;  %v1759_v10 = vshll.u32 %v1708_v4, 16  ;;  %v2657_v12 = vrot.slane %v2655_v1, 3  ;;  %v3168_v16 = vld [vmem:[#allocation2 + $0x20] sm:$0xf0]  ;;  %2187 = vrot.lane.b32.xlu0 %v2141_v55, %s4680_s9  ;;  %v5032_v29 = vpop.f32.mrb[10].mxu1 }
 0x134   : > { %v2660_v13 = vrot.slane %v2658_v2, 4  ;;  %v2665_v14 = vrot.slane %v2663_v3, 3  ;;  %v1764_v15 = vshrl.u32 %v1709_v8, 16  ;;  %v2668_v17 = vrot.slane %v2666_v7, 4  ;;  %v3169_v21 = vld [vmem:[#allocation2 + $0x28] sm:$0x1f]  ;;  %1291 = vrot.lane.b32.xlu1 %v1255_v48, %s4678_s23 }
 0x135   : > { %v1758_v18 = vrot.slane %v1756_v9, 3  ;;  %v1761_v19 = vrot.slane %v1759_v10, 4  ;;  %v1767_v20 = vshll.u32 %v1709_v8, 16  ;;  %v3201_v24 = vshrl.u32 %v3168_v16, 16  ;;  %v2254_v28 = vld [vmem:[#allocation2 + $0x20] sm:$0xf0] }
 0x136   : > { %v2661_v22 = vor.u32 %v2660_v13, %v2657_v12  ;;  %v1766_v23 = vrot.slane %v1764_v15, 3  ;;  %v3204_v27 = vshll.u32 %v3168_v16, 16  ;;  %v2669_v30 = vor.u32 %v2668_v17, %v2665_v14  ;;  %v2255_v36 = vld [vmem:[#allocation2 + $0x28] sm:$0x1f]  ;;  %v1340_v43 = vld [vmem:[#allocation2 + $0x20] sm:$0xf0] }
 0x137   : > { %v1762_v31 = vor.u32 %v1761_v19, %v1758_v18  ;;  %v1769_v33 = vrot.slane %v1767_v20, 4  ;;  %v3209_v35 = vshrl.u32 %v3169_v21, 16  ;;  %v3203_v37 = vrot.slane %v3201_v24, 4  ;;  %v1341_v53 = vld [vmem:[#allocation2 + $0x28] sm:$0x1f]  ;;  %2203 = vrot.lane.b32.xlu0 %v2165_v0, %s4680_s9  ;;  %v5037_v59 = vpop.f32.mrb[11].mxu1 }
 0x138   : > { %v3206_v39 = vrot.slane %v3204_v27, 5  ;;  %v3212_v41 = vshll.u32 %v3169_v21, 16  ;;  %v2302_v42 = vshrl.u32 %v2254_v28, 16  ;;  %v2670_v44 = vsel %vm667_vm3, %v2661_v22, %v2669_v30  ;;  %3117 = vrot.lane.b32.xlu1 %v3078_v58, %s4679_s21  ;;  %v1724_v2 = vld [vmem:[#allocation2 + $0xa0] sm:$0xf8] }
 0x139   : > { %v1770_v45 = vor.u32 %v1769_v33, %v1766_v23  ;;  %v3211_v47 = vrot.slane %v3209_v35, 4  ;;  %v2305_v52 = vshll.u32 %v2254_v28, 16  ;;  %v2310_v55 = vshrl.u32 %v2255_v36, 16  ;;  %v1725_v9 = vld [vmem:[#allocation2 + $0xa8] sm:$0xf] }
 0x13a   : > { %v3207_v54 = vor.u32 %v3206_v39, %v3203_v37  ;;  %v3214_v48 = vrot.slane %v3212_v41, 5  ;;  %v2304_v38 = vrot.slane %v2302_v42, 4  ;;  %v2313_v63 = vshll.u32 %v2255_v36, 16  ;;  %v2638_v14 = vld [vmem:[#allocation2 + $0xa0] sm:$0xf8] }
 0x13b   : > { %v1771_v61 = vsel %vm667_vm3, %v1762_v31, %v1770_v45  ;;  %v2307_v62 = vrot.slane %v2305_v52, 5  ;;  %v1404_v1 = vshrl.u32 %v1340_v43, 16  ;;  %v2312_v4 = vrot.slane %v2310_v55, 4  ;;  %2926 = vrot.lane.b32.xlu0 %v2670_v44, %s4681_s8  ;;  %v2639_v22 = vld [vmem:[#allocation2 + $0xa8] sm:$0xf] }
 0x13c   : > { %v3215_v3 = vor.u32 %v3214_v48, %v3211_v47  ;;  %v1407_v7 = vshll.u32 %v1340_v43, 16  ;;  %v1412_v8 = vshrl.u32 %v1341_v53, 16  ;;  %v2315_v10 = vrot.slane %v2313_v63, 5  ;;  %1289 = vrot.lane.b32.xlu1 %v5027_v6, %s4678_s23  ;;  %v2270_v30 = vld [vmem:[#allocation2 + $0xa0] sm:$0xf0] }
 0x13d   : > { %v2308_v0 = vor.u32 %v2307_v62, %v2304_v38  ;;  %v1406_v12 = vrot.slane %v1404_v1, 4  ;;  %v1415_v13 = vshll.u32 %v1341_v53, 16  ;;  %v1892_v17 = vshrl.u32 %v1724_v2, 16  ;;  %v2271_v42 = vld [vmem:[#allocation2 + $0xa8] sm:$0x1f] }
 0x13e   : > { %v3216_v58 = vsel %vm1368_vm7, %v3207_v54, %v3215_v3  ;;  %v1409_v15 = vrot.slane %v1407_v7, 5  ;;  %v1414_v16 = vrot.slane %v1412_v8, 4  ;;  %v2316_v18 = vor.u32 %v2315_v10, %v2312_v4  ;;  %v3184_v52 = vld [vmem:[#allocation2 + $0xa0] sm:$0xf0]  ;;  %v1338_v8 = vld [vmem:[#allocation2 + $0x10] sm:$0xf0] }
 0x13f   : > { %v1417_v19 = vrot.slane %v1415_v13, 5  ;;  %v1895_v20 = vshll.u32 %v1724_v2, 16  ;;  %v1900_v21 = vshrl.u32 %v1725_v9, 16  ;;  %v1894_v24 = vrot.slane %v1892_v17, 3  ;;  %3472 = vrot.lane.b32.xlu0 %v3216_v58, %s4682_s11  ;;  %v3185_v2 = vld [vmem:[#allocation2 + $0xa8] sm:$0x1f] }
 0x140   : > { %v1410_v23 = vor.u32 %v1409_v15, %v1406_v12  ;;  %v1903_v27 = vshll.u32 %v1725_v9, 16  ;;  %v2791_v28 = vshrl.u32 %v2638_v14, 16  ;;  %v2317_v31 = vsel %vm1368_vm7, %v2308_v0, %v2316_v18  ;;  %2012 = vrot.lane.b32.xlu1 %v1771_v61, %s4683_s18  ;;  %v1339_v13 = vld [vmem:[#allocation2 + $0x18] sm:$0x1f] }
 0x141   : > { %v1418_v33 = vor.u32 %v1417_v19, %v1414_v16  ;;  %v1897_v35 = vrot.slane %v1895_v20, 4  ;;  %v1902_v36 = vrot.slane %v1900_v21, 3  ;;  %v2794_v39 = vshll.u32 %v2638_v14, 16  ;;  %v1356_v21 = vld [vmem:[#allocation2 + $0xa0] sm:$0xf0] }
 0x142   : > { %v1905_v37 = vrot.slane %v1903_v27, 4  ;;  %v2793_v6 = vrot.slane %v2791_v28, 3  ;;  %v2799_v41 = vshrl.u32 %v2639_v22, 16  ;;  %v2802_v45 = vshll.u32 %v2639_v22, 16  ;;  %v1357_v28 = vld [vmem:[#allocation2 + $0xa8] sm:$0x1f] }
 0x143   : > { %v1419_v43 = vsel %vm1368_vm7, %v1410_v23, %v1418_v33  ;;  %v1898_v44 = vor.u32 %v1897_v35, %v1894_v24  ;;  %v2438_v47 = vshrl.u32 %v2270_v30, 16  ;;  %v2796_v54 = vrot.slane %v2794_v39, 4 }
 0x144   : > { %v1906_v53 = vor.u32 %v1905_v37, %v1902_v36  ;;  %v2801_v48 = vrot.slane %v2799_v41, 3  ;;  %v2441_v38 = vshll.u32 %v2270_v30, 16  ;;  %v2804_v55 = vrot.slane %v2802_v45, 4  ;;  %1645 = vrot.lane.b32.xlu0 %v1419_v43, %s4677_s12  ;;  %2558 = vrot.lane.b32.xlu1 %v2317_v31, %s4684_s20  ;;  %v2636_v36 = vld [vmem:[#allocation2 + $0x90] sm:$0xf8] }
 0x145   : > { %v2440_v62 = vrot.slane %v2438_v47, 4  ;;  %v2446_v63 = vshrl.u32 %v2271_v42, 16  ;;  %v2449_v1 = vshll.u32 %v2271_v42, 16  ;;  %v2797_v61 = vor.u32 %v2796_v54, %v2793_v6  ;;  %v2637_v47 = vld [vmem:[#allocation2 + $0x98] sm:$0xf] }
 0x146   : > { %v1907_v3 = vsel %vm667_vm3, %v1898_v44, %v1906_v53  ;;  %v2443_v4 = vrot.slane %v2441_v38, 5  ;;  %v3337_v7 = vshrl.u32 %v3184_v52, 16  ;;  %v2805_v9 = vor.u32 %v2804_v55, %v2801_v48  ;;  %v1706_v38 = vld [vmem:[#allocation2 + $0x10] sm:$0xf8] }
 0x147   : > { %v2448_v0 = vrot.slane %v2446_v63, 4  ;;  %v2451_v10 = vrot.slane %v2449_v1, 5  ;;  %v3340_v12 = vshll.u32 %v3184_v52, 16  ;;  %v3345_v15 = vshrl.u32 %v3185_v2, 16 }
 0x148   : > { %v2444_v14 = vor.u32 %v2443_v4, %v2440_v62  ;;  %v3339_v58 = vrot.slane %v3337_v7, 4  ;;  %v3348_v16 = vshll.u32 %v3185_v2, 16  ;;  %v2806_v17 = vsel %vm667_vm3, %v2797_v61, %v2805_v9  ;;  %2028 = vrot.lane.b32.xlu1 %v1907_v3, %s4683_s18  ;;  %v1707_v7 = vld [vmem:[#allocation2 + $0x18] sm:$0xf] }
 0x149   : > { %v2452_v18 = vor.u32 %v2451_v10, %v2448_v0  ;;  %v3342_v19 = vrot.slane %v3340_v12, 5  ;;  %v1387_v20 = vshrl.u32 %v1338_v8, 16  ;;  %2942 = vrot.lane.b32.xlu0 %v2806_v17, %s4681_s8  ;;  %v3347_v22 = vrot.slane %v3345_v15, 4  ;;  %v1354_v12 = vld [vmem:[#allocation2 + $0x90] sm:$0xf0] }
 0x14a   : > { %v3350_v23 = vrot.slane %v3348_v16, 5  ;;  %v1390_v24 = vshll.u32 %v1338_v8, 16  ;;  %v1395_v27 = vshrl.u32 %v1339_v13, 16  ;;  %v1398_v35 = vshll.u32 %v1339_v13, 16  ;;  %v5060_v13 = vpop.f32.mrb[12].mxu0 }
 0x14b   : > { %v2453_v30 = vsel %vm1368_vm7, %v2444_v14, %v2452_v18  ;;  %v3343_v31 = vor.u32 %v3342_v19, %v3339_v58  ;;  %v1389_v33 = vrot.slane %v1387_v20, 4  ;;  %v1540_v41 = vshrl.u32 %v1356_v21, 16  ;;  %v1355_v17 = vld [vmem:[#allocation2 + $0x98] sm:$0x1f] }
 0x14c   : > { %v3351_v37 = vor.u32 %v3350_v23, %v3347_v22  ;;  %v1392_v6 = vrot.slane %v1390_v24, 5  ;;  %v1397_v39 = vrot.slane %v1395_v27, 4  ;;  %v1400_v42 = vrot.slane %v1398_v35, 5  ;;  %2574 = vrot.lane.b32.xlu1 %v2453_v30, %s4684_s20 }
 0x14d   : > { %v1543_v43 = vshll.u32 %v1356_v21, 16  ;;  %v1548_v44 = vshrl.u32 %v1357_v28, 16  ;;  %v1551_v45 = vshll.u32 %v1357_v28, 16  ;;  %v1542_v54 = vrot.slane %v1540_v41, 4  ;;  %v2252_v28 = vld [vmem:[#allocation2 + $0x10] sm:$0xf0] }
 0x14e   : > { %v3352_v52 = vsel %vm1368_vm7, %v3343_v31, %v3351_v37  ;;  %v1393_v53 = vor.u32 %v1392_v6, %v1389_v33  ;;  %v2774_v48 = vshrl.u32 %v2636_v36, 16  ;;  %v1401_v55 = vor.u32 %v1400_v42, %v1397_v39  ;;  %v2081_v42 = vld [vmem:[#allocation2 + $0x40] sm:$0xf0] }
 0x14f   : > { %3488 = vrot.lane.b32.xlu0 %v3352_v52, %s4682_s11  ;;  %v1545_v62 = vrot.slane %v1543_v43, 5  ;;  %v1550_v63 = vrot.slane %v1548_v44, 4  ;;  %v1553_v1 = vrot.slane %v1551_v45, 5  ;;  %v2777_v3 = vshll.u32 %v2636_v36, 16  ;;  %v2253_v36 = vld [vmem:[#allocation2 + $0x18] sm:$0x1f] }
 0x150   : > { %v2776_v2 = vrot.slane %v2774_v48, 3  ;;  %v2782_v61 = vshrl.u32 %v2637_v47, 16  ;;  %v2785_v4 = vshll.u32 %v2637_v47, 16  ;;  %v1402_v8 = vsel %vm1368_vm7, %v1393_v53, %v1401_v55  ;;  %v2082_v43 = vld [vmem:[#allocation2 + $0x48] sm:$0xf] }
 0x151   : > { %v1546_v9 = vor.u32 %v1545_v62, %v1542_v54  ;;  %v1554_v0 = vor.u32 %v1553_v1, %v1550_v63  ;;  %v1739_v10 = vshrl.u32 %v1706_v38, 16  ;;  %v2779_v14 = vrot.slane %v2777_v3, 4  ;;  %1643 = vrot.lane.b32.xlu1 %v1402_v8, %s4677_s12  ;;  %v3182_v53 = vld [vmem:[#allocation2 + $0x90] sm:$0xf0]  ;;  %v5067_v54 = vpop.f32.mrb[13].mxu0 }
 0x152   : > { %v2784_v58 = vrot.slane %v2782_v61, 3  ;;  %v2787_v15 = vrot.slane %v2785_v4, 4  ;;  %v1742_v16 = vshll.u32 %v1706_v38, 16  ;;  %v1747_v20 = vshrl.u32 %v1707_v7, 16  ;;  %v3183_v63 = vld [vmem:[#allocation2 + $0x98] sm:$0x1f] }
 0x153   : > { %v1555_v18 = vsel %vm1368_vm7, %v1546_v9, %v1554_v0  ;;  %v1741_v19 = vrot.slane %v1739_v10, 3  ;;  %v1750_v21 = vshll.u32 %v1707_v7, 16  ;;  %v2780_v22 = vor.u32 %v2779_v14, %v2776_v2  ;;  %v1166_v4 = vld [vmem:[#allocation2 + $0x40] sm:$0xf0]  ;;  %v1167_v7 = vld [vmem:[#allocation2 + $0x48] sm:$0xf] }
 0x154   : > { %1661 = vrot.lane.b32.xlu0 %v1555_v18, %s4677_s12  ;;  %v2788_v23 = vor.u32 %v2787_v15, %v2784_v58  ;;  %v1744_v24 = vrot.slane %v1742_v16, 4  ;;  %v1523_v27 = vshrl.u32 %v1354_v12, 16  ;;  %v1749_v30 = vrot.slane %v1747_v20, 3  ;;  %v5071_v14 = vpop.f32.mrb[14].mxu0  ;;  %v1723_v18 = vld [vmem:[#allocation2 + $0x98] sm:$0xf] }
 0x155   : > { %v1752_v31 = vrot.slane %v1750_v21, 4  ;;  %v1526_v33 = vshll.u32 %v1354_v12, 16  ;;  %v1531_v35 = vshrl.u32 %v1355_v17, 16  ;;  %v1534_v41 = vshll.u32 %v1355_v17, 16  ;;  %v1722_v12 = vld [vmem:[#allocation2 + $0x90] sm:$0xf8] }
 0x156   : > { %v2789_v37 = vsel %vm667_vm3, %v2780_v22, %v2788_v23  ;;  %v1745_v6 = vor.u32 %v1744_v24, %v1741_v19  ;;  %v1525_v39 = vrot.slane %v1523_v27, 4  ;;  %v2285_v52 = vshrl.u32 %v2252_v28, 16  ;;  %v2097_v23 = vld [vmem:[#allocation2 + $0xc0] sm:$0xf0]  ;;  %v2098_v24 = vld [vmem:[#allocation2 + $0xc8] sm:$0xf] }
 0x157   : > { %2940 = vrot.lane.b32.xlu1 %v2789_v37, %s4681_s8  ;;  %v1753_v44 = vor.u32 %v1752_v31, %v1749_v30  ;;  %v1528_v45 = vrot.slane %v1526_v33, 5  ;;  %v1533_v47 = vrot.slane %v1531_v35, 4  ;;  %v1536_v48 = vrot.slane %v1534_v41, 5  ;;  %v5074_v27 = vpop.f32.mrb[15].mxu0  ;;  %v2268_v35 = vld [vmem:[#allocation2 + $0x90] sm:$0xf0] }
 0x158   : > { %v2288_v38 = vshll.u32 %v2252_v28, 16  ;;  %v2293_v55 = vshrl.u32 %v2253_v36, 16  ;;  %v2296_v62 = vshll.u32 %v2253_v36, 16  ;;  %v2287_v3 = vrot.slane %v2285_v52, 4  ;;  %v2269_v41 = vld [vmem:[#allocation2 + $0x98] sm:$0x1f] }
 0x159   : > { %v1754_v1 = vsel %vm667_vm3, %v1745_v6, %v1753_v44  ;;  %v1529_v2 = vor.u32 %v1528_v45, %v1525_v39  ;;  %v2148_v61 = vrot.slane %v2081_v42, 4  ;;  %v1537_v8 = vor.u32 %v1536_v48, %v1533_v47  ;;  %v1182_v47 = vld [vmem:[#allocation2 + $0xc0] sm:$0xf0] }
 0x15a   : > { %2010 = vrot.lane.b32.xlu0 %v1754_v1, %s4683_s18  ;;  %v2290_v9 = vrot.slane %v2288_v38, 5  ;;  %v2295_v0 = vrot.slane %v2293_v55, 4  ;;  %v2298_v10 = vrot.slane %v2296_v62, 5  ;;  %v2149_v58 = vrot.slane %v2082_v43, 4  ;;  %v1183_v55 = vld [vmem:[#allocation2 + $0xc8] sm:$0xf] }
 0x15b   : > { %v3320_v15 = vshrl.u32 %v3182_v53, 16  ;;  %v3323_v16 = vshll.u32 %v3182_v53, 16  ;;  %v3328_v17 = vshrl.u32 %v3183_v63, 16  ;;  %v1538_v19 = vsel %vm1368_vm7, %v1529_v2, %v1537_v8  ;;  %v2995_v62 = vld [vmem:[#allocation2 + $0x40] sm:$0xf0] }
 0x15c   : > { %v2291_v20 = vor.u32 %v2290_v9, %v2287_v3  ;;  %v2299_v21 = vor.u32 %v2298_v10, %v2295_v0  ;;  %v3331_v22 = vshll.u32 %v3183_v63, 16  ;;  %1659 = vrot.lane.b32.xlu1 %v1538_v19, %s4677_s12  ;;  %v2150_v28 = vsel %vm1222_vm9, %v2148_v61, %v2149_v58  ;;  %v2996_v61 = vld [vmem:[#allocation2 + $0x48] sm:$0xf]  ;;  %v2994_v10 = vld [vmem:[#allocation2 + $0x38] sm:$0xf] }
 0x15d   : > { %v3322_v30 = vrot.slane %v3320_v15, 4  ;;  %v3325_v31 = vrot.slane %v3323_v16, 5  ;;  %v3330_v33 = vrot.slane %v3328_v17, 4  ;;  %v1235_v6 = vrot.slane %v1166_v4, 4  ;;  %v2993_v4 = vld [vmem:[#allocation2 + $0x30] sm:$0xf0] }
 0x15e   : > { %v2300_v36 = vsel %vm1368_vm7, %v2291_v20, %v2299_v21  ;;  %v3333_v37 = vrot.slane %v3331_v22, 5  ;;  %v1236_v39 = vrot.slane %v1167_v7, 4  ;;  %v1875_v43 = vshrl.u32 %v1722_v12, 16  ;;  %v1164_v19 = vld [vmem:[#allocation2 + $0x30] sm:$0xf0] }
 0x15f   : > { %2556 = vrot.lane.b32.xlu0 %v2300_v36, %s4684_s20  ;;  %v3326_v42 = vor.u32 %v3325_v31, %v3322_v30  ;;  %v1878_v44 = vshll.u32 %v1722_v12, 16  ;;  %v1883_v45 = vshrl.u32 %v1723_v18, 16  ;;  %v1886_v48 = vshll.u32 %v1723_v18, 16  ;;  %v3011_v12 = vld [vmem:[#allocation2 + $0xc0] sm:$0xf0] }
 0x160   : > { %v3334_v52 = vor.u32 %v3333_v37, %v3330_v33  ;;  %v1237_v53 = vsel %vm1222_vm9, %v1235_v6, %v1236_v39  ;;  %v2172_v38 = vrot.slane %v2097_v23, 4  ;;  %2193 = vrot.lane.b32.xlu1 %v2150_v28, %s4680_s9  ;;  %v1877_v63 = vrot.slane %v1875_v43, 3  ;;  %v3012_v18 = vld [vmem:[#allocation2 + $0xc8] sm:$0xf]  ;;  %v1165_v20 = vld [vmem:[#allocation2 + $0x38] sm:$0xf] }
 0x161   : > { %v1880_v1 = vrot.slane %v1878_v44, 4  ;;  %v1885_v2 = vrot.slane %v1883_v45, 3  ;;  %v2173_v3 = vrot.slane %v2098_v24, 4  ;;  %v1888_v8 = vrot.slane %v1886_v48, 4  ;;  %v2079_v28 = vld [vmem:[#allocation2 + $0x30] sm:$0xf0] }
 0x162   : > { %v3335_v7 = vsel %vm1368_vm7, %v3326_v42, %v3334_v52  ;;  %v2421_v9 = vshrl.u32 %v2268_v35, 16  ;;  %v2424_v0 = vshll.u32 %v2268_v35, 16  ;;  %v2429_v16 = vshrl.u32 %v2269_v41, 16  ;;  %v2080_v36 = vld [vmem:[#allocation2 + $0x38] sm:$0xf] }
 0x163   : > { %3486 = vrot.lane.b32.xlu0 %v3335_v7, %s4682_s11  ;;  %v1881_v58 = vor.u32 %v1880_v1, %v1877_v63  ;;  %v2174_v15 = vsel %vm1222_vm9, %v2172_v38, %v2173_v3  ;;  %v2432_v17 = vshll.u32 %v2269_v41, 16  ;;  %v1889_v21 = vor.u32 %v1888_v8, %v1885_v2  ;;  %v3009_v42 = vld [vmem:[#allocation2 + $0xb0] sm:$0xf0]  ;;  %v3010_v43 = vld [vmem:[#allocation2 + $0xb8] sm:$0xf] }
 0x164   : > { %v2423_v22 = vrot.slane %v2421_v9, 4  ;;  %v2426_v23 = vrot.slane %v2424_v0, 5  ;;  %v1259_v24 = vrot.slane %v1182_v47, 4  ;;  %1279 = vrot.lane.b32.xlu1 %v1237_v53, %s4678_s23  ;;  %v2431_v30 = vrot.slane %v2429_v16, 4  ;;  %v2095_v53 = vld [vmem:[#allocation2 + $0xb0] sm:$0xf0] }
 0x165   : > { %v2434_v31 = vrot.slane %v2432_v17, 5  ;;  %v1260_v33 = vrot.slane %v1183_v55, 4  ;;  %v3061_v35 = vrot.slane %v2995_v62, 4  ;;  %v1890_v37 = vsel %vm667_vm3, %v1881_v58, %v1889_v21  ;;  %v2096_v48 = vld [vmem:[#allocation2 + $0xb8] sm:$0xf] }
 0x166   : > { %v2427_v6 = vor.u32 %v2426_v23, %v2423_v22  ;;  %v3062_v39 = vrot.slane %v2996_v61, 4  ;;  %v3058_v41 = vrot.slane %v2993_v4, 4  ;;  %v3059_v47 = vrot.slane %v2994_v10, 4  ;;  %v1180_v1 = vld [vmem:[#allocation2 + $0xb0] sm:$0xf0] }
 0x167   : > { %2026 = vrot.lane.b32.xlu0 %v1890_v37, %s4683_s18  ;;  %v2435_v44 = vor.u32 %v2434_v31, %v2431_v30  ;;  %v1261_v45 = vsel %vm1222_vm9, %v1259_v24, %v1260_v33  ;;  %v3085_v52 = vrot.slane %v3011_v12, 4  ;;  %v3086_v55 = vrot.slane %v3012_v18, 4  ;;  %v1181_v7 = vld [vmem:[#allocation2 + $0xb8] sm:$0xf]  ;;  %v2626_v8 = vld [vmem:[#allocation2 + $0x40] sm:$0xf8] }
 0x168   : > { %v3063_v38 = vsel %vm1222_vm9, %v3061_v35, %v3062_v39  ;;  %v1232_v62 = vrot.slane %v1164_v19, 4  ;;  %v1233_v63 = vrot.slane %v1165_v20, 4  ;;  %2209 = vrot.lane.b32.xlu1 %v2174_v15, %s4680_s9  ;;  %v3060_v3 = vsel %vm1222_vm9, %v3058_v41, %v3059_v47  ;;  %v2627_v58 = vld [vmem:[#allocation2 + $0x48] sm:$0xf]  ;;  %v1712_v16 = vld [vmem:[#allocation2 + $0x40] sm:$0xf8] }
 0x169   : > { %v2436_v2 = vsel %vm1368_vm7, %v2427_v6, %v2435_v44  ;;  %v2145_v61 = vrot.slane %v2079_v28, 4  ;;  %v2146_v4 = vrot.slane %v2080_v36, 4  ;;  %v3087_v9 = vsel %vm1222_vm9, %v3085_v52, %v3086_v55  ;;  %v5099_v20 = vpop.f32.mrb[12].mxu1  ;;  %v1713_v28 = vld [vmem:[#allocation2 + $0x48] sm:$0xf] }
 0x16a   : > { %v1234_v0 = vsel %vm1222_vm9, %v1232_v62, %v1233_v63  ;;  %v3082_v10 = vrot.slane %v3009_v42, 4  ;;  %v3083_v12 = vrot.slane %v3010_v43, 4  ;;  %v2169_v17 = vrot.slane %v2095_v53, 4  ;;  %v5104_v30 = vpop.f32.mrb[13].mxu1  ;;  %v3172_v37 = vld [vmem:[#allocation2 + $0x40] sm:$0xf0] }
 0x16b   : > { %2572 = vrot.lane.b32.xlu0 %v2436_v2, %s4684_s20  ;;  %v5097_v15 = vsel %vm1222_vm9, %v2145_v61, %v2146_v4  ;;  %v2170_v18 = vrot.slane %v2096_v48, 4  ;;  %v1256_v19 = vrot.slane %v1180_v1, 4  ;;  %v1257_v22 = vrot.slane %v1181_v7, 4  ;;  %v3173_v43 = vld [vmem:[#allocation2 + $0x48] sm:$0x1f] }
 0x16c   : > { %v5102_v21 = vsel %vm1222_vm9, %v3082_v10, %v3083_v12  ;;  %v2689_v23 = vshrl.u32 %v2626_v8, 16  ;;  %v2692_v24 = vshll.u32 %v2626_v8, 16  ;;  %1295 = vrot.lane.b32.xlu1 %v1261_v45, %s4678_s23  ;;  %v2697_v33 = vshrl.u32 %v2627_v58, 16  ;;  %v2258_v63 = vld [vmem:[#allocation2 + $0x40] sm:$0xf0] }
 0x16d   : > { %v5108_v31 = vsel %vm1222_vm9, %v2169_v17, %v2170_v18  ;;  %v2700_v35 = vshll.u32 %v2627_v58, 16  ;;  %v1790_v36 = vshrl.u32 %v1712_v16, 16  ;;  %v5111_v6 = vsel %vm1222_vm9, %v1256_v19, %v1257_v22  ;;  %v2259_v7 = vld [vmem:[#allocation2 + $0x48] sm:$0x1f]  ;;  %v1344_v58 = vld [vmem:[#allocation2 + $0x40] sm:$0xf0] }
 0x16e   : > { %v2691_v39 = vrot.slane %v2689_v23, 3  ;;  %v2694_v41 = vrot.slane %v2692_v24, 4  ;;  %v1793_v42 = vshll.u32 %v1712_v16, 16  ;;  %v2699_v44 = vrot.slane %v2697_v33, 3  ;;  %v5117_v33 = vpop.f32.mrb[14].mxu1 }
 0x16f   : > { %3107 = vrot.lane.b32.xlu0 %v3063_v38, %s4679_s21  ;;  %v2702_v47 = vrot.slane %v2700_v35, 4  ;;  %v1792_v52 = vrot.slane %v1790_v36, 3  ;;  %v1798_v45 = vshrl.u32 %v1713_v28, 16  ;;  %v1801_v55 = vshll.u32 %v1713_v28, 16  ;;  %v1345_v28 = vld [vmem:[#allocation2 + $0x48] sm:$0x1f] }
 0x170   : > { %v2695_v53 = vor.u32 %v2694_v41, %v2691_v39  ;;  %v1795_v48 = vrot.slane %v1793_v42, 4  ;;  %v3235_v62 = vshrl.u32 %v3172_v37, 16  ;;  %3105 = vrot.lane.b32.xlu1 %v3060_v3, %s4679_s21  ;;  %v3238_v61 = vshll.u32 %v3172_v37, 16  ;;  %v5120_v41 = vpop.f32.mrb[15].mxu1 }
 0x171   : > { %v2703_v1 = vor.u32 %v2702_v47, %v2699_v44  ;;  %v1800_v2 = vrot.slane %v1798_v45, 3  ;;  %v3243_v4 = vshrl.u32 %v3173_v43, 16  ;;  %v1803_v10 = vrot.slane %v1801_v55, 4  ;;  %v1728_v47 = vld [vmem:[#allocation2 + $0xc0] sm:$0xf8] }
 0x172   : > { %v1796_v8 = vor.u32 %v1795_v48, %v1792_v52  ;;  %v3237_v12 = vrot.slane %v3235_v62, 4  ;;  %v3246_v38 = vshll.u32 %v3173_v43, 16  ;;  %v3240_v17 = vrot.slane %v3238_v61, 5 }
 0x173   : > { %3123 = vrot.lane.b32.xlu0 %v3087_v9, %s4679_s21  ;;  %v2704_v16 = vsel %vm667_vm3, %v2695_v53, %v2703_v1  ;;  %v3245_v18 = vrot.slane %v3243_v4, 4  ;;  %v2336_v19 = vshrl.u32 %v2258_v63, 16  ;;  %v1804_v22 = vor.u32 %v1803_v10, %v1800_v2  ;;  %v2642_v2 = vld [vmem:[#allocation2 + $0xc0] sm:$0xf8] }
 0x174   : > { %v3248_v23 = vrot.slane %v3246_v38, 5  ;;  %v2339_v3 = vshll.u32 %v2258_v63, 16  ;;  %v2344_v24 = vshrl.u32 %v2259_v7, 16  ;;  %1277 = vrot.lane.b32.xlu1 %v1234_v0, %s4678_s23  ;;  %v3241_v35 = vor.u32 %v3240_v17, %v3237_v12  ;;  %v1729_v0 = vld [vmem:[#allocation2 + $0xc8] sm:$0xf] }
 0x175   : > { %v2338_v36 = vrot.slane %v2336_v19, 4  ;;  %v2347_v37 = vshll.u32 %v2259_v7, 16  ;;  %v1438_v39 = vshrl.u32 %v1344_v58, 16  ;;  %v1805_v9 = vsel %vm667_vm3, %v1796_v8, %v1804_v22 }
 0x176   : > { %v3249_v42 = vor.u32 %v3248_v23, %v3245_v18  ;;  %v2341_v43 = vrot.slane %v2339_v3, 5  ;;  %v2346_v44 = vrot.slane %v2344_v24, 4  ;;  %v1441_v53 = vshll.u32 %v1344_v58, 16  ;;  %v2643_v58 = vld [vmem:[#allocation2 + $0xc8] sm:$0xf] }
 0x177   : > { %2191 = vrot.lane.b32.xlu0 %v5097_v15, %s4680_s9  ;;  %v2349_v52 = vrot.slane %v2347_v37, 5  ;;  %v1440_v45 = vrot.slane %v1438_v39, 4  ;;  %v1446_v48 = vshrl.u32 %v1345_v28, 16  ;;  %v1449_v63 = vshll.u32 %v1345_v28, 16  ;;  %v2274_v37 = vld [vmem:[#allocation2 + $0xc0] sm:$0xf0] }
 0x178   : > { %v3250_v55 = vsel %vm1368_vm7, %v3241_v35, %v3249_v42  ;;  %v2342_v62 = vor.u32 %v2341_v43, %v2338_v36  ;;  %v581_v1 = vmax.f32 %v4999_v25, 0.0  ;;  %3121 = vrot.lane.b32.xlu1 %v5102_v21, %s4679_s21  ;;  %v1443_v4 = vrot.slane %v1441_v53, 5 }
 0x179   : > { %v2350_v61 = vor.u32 %v2349_v52, %v2346_v44  ;;  %v1448_v7 = vrot.slane %v1446_v48, 4  ;;  %v1926_v8 = vshrl.u32 %v1728_v47, 16  ;;  %v1451_v15 = vrot.slane %v1449_v63, 5  ;;  %v2275_v44 = vld [vmem:[#allocation2 + $0xc8] sm:$0x1f] }
 0x17a   : > { %v1929_v10 = vshll.u32 %v1728_v47, 16  ;;  %v1934_v12 = vshrl.u32 %v1729_v0, 16  ;;  %v1937_v38 = vshll.u32 %v1729_v0, 16  ;;  %v1444_v18 = vor.u32 %v1443_v4, %v1440_v45  ;;  %v3188_v63 = vld [vmem:[#allocation2 + $0xc0] sm:$0xf0] }
 0x17b   : > { %2207 = vrot.lane.b32.xlu0 %v5108_v31, %s4680_s9  ;;  %v2351_v17 = vsel %vm1368_vm7, %v2342_v62, %v2350_v61  ;;  %v1928_v25 = vrot.slane %v1926_v8, 3  ;;  %v2825_v19 = vshrl.u32 %v2642_v2, 16  ;;  %v1452_v22 = vor.u32 %v1451_v15, %v1448_v7 }
 0x17c   : > { %v1931_v23 = vrot.slane %v1929_v10, 4  ;;  %v1936_v21 = vrot.slane %v1934_v12, 3  ;;  %v1939_v3 = vrot.slane %v1937_v38, 4  ;;  %1293 = vrot.lane.b32.xlu1 %v5111_v6, %s4678_s23  ;;  %v2828_v28 = vshll.u32 %v2642_v2, 16  ;;  %v5140_v6 = vld [vmem:[%s6233_s2] ss:$0 sm:$0xff] }
 0x17d   : > { %v2827_v24 = vrot.slane %v2825_v19, 3  ;;  %v2833_v35 = vshrl.u32 %v2643_v58, 16  ;;  %v2836_v36 = vshll.u32 %v2643_v58, 16  ;;  %v1453_v39 = vsel %vm1368_vm7, %v1444_v18, %v1452_v22  ;;  %v3189_v12 = vld [vmem:[#allocation2 + $0xc8] sm:$0x1f] }
 0x17e   : > { %v1932_v31 = vor.u32 %v1931_v23, %v1928_v25  ;;  %v1940_v42 = vor.u32 %v1939_v3, %v1936_v21  ;;  %v579_v43 = vmax.f32 %v5006_v32, 0.0  ;;  %v2830_v47 = vrot.slane %v2828_v28, 4  ;;  %v2624_v22 = vld [vmem:[#allocation2 + $0x30] sm:$0xf8]  ;;  %v2625_v28 = vld [vmem:[#allocation2 + $0x38] sm:$0xf] }
 0x17f   : > { %2930 = vrot.lane.b32.xlu0 %v2704_v16, %s4681_s8  ;;  %v2835_v52 = vrot.slane %v2833_v35, 3  ;;  %v2838_v45 = vrot.slane %v2836_v36, 4  ;;  %v488_v53 = vadd.f32 %v5140_v6, %v5023_v5  ;;  %v480_v0 = vadd.f32 %v5140_v6, %v5029_v11 }
 0x180   : > { %v1941_v48 = vsel %vm667_vm3, %v1932_v31, %v1940_v42  ;;  %v2472_v32 = vshrl.u32 %v2274_v37, 16  ;;  %v2475_v62 = vshll.u32 %v2274_v37, 16  ;;  %2016 = vrot.lane.b32.xlu1 %v1805_v9, %s4683_s18  ;;  %v2831_v16 = vor.u32 %v2830_v47, %v2827_v24 }
 0x181   : > { %v2839_v2 = vor.u32 %v2838_v45, %v2835_v52  ;;  %v582_v61 = vmax.f32 %v488_v53, 0.0  ;;  %v2480_v4 = vshrl.u32 %v2275_v44, 16  ;;  %v580_v7 = vmax.f32 %v480_v0, 0.0 }
 0x182   : > { %v2474_v8 = vrot.slane %v2472_v32, 4  ;;  %v2477_v15 = vrot.slane %v2475_v62, 5  ;;  %v2483_v10 = vshll.u32 %v2275_v44, 16  ;;  %v3371_v58 = vshrl.u32 %v3188_v63, 16  ;;  %v1361_v44 = vld [vmem:[#allocation2 + $0xc8] sm:$0x1f] }
 0x183   : > { %3476 = vrot.lane.b32.xlu0 %v3250_v55, %s4682_s11  ;;  %v2840_v5 = vsel %vm667_vm3, %v2831_v16, %v2839_v2  ;;  %v728_v38 = vpack.c.bf16 %v582_v61, %v581_v1  ;;  %v2482_v11 = vrot.slane %v2480_v4, 4  ;;  %v727_v18 = vpack.c.bf16 %v580_v7, %v579_v43  ;;  %v1360_v1 = vld [vmem:[#allocation2 + $0xc0] sm:$0xf0]  ;;  %v1342_v61 = vld [vmem:[#allocation2 + $0x30] sm:$0xf0] }
 0x184   : > { %v2478_v25 = vor.u32 %v2477_v15, %v2474_v8  ;;  %v2485_v19 = vrot.slane %v2483_v10, 5  ;;  %v3374_v9 = vshll.u32 %v3188_v63, 16  ;;  %2562 = vrot.lane.b32.xlu1 %v2351_v17, %s4684_s20  ;;  %v3373_v21 = vrot.slane %v3371_v58, 4  ;;  %v1343_v10 = vld [vmem:[#allocation2 + $0x38] sm:$0x1f] }
 0x185   : > { %v760_v23 = vrot.slane %v728_v38, 4  ;;  %v3379_v3 = vshrl.u32 %v3189_v12, 16  ;;  %v3382_v24 = vshll.u32 %v3189_v12, 16  ;;  %v759_v35 = vrot.slane %v727_v18, 4 }
 0x186   : > { %v2486_v36 = vor.u32 %v2485_v19, %v2482_v11  ;;  %v3376_v55 = vrot.slane %v3374_v9, 5  ;;  %v597_v37 = vmax.f32 %v5002_v26, 0.0  ;;  %v2672_v17 = vshrl.u32 %v2624_v22, 16  ;;  %v3170_v19 = vld [vmem:[#allocation2 + $0x30] sm:$0xf0] }
 0x187   : > { %1649 = vrot.lane.b32.xlu0 %v1453_v39, %s4677_s12  ;;  %800 = vst.msk [vmem:[#allocation2 + $0x60] sm:$0xf0] %vm788_vm10, %v760_v23  ;;  %v3381_v31 = vrot.slane %v3379_v3, 4  ;;  %v3384_v42 = vrot.slane %v3382_v24, 5  ;;  %v2675_v43 = vshll.u32 %v2624_v22, 16  ;;  %v2680_v26 = vshrl.u32 %v2625_v28, 16 }
 0x188   : > { %801 = vst.msk [vmem:[#allocation2 + $0x68] sm:$0xf] %vm790_vm11, %v760_v23  ;;  %799 = vst.msk [vmem:[#allocation2 + $0x58] sm:$0xf] %vm790_vm11, %v759_v35  ;;  %v2487_v47 = vsel %vm1368_vm7, %v2478_v25, %v2486_v36  ;;  %v3377_v52 = vor.u32 %v3376_v55, %v3373_v21  ;;  %v2683_v45 = vshll.u32 %v2625_v28, 16  ;;  %2032 = vrot.lane.b32.xlu1 %v1941_v48, %s4683_s18  ;;  %v2674_v53 = vrot.slane %v2672_v17, 3 }
 0x189   : > { %798 = vst.msk [vmem:[#allocation2 + $0x50] sm:$0xf0] %vm788_vm10, %v759_v35  ;;  %v3385_v39 = vor.u32 %v3384_v42, %v3381_v31  ;;  %v2677_v0 = vrot.slane %v2675_v43, 4  ;;  %v1574_v32 = vshrl.u32 %v1360_v1, 16  ;;  %v2682_v62 = vrot.slane %v2680_v26, 3 }
 0x18a   : > { %v2685_v63 = vrot.slane %v2683_v45, 4  ;;  %v1577_v16 = vshll.u32 %v1360_v1, 16  ;;  %v1582_v2 = vshrl.u32 %v1361_v44, 16  ;;  %v1585_v15 = vshll.u32 %v1361_v44, 16  ;;  %v3171_v35 = vld [vmem:[#allocation2 + $0x38] sm:$0x1f] }
 0x18b   : > { %2946 = vrot.lane.b32.xlu0 %v2840_v5, %s4681_s8  ;;  %v3386_v4 = vsel %vm1368_vm7, %v3377_v52, %v3385_v39  ;;  %v2678_v7 = vor.u32 %v2677_v0, %v2674_v53  ;;  %v1576_v8 = vrot.slane %v1574_v32, 4  ;;  %v595_v11 = vmax.f32 %v5011_v40, 0.0  ;;  %v2640_v43 = vld [vmem:[#allocation2 + $0xb0] sm:$0xf8]  ;;  %v2641_v45 = vld [vmem:[#allocation2 + $0xb8] sm:$0xf] }
 0x18c   : > { %v2686_v12 = vor.u32 %v2685_v63, %v2682_v62  ;;  %v1579_v38 = vrot.slane %v1577_v16, 5  ;;  %v1584_v48 = vrot.slane %v1582_v2, 4  ;;  %2578 = vrot.lane.b32.xlu1 %v2487_v47, %s4684_s20  ;;  %v1587_v58 = vrot.slane %v1585_v15, 5  ;;  %v1710_v62 = vld [vmem:[#allocation2 + $0x30] sm:$0xf8] }
 0x18d   : > { %v552_v18 = vadd.f32 %v5140_v6, %v5032_v29  ;;  %v544_v5 = vadd.f32 %v5140_v6, %v5037_v59  ;;  %v1421_v25 = vshrl.u32 %v1342_v61, 16  ;;  %v1424_v23 = vshll.u32 %v1342_v61, 16  ;;  %v1711_v15 = vld [vmem:[#allocation2 + $0x38] sm:$0xf] }
 0x18e   : > { %v2687_v9 = vsel %vm667_vm3, %v2678_v7, %v2686_v12  ;;  %v1580_v22 = vor.u32 %v1579_v38, %v1576_v8  ;;  %v1429_v21 = vshrl.u32 %v1343_v10, 16  ;;  %v1588_v3 = vor.u32 %v1587_v58, %v1584_v48 }
 0x18f   : > { %3492 = vrot.lane.b32.xlu0 %v3386_v4, %s4682_s11  ;;  %v598_v40 = vmax.f32 %v552_v18, 0.0  ;;  %v596_v24 = vmax.f32 %v544_v5, 0.0  ;;  %v1423_v28 = vrot.slane %v1421_v25, 4  ;;  %v1426_v36 = vrot.slane %v1424_v23, 5 }
 0x190   : > { %v1431_v55 = vrot.slane %v1429_v21, 4  ;;  %v1432_v29 = vshll.u32 %v1343_v10, 16  ;;  %v3218_v1 = vshrl.u32 %v3170_v19, 16  ;;  %2928 = vrot.lane.b32.xlu1 %v2687_v9, %s4681_s8  ;;  %v1589_v59 = vsel %vm1368_vm7, %v1580_v22, %v1588_v3  ;;  %v1358_v9 = vld [vmem:[#allocation2 + $0xb0] sm:$0xf0] }
 0x191   : > { %v736_v31 = vpack.c.bf16 %v598_v40, %v597_v37  ;;  %v735_v42 = vpack.c.bf16 %v596_v24, %v595_v11  ;;  %v3221_v17 = vshll.u32 %v3170_v19, 16  ;;  %v1427_v44 = vor.u32 %v1426_v36, %v1423_v28  ;;  %v1272_v11 = vpop.permute.xlu0 %1271  ;;  %v5178_v19 = vpop.permute.xlu1 %1641  ;;  %v1359_v40 = vld [vmem:[#allocation2 + $0xb8] sm:$0x1f] }
 0x192   : > { %v1434_v47 = vrot.slane %v1432_v29, 5  ;;  %v3220_v52 = vrot.slane %v3218_v1, 4  ;;  %v3226_v26 = vshrl.u32 %v3171_v35, 16  ;;  %v3229_v32 = vshll.u32 %v3171_v35, 16 }
 0x193   : > { %1665 = vrot.lane.b32.xlu0 %v1589_v59, %s4677_s12  ;;  %v768_v39 = vrot.slane %v736_v31, 4  ;;  %v767_v53 = vrot.slane %v735_v42, 4  ;;  %v3223_v0 = vrot.slane %v3221_v17, 5  ;;  %v2808_v2 = vshrl.u32 %v2640_v43, 16  ;;  %v2256_v31 = vld [vmem:[#allocation2 + $0x30] sm:$0xf0] }
 0x194   : > { %v1435_v63 = vor.u32 %v1434_v47, %v1431_v55  ;;  %v3228_v16 = vrot.slane %v3226_v26, 4  ;;  %v2811_v61 = vshll.u32 %v2640_v43, 16  ;;  %v3231_v4 = vrot.slane %v3229_v32, 5  ;;  %v2257_v47 = vld [vmem:[#allocation2 + $0x38] sm:$0x1f] }
 0x195   : > { %816 = vst.msk [vmem:[#allocation2 + $0xe0] sm:$0xf0] %vm788_vm10, %v768_v39  ;;  %814 = vst.msk [vmem:[#allocation2 + $0xd0] sm:$0xf0] %vm788_vm10, %v767_v53  ;;  %v3224_v37 = vor.u32 %v3223_v0, %v3220_v52  ;;  %v2816_v7 = vshrl.u32 %v2641_v45, 16  ;;  %v2819_v8 = vshll.u32 %v2641_v45, 16 }
 0x196   : > { %817 = vst.msk [vmem:[#allocation2 + $0xe8] sm:$0xf] %vm790_vm11, %v768_v39  ;;  %815 = vst.msk [vmem:[#allocation2 + $0xd8] sm:$0xf] %vm790_vm11, %v767_v53  ;;  %v1436_v10 = vsel %vm1368_vm7, %v1427_v44, %v1435_v63  ;;  %v2810_v12 = vrot.slane %v2808_v2, 3  ;;  %v2813_v38 = vrot.slane %v2811_v61, 4  ;;  %v3232_v58 = vor.u32 %v3231_v4, %v3228_v16 }
 0x197   : > { %v1773_v48 = vshrl.u32 %v1710_v62, 16  ;;  %1647 = vrot.lane.b32.xlu1 %v1436_v10, %s4677_s12  ;;  %v2818_v18 = vrot.slane %v2816_v7, 3  ;;  %v2821_v5 = vrot.slane %v2819_v8, 4  ;;  %v1776_v25 = vshll.u32 %v1710_v62, 16  ;;  %v3186_v52 = vld [vmem:[#allocation2 + $0xb0] sm:$0xf0] }
 0x198   : > { %v2814_v22 = vor.u32 %v2813_v38, %v2810_v12  ;;  %v1781_v21 = vshrl.u32 %v1711_v15, 16  ;;  %v1784_v3 = vshll.u32 %v1711_v15, 16  ;;  %v3233_v24 = vsel %vm1368_vm7, %v3224_v37, %v3232_v58  ;;  %v2085_v53 = vld [vmem:[#allocation2 + $0x60] sm:$0xf0]  ;;  %v2086_v16 = vld [vmem:[#allocation2 + $0x68] sm:$0xf] }
 0x199   : > { %v1775_v23 = vrot.slane %v1773_v48, 3  ;;  %v2822_v28 = vor.u32 %v2821_v5, %v2818_v18  ;;  %v1778_v35 = vrot.slane %v1776_v25, 4  ;;  %v860_v36 = vrot.slane %v858_v57, 4  ;;  %3474 = vrot.lane.b32.xlu0 %v3233_v24, %s4682_s11  ;;  %v5187_v39 = vpop.permute.xlu0 %3103  ;;  %v3187_v7 = vld [vmem:[#allocation2 + $0xb8] sm:$0x1f] }
 0x19a   : > { %v1783_v55 = vrot.slane %v1781_v21, 3  ;;  %v1786_v29 = vrot.slane %v1784_v3, 4  ;;  %v1557_v1 = vshrl.u32 %v1358_v9, 16  ;;  %v1560_v59 = vshll.u32 %v1358_v9, 16  ;;  %v5193_v63 = vpop.permute.xlu1 %2189  ;;  %v827_v58 = vld [vmem:[#allocation2 + $0x28] sm:$0xf] }
 0x19b   : > { %v2823_v42 = vsel %vm667_vm3, %v2814_v22, %v2822_v28  ;;  %v1779_v17 = vor.u32 %v1778_v35, %v1775_v23  ;;  %v861_v43 = vor.u32 %v860_v36, %v4983_v56  ;;  %v1565_v44 = vshrl.u32 %v1359_v40, 16  ;;  %v826_v23 = vld [vmem:[#allocation2 + $0x20] sm:$0xf8]  ;;  %v1726_v28 = vld [vmem:[#allocation2 + $0xb0] sm:$0xf8] }
 0x19c   : > { %2944 = vrot.lane.b32.xlu1 %v2823_v42, %s4681_s8  ;;  %v1787_v26 = vor.u32 %v1786_v29, %v1783_v55  ;;  %v1559_v34 = vrot.slane %v1557_v1, 4  ;;  %v1562_v57 = vrot.slane %v1560_v59, 5  ;;  %v1568_v45 = vshll.u32 %v1359_v40, 16  ;;  %v1170_v24 = vld [vmem:[#allocation2 + $0x60] sm:$0xf0] }
 0x19d   : > { %v870_v0 = vsel %vm667_vm3, %v861_v43, %v869_v46  ;;  %v1567_v32 = vrot.slane %v1565_v44, 4  ;;  %v2319_v62 = vshrl.u32 %v2256_v31, 16  ;;  %v2322_v56 = vshll.u32 %v2256_v31, 16  ;;  %v5199_v48 = vpop.permute.xlu0 %3119  ;;  %v1727_v1 = vld [vmem:[#allocation2 + $0xb8] sm:$0xf] }
 0x19e   : > { %v1788_v2 = vsel %vm667_vm3, %v1779_v17, %v1787_v26  ;;  %1142 = vst.msk [vmem:[#allocation3] sm:$0xff] %vm603_vm1, %v870_v0  ;;  %v1563_v61 = vor.u32 %v1562_v57, %v1559_v34  ;;  %v1570_v37 = vrot.slane %v1568_v45, 5  ;;  %v2327_v4 = vshrl.u32 %v2257_v47, 16  ;;  %v1276_v22 = vpop.permute.xlu1 %1275  ;;  %v1171_v43 = vld [vmem:[#allocation2 + $0x68] sm:$0xf] }
 0x19f   : > { %2014 = vrot.lane.b32.xlu0 %v1788_v2, %s4683_s18  ;;  %1320 = vst.msk [vmem:[#allocation3] sm:$0xff] %vm1319_vm12, %v1272_v11  ;;  %v2321_v49 = vrot.slane %v2319_v62, 4  ;;  %v2324_v51 = vrot.slane %v2322_v56, 5  ;;  %v2330_v46 = vshll.u32 %v2257_v47, 16  ;;  %v2154_v8 = vrot.slane %v2085_v53, 4 }
 0x1a0   : > { %v1571_v15 = vor.u32 %v1570_v37, %v1567_v32  ;;  %v2329_v10 = vrot.slane %v2327_v4, 4  ;;  %v2155_v12 = vrot.slane %v2086_v16, 4  ;;  %v3354_v38 = vshrl.u32 %v3186_v52, 16  ;;  %1690 = vst.msk [vmem:[#allocation3] sm:$0xff] %vm1689_vm13, %v5178_v19 }
 0x1a1   : > { %v2325_v18 = vor.u32 %v2324_v51, %v2321_v49  ;;  %v2332_v5 = vrot.slane %v2330_v46, 5  ;;  %v3357_v25 = vshll.u32 %v3186_v52, 16  ;;  %v3362_v9 = vshrl.u32 %v3187_v7, 16  ;;  %v5204_v44 = vpop.permute.xlu0 %1273  ;;  %v824_v51 = vld [vmem:[#allocation2 + $0x10] sm:$0xf8] }
 0x1a2   : > { %v1572_v21 = vsel %vm1368_vm7, %v1563_v61, %v1571_v15  ;;  %v2156_v11 = vsel %vm1222_vm9, %v2154_v8, %v2155_v12  ;;  %v3356_v3 = vrot.slane %v3354_v38, 4  ;;  %v3365_v40 = vshll.u32 %v3187_v7, 16  ;;  %v5207_v57 = vpop.permute.xlu1 %2205  ;;  %v825_v61 = vld [vmem:[#allocation2 + $0x18] sm:$0xf]  ;;  %v2101_v46 = vld [vmem:[#allocation2 + $0xe0] sm:$0xf0] }
 0x1a3   : > { %1663 = vrot.lane.b32.xlu1 %v1572_v21, %s4677_s12  ;;  %v2333_v35 = vor.u32 %v2332_v5, %v2329_v10  ;;  %v3359_v36 = vrot.slane %v3357_v25, 5  ;;  %v3364_v55 = vrot.slane %v3362_v9, 4  ;;  %v897_v29 = vshrl.u32 %v827_v58, 16  ;;  %v2272_v21 = vld [vmem:[#allocation2 + $0xb0] sm:$0xf0] }
 0x1a4   : > { %v3367_v59 = vrot.slane %v3365_v40, 5  ;;  %v900_v31 = vshll.u32 %v827_v58, 16  ;;  %v889_v42 = vshrl.u32 %v826_v23, 16  ;;  %v892_v17 = vshll.u32 %v826_v23, 16  ;;  %v2102_v58 = vld [vmem:[#allocation2 + $0xe8] sm:$0xf] }
 0x1a5   : > { %v2334_v47 = vsel %vm1368_vm7, %v2325_v18, %v2333_v35  ;;  %v3360_v52 = vor.u32 %v3359_v36, %v3356_v3  ;;  %v899_v26 = vrot.slane %v897_v29, 3  ;;  %v1241_v34 = vrot.slane %v1170_v24, 4  ;;  %v5212_v8 = vpop.permute.xlu0 %2187 }
 0x1a6   : > { %2560 = vrot.lane.b32.xlu0 %v2334_v47, %s4684_s20  ;;  %v3368_v45 = vor.u32 %v3367_v59, %v3364_v55  ;;  %v902_v53 = vrot.slane %v900_v31, 4  ;;  %v891_v0 = vrot.slane %v889_v42, 3  ;;  %v894_v32 = vrot.slane %v892_v17, 4  ;;  %v5215_v18 = vpop.permute.xlu1 %1291  ;;  %v843_v47 = vld [vmem:[#allocation2 + $0xa8] sm:$0xf] }
 0x1a7   : > { %2197 = vrot.lane.b32.xlu1 %v2156_v11, %s4680_s9  ;;  %v1242_v62 = vrot.slane %v1171_v43, 4  ;;  %v1909_v56 = vshrl.u32 %v1726_v28, 16  ;;  %v1912_v16 = vshll.u32 %v1726_v28, 16  ;;  %v1917_v2 = vshrl.u32 %v1727_v1, 16  ;;  %v2273_v28 = vld [vmem:[#allocation2 + $0xb8] sm:$0x1f] }
 0x1a8   : > { %v3369_v37 = vsel %vm1368_vm7, %v3360_v52, %v3368_v45  ;;  %v903_v4 = vor.u32 %v902_v53, %v899_v26  ;;  %v895_v7 = vor.u32 %v894_v32, %v891_v0  ;;  %v1920_v49 = vshll.u32 %v1727_v1, 16  ;;  %v842_v1 = vld [vmem:[#allocation2 + $0xa0] sm:$0xf8]  ;;  %v2997_v53 = vld [vmem:[#allocation2 + $0x50] sm:$0xf0] }
 0x1a9   : > { %v1243_v15 = vsel %vm1222_vm9, %v1241_v34, %v1242_v62  ;;  %v1911_v10 = vrot.slane %v1909_v56, 3  ;;  %v1914_v12 = vrot.slane %v1912_v16, 4  ;;  %v1919_v38 = vrot.slane %v1917_v2, 3  ;;  %v5222_v59 = vpop.permute.xlu0 %2203  ;;  %v2998_v0 = vld [vmem:[#allocation2 + $0x58] sm:$0xf] }
 0x1aa   : > { %3490 = vrot.lane.b32.xlu0 %v3369_v37, %s4682_s11  ;;  %v904_v5 = vsel %vm667_vm3, %v895_v7, %v903_v4  ;;  %v1922_v25 = vrot.slane %v1920_v49, 4  ;;  %v880_v9 = vshrl.u32 %v825_v61, 16  ;;  %v883_v23 = vshll.u32 %v825_v61, 16  ;;  %v5224_v52 = vpop.permute.xlu1 %3117  ;;  %v2999_v2 = vld [vmem:[#allocation2 + $0x60] sm:$0xf0] }
 0x1ab   : > { %1144 = vst.msk [vmem:[#allocation3 + $0x10] sm:$0xff] %vm603_vm1, %v904_v5  ;;  %1283 = vrot.lane.b32.xlu1 %v1243_v15, %s4678_s23  ;;  %v1915_v11 = vor.u32 %v1914_v12, %v1911_v10  ;;  %v872_v3 = vshrl.u32 %v824_v51, 16  ;;  %v875_v40 = vshll.u32 %v824_v51, 16  ;;  %v2178_v24 = vrot.slane %v2101_v46, 4  ;;  %v4570_v61 = vld [vmem:[%s6234_s3] sm:$0xff]  }
 0x1ac   : > { %1322 = vst.msk [vmem:[#allocation3 + $0x10] sm:$0xff] %vm1319_vm12, %v1276_v22  ;;  %v1923_v35 = vor.u32 %v1922_v25, %v1919_v38  ;;  %v882_v36 = vrot.slane %v880_v9, 3  ;;  %v885_v55 = vrot.slane %v883_v23, 4  ;;  %v2179_v29 = vrot.slane %v2102_v58, 4  ;;  %v3000_v51 = vld [vmem:[#allocation2 + $0x68] sm:$0xf]  ;;  %4435 = vmatprep.subr.bf16.mxu1 %v4570_v61 }
 0x1ad   : > { %v874_v31 = vrot.slane %v872_v3, 3  ;;  %v877_v42 = vrot.slane %v875_v40, 4  ;;  %v2455_v17 = vshrl.u32 %v2272_v21, 16  ;;  %v2458_v43 = vshll.u32 %v2272_v21, 16  ;;  %v5233_v46 = vpop.permute.xlu0 %2926  ;;  %v1168_v58 = vld [vmem:[#allocation2 + $0x50] sm:$0xf0]  ;;  %4436 = vmatpush3.bf16.msra.mxu1 %v4570_v61 }
 0x1ae   : > { %v1924_v26 = vsel %vm667_vm3, %v1915_v11, %v1923_v35  ;;  %v886_v34 = vor.u32 %v885_v55, %v882_v36  ;;  %v2180_v45 = vsel %vm1222_vm9, %v2178_v24, %v2179_v29  ;;  %v2463_v22 = vshrl.u32 %v2273_v28, 16  ;;  %v1169_v5 = vld [vmem:[#allocation2 + $0x58] sm:$0xf]  ;;  %v840_v25 = vld [vmem:[#allocation2 + $0x90] sm:$0xf8]  ;;  %v5236_v9 = vpop.permute.xlu1 %1289 }
 0x1af   : > { %2030 = vrot.lane.b32.xlu0 %v1924_v26, %s4683_s18  ;;  %v878_v32 = vor.u32 %v877_v42, %v874_v31  ;;  %2213 = vrot.lane.b32.xlu1 %v2180_v45, %s4680_s9  ;;  %v2457_v62 = vrot.slane %v2455_v17, 4  ;;  %v2460_v56 = vrot.slane %v2458_v43, 5  ;;  %v2466_v16 = vshll.u32 %v2273_v28, 16  ;;  %v3015_v40 = vld [vmem:[#allocation2 + $0xe0] sm:$0xf0] }
 0x1b0   : > { %v2465_v37 = vrot.slane %v2463_v22, 4  ;;  %v1025_v4 = vshrl.u32 %v842_v1, 16  ;;  %v1028_v7 = vshll.u32 %v842_v1, 16  ;;  %v1033_v49 = vshrl.u32 %v843_v47, 16  ;;  %v841_v24 = vld [vmem:[#allocation2 + $0x98] sm:$0xf] }
 0x1b1   : > { %v887_v15 = vsel %vm667_vm3, %v878_v32, %v886_v34  ;;  %v2461_v10 = vor.u32 %v2460_v56, %v2457_v62  ;;  %v2468_v12 = vrot.slane %v2466_v16, 5  ;;  %v1036_v38 = vshll.u32 %v843_v47, 16  ;;  %v3016_v29 = vld [vmem:[#allocation2 + $0xe8] sm:$0xf]  ;;  %v2083_v47 = vld [vmem:[#allocation2 + $0x50] sm:$0xf0]  ;;  %v5244_v26 = vpop.permute.xlu0 %3472 }
 0x1b2   : > { %1143 = vst.msk [vmem:[#allocation3 + $0x8] sm:$0xff] %vm603_vm1, %v887_v15  ;;  %v1027_v23 = vrot.slane %v1025_v4, 3  ;;  %v1030_v21 = vrot.slane %v1028_v7, 4  ;;  %v1035_v11 = vrot.slane %v1033_v49, 3  ;;  %v3064_v3 = vrot.slane %v2997_v53, 4  ;;  %v4571_v1 = vld [vmem:[%s6234_s3 + $0x8] sm:$0xff]   ;;  %v5248_v62 = vpop.permute.xlu1 %2012 }
 0x1b3   : > { %1321 = vst.msk [vmem:[#allocation3 + $0x8] sm:$0xff] %vm1319_vm12, %v5204_v44  ;;  %v2469_v28 = vor.u32 %v2468_v12, %v2465_v37  ;;  %v1038_v35 = vrot.slane %v1036_v38, 4  ;;  %v3065_v36 = vrot.slane %v2998_v0, 4  ;;  %v3067_v55 = vrot.slane %v2999_v2, 4  ;;  %v3013_v53 = vld [vmem:[#allocation2 + $0xd0] sm:$0xf0]  ;;  %4437 = vmatprep.subr.bf16.mxu1 %v4571_v1 }
 0x1b4   : > { %v1031_v31 = vor.u32 %v1030_v21, %v1027_v23  ;;  %v3068_v42 = vrot.slane %v3000_v51, 4  ;;  %v1238_v17 = vrot.slane %v1168_v58, 4  ;;  %v1239_v43 = vrot.slane %v1169_v5, 4  ;;  %v3014_v0 = vld [vmem:[#allocation2 + $0xd8] sm:$0xf]  ;;  %4438 = vmatpush3.bf16.msra.mxu1 %v4571_v1 }
 0x1b5   : > { %v2470_v34 = vsel %vm1368_vm7, %v2461_v10, %v2469_v28  ;;  %v1039_v45 = vor.u32 %v1038_v35, %v1035_v11  ;;  %v3066_v44 = vsel %vm1222_vm9, %v3064_v3, %v3065_v36  ;;  %v3091_v22 = vrot.slane %v3015_v40, 4  ;;  %v2084_v32 = vld [vmem:[#allocation2 + $0x58] sm:$0xf]  ;;  %v1184_v37 = vld [vmem:[#allocation2 + $0xd0] sm:$0xf0] }
 0x1b6   : > { %2576 = vrot.lane.b32.xlu0 %v2470_v34, %s4684_s20  ;;  %3109 = vrot.lane.b32.xlu1 %v3066_v44, %s4679_s21  ;;  %v3069_v56 = vsel %vm1222_vm9, %v3067_v55, %v3068_v42  ;;  %v1240_v16 = vsel %vm1222_vm9, %v1238_v17, %v1239_v43  ;;  %v3092_v2 = vrot.slane %v3016_v29, 4  ;;  %v1008_v61 = vshrl.u32 %v840_v25, 16  ;;  %v1185_v4 = vld [vmem:[#allocation2 + $0xd8] sm:$0xf]  ;;  %v2099_v10 = vld [vmem:[#allocation2 + $0xd0] sm:$0xf0]  ;;  %v1646_v11 = vpop.permute.xlu0 %1645 }
 0x1b7   : > { %v1040_v7 = vsel %vm667_vm3, %v1031_v31, %v1039_v45  ;;  %v1011_v49 = vshll.u32 %v840_v25, 16  ;;  %v1016_v51 = vshrl.u32 %v841_v24, 16  ;;  %v1019_v15 = vshll.u32 %v841_v24, 16  ;;  %v630_v12 = vld [vmem:[#allocation2 + $0x60] sm:$0x8]  ;;  %v5259_v24 = vpop.permute.xlu1 %2558  ;;  %1692 = vst.msk [vmem:[#allocation3 + $0x10] sm:$0xff] %vm1689_vm13, %v1646_v11 }
 0x1b8   : > { %1152 = vst.msk [vmem:[#allocation3 + $0x50] sm:$0xff] %vm603_vm1, %v1040_v7  ;;  %v3093_v38 = vsel %vm1222_vm9, %v3091_v22, %v3092_v2  ;;  %v1010_v58 = vrot.slane %v1008_v61, 3  ;;  %v3088_v5 = vrot.slane %v3013_v53, 4  ;;  %v3089_v23 = vrot.slane %v3014_v0, 4  ;;  %v2100_v21 = vld [vmem:[#allocation2 + $0xd8] sm:$0xf] }
 0x1b9   : > { %1330 = vst.msk [vmem:[#allocation3 + $0x50] sm:$0xff] %vm1319_vm12, %v5215_v18  ;;  %v1013_v3 = vrot.slane %v1011_v49, 4  ;;  %v1018_v40 = vrot.slane %v1016_v51, 3  ;;  %v1021_v25 = vrot.slane %v1019_v15, 4  ;;  %v2151_v28 = vrot.slane %v2083_v47, 4 }
 0x1ba   : > { %v687_v35 = vld [vmem:[#allocation2 + $0x68] sm:$0x10]  ;;  %3111 = vrot.lane.b32.xlu0 %v3069_v56, %s4679_s21  ;;  %1281 = vrot.lane.b32.xlu1 %v1240_v16, %s4678_s23  ;;  %v3090_v36 = vsel %vm1222_vm9, %v3088_v5, %v3089_v23  ;;  %v2152_v55 = vrot.slane %v2084_v32, 4  ;;  %v1262_v29 = vrot.slane %v1184_v37, 4  ;;  %v1263_v1 = vrot.slane %v1185_v4, 4 }
 0x1bb   : > { %v1717_v31 = vld [vmem:[#allocation2 + $0x68] sm:$0xf]  ;;  %v1014_v42 = vor.u32 %v1013_v3, %v1010_v58  ;;  %v1022_v17 = vor.u32 %v1021_v25, %v1018_v40  ;;  %v2175_v18 = vrot.slane %v2099_v10, 4  ;;  %v2176_v43 = vrot.slane %v2100_v21, 4  ;;  %v2262_v45 = vld [vmem:[#allocation2 + $0x60] sm:$0xf0]  ;;  %v5268_v53 = vpop.permute.xlu0 %2942  ;;  %v5275_v61 = vpop.permute.xlu1 %2028 }
 0x1bc   : > { %v2631_v34 = vld [vmem:[#allocation2 + $0x68] sm:$0xf]  ;;  %v2153_v47 = vsel %vm1222_vm9, %v2151_v28, %v2152_v55  ;;  %v1264_v44 = vsel %vm1222_vm9, %v1262_v29, %v1263_v1  ;;  %v631_v22 = vsel %vm4905_vm8, 0, %v630_v12  ;;  %v3176_v0 = vld [vmem:[#allocation2 + $0x60] sm:$0xf0]  ;;  %v1832_v16 = vshrl.u32 %v1717_v31, 16 }
 0x1bd   : > { %v1023_v32 = vsel %vm667_vm3, %v1014_v42, %v1022_v17  ;;  %v2177_v56 = vsel %vm1222_vm9, %v2175_v18, %v2176_v43  ;;  %632 = vst [vmem:[#allocation2 + $0x60] sm:$0x8] %v631_v22  ;;  %v1835_v2 = vshll.u32 %v1717_v31, 16  ;;  %v2731_v37 = vshrl.u32 %v2631_v34, 16  ;;  %v654_v51 = vld [vmem:[#allocation2 + $0xe0] sm:$0x8] }
 0x1be   : > { %3127 = vrot.lane.b32.xlu0 %v3093_v38, %s4679_s21  ;;  %1151 = vst.msk [vmem:[#allocation3 + $0x48] sm:$0xff] %vm603_vm1, %v1023_v32  ;;  %3125 = vrot.lane.b32.xlu1 %v3090_v36, %s4679_s21  ;;  %v2734_v4 = vshll.u32 %v2631_v34, 16  ;;  %v688_v7 = vsel %vm4899_vm4, 0, %v687_v35  ;;  %v2370_v49 = vshrl.u32 %v2262_v45, 16  ;;  %v5284_v19 = vrot.slane %v1832_v16, 3 }
 0x1bf   : > { %1329 = vst.msk [vmem:[#allocation3 + $0x48] sm:$0xff] %vm1319_vm12, %v5236_v9  ;;  %v5286_v15 = vrot.slane %v1835_v2, 4  ;;  %689 = vst [vmem:[#allocation2 + $0x68] sm:$0x10] %v688_v7  ;;  %v2373_v10 = vshll.u32 %v2262_v45, 16  ;;  %v3269_v12 = vshrl.u32 %v3176_v0, 16  ;;  %v5300_v25 = vpop.permute.xlu1 %2574  ;;  %v5306_v35 = vadd.f32 %v5140_v6, %v5060_v13 }
 0x1c0   : > { %v1733_v38 = vld [vmem:[#allocation2 + $0xe8] sm:$0xf]  ;;  %v5288_v58 = vrot.slane %v2731_v37, 3  ;;  %v5290_v5 = vrot.slane %v2734_v4, 4  ;;  %v5292_v23 = vrot.slane %v2370_v49, 4  ;;  %v3272_v21 = vshll.u32 %v3176_v0, 16 }
 0x1c1   : > { %v1348_v11 = vld [vmem:[#allocation2 + $0x60] sm:$0xf0]  ;;  %v1838_v3 = vor.u32 %v5286_v15, %v5284_v19  ;;  %v5296_v9 = vrot.slane %v2373_v10, 5  ;;  %v5298_v40 = vrot.slane %v3269_v12, 4  ;;  %v5302_v28 = vpop.permute.xlu0 %3488  ;;  %v655_v29 = vsel %vm4905_vm8, 0, %v654_v51 }
 0x1c2   : > { %2195 = vrot.lane.b32.xlu0 %v2153_v47, %s4680_s9  ;;  %1297 = vrot.lane.b32.xlu1 %v1264_v44, %s4678_s23  ;;  %v2737_v36 = vor.u32 %v5290_v5, %v5288_v58  ;;  %v5312_v55 = vrot.slane %v3272_v21, 5  ;;  %v1968_v1 = vshrl.u32 %v1733_v38, 16  ;;  %v585_v42 = vmax.f32 %v5306_v35, 0.0  ;;  %656 = vst [vmem:[#allocation2 + $0xe0] sm:$0x8] %v655_v29 }
 0x1c3   : > { %v2376_v31 = vor.u32 %v5296_v9, %v5292_v23  ;;  %v1971_v13 = vshll.u32 %v1733_v38, 16  ;;  %v1472_v17 = vshrl.u32 %v1348_v11, 16  ;;  %v1475_v47 = vshll.u32 %v1348_v11, 16  ;;  %v1644_v2 = vpop.permute.xlu1 %1643 }
 0x1c4   : > { %v1716_v18 = vld [vmem:[#allocation2 + $0x60] sm:$0xf8]  ;;  %v3275_v34 = vor.u32 %v5312_v55, %v5298_v40  ;;  %v5321_v45 = vrot.slane %v1968_v1, 3  ;;  %v5325_v44 = vadd.f32 %v5140_v6, %v5067_v54  ;;  %v504_v51 = vadd.f32 %v5140_v6, %v5071_v14  ;;  %1691 = vst.msk [vmem:[#allocation3 + $0x8] sm:$0xff] %vm1689_vm13, %v1644_v2 }
 0x1c5   : > { %v2630_v43 = vld [vmem:[#allocation2 + $0x60] sm:$0xf8]  ;;  %v1824_v22 = vshrl.u32 %v1716_v18, 16  ;;  %v1827_v0 = vshll.u32 %v1716_v18, 16  ;;  %v5328_v7 = vrot.slane %v1971_v13, 4  ;;  %v5330_v49 = vrot.slane %v1472_v17, 4 }
 0x1c6   : > { %v2723_v32 = vshrl.u32 %v2630_v43, 16  ;;  %v2726_v16 = vshll.u32 %v2630_v43, 16  ;;  %2211 = vrot.lane.b32.xlu0 %v2177_v56, %s4680_s9  ;;  %v2263_v37 = vld [vmem:[#allocation2 + $0x68] sm:$0x1f]  ;;  %v1662_v54 = vpop.permute.xlu0 %1661  ;;  %v496_v19 = vadd.f32 %v5140_v6, %v5074_v27  ;;  %v1477_v29 = vrot.slane %v1475_v47, 5  ;;  %2060 = vst.msk [vmem:[#allocation3 + $0x8] sm:$0xff] %vm2058_vm14, %v5248_v62 }
 0x1c7   : > { %v3177_v4 = vld [vmem:[#allocation2 + $0x68] sm:$0x1f]  ;;  %v1826_v15 = vrot.slane %v1824_v22, 3  ;;  %v1829_v10 = vrot.slane %v1827_v0, 4  ;;  %1700 = vst.msk [vmem:[#allocation3 + $0x50] sm:$0xff] %vm1689_vm13, %v1662_v54  ;;  %v2378_v56 = vshrl.u32 %v2263_v37, 16  ;;  %v1974_v14 = vor.u32 %v5328_v7, %v5321_v45 }
 0x1c8   : > { %v2725_v12 = vrot.slane %v2723_v32, 3  ;;  %v2728_v38 = vrot.slane %v2726_v16, 4  ;;  %v2381_v58 = vshll.u32 %v2263_v37, 16  ;;  %v3277_v5 = vshrl.u32 %v3177_v4, 16  ;;  %v1349_v55 = vld [vmem:[#allocation2 + $0x68] sm:$0x1f] }
 0x1c9   : > { %v3280_v21 = vshll.u32 %v3177_v4, 16  ;;  %v1830_v11 = vor.u32 %v1829_v10, %v1826_v15  ;;  %v5340_v1 = vpop.permute.xlu1 %2940  ;;  %v2380_v27 = vrot.slane %v2378_v56, 4  ;;  %v1732_v18 = vld [vmem:[#allocation2 + $0xe0] sm:$0xf8]  ;;  %v1478_v47 = vor.u32 %v1477_v29, %v5330_v49  ;;  %v711_v37 = vld [vmem:[#allocation2 + $0xe8] sm:$0x10] }
 0x1ca   : > { %v2729_v40 = vor.u32 %v2728_v38, %v2725_v12  ;;  %v2383_v6 = vrot.slane %v2381_v58, 5  ;;  %v3279_v13 = vrot.slane %v3277_v5, 4  ;;  %v1960_v0 = vshrl.u32 %v1732_v18, 16  ;;  %v2278_v10 = vld [vmem:[#allocation2 + $0xe0] sm:$0xf0]  ;;  %2237 = vst.msk [vmem:[#allocation3 + $0x8] sm:$0xff] %vm2235_vm15, %v5193_v63 }
 0x1cb   : > { %v3282_v17 = vrot.slane %v3280_v21, 5  ;;  %v1839_v43 = vsel %vm667_vm3, %v1830_v11, %v1838_v3  ;;  %v1963_v32 = vshll.u32 %v1732_v18, 16  ;;  %v1480_v2 = vshrl.u32 %v1349_v55, 16  ;;  %v2646_v58 = vld [vmem:[#allocation2 + $0xe0] sm:$0xf8]  ;;  %2606 = vst.msk [vmem:[#allocation3 + $0x8] sm:$0xff] %vm6241_vm2, %v5259_v24 }
 0x1cc   : > { %v2738_v22 = vsel %vm667_vm3, %v2729_v40, %v2737_v36  ;;  %2020 = vrot.lane.b32.xlu1 %v1839_v43, %s4683_s18  ;;  %v2384_v45 = vor.u32 %v2383_v6, %v2380_v27  ;;  %v2011_v4 = vpop.permute.xlu0 %2010  ;;  %v1962_v7 = vrot.slane %v1960_v0, 3  ;;  %v1483_v15 = vshll.u32 %v1349_v55, 16  ;;  %v684_v55 = vld [vmem:[#allocation2 + $0x58] sm:$0x10]  ;;  %v3174_v0 = vld [vmem:[#allocation2 + $0x50] sm:$0xf0] }
 0x1cd   : > { %2934 = vrot.lane.b32.xlu0 %v2738_v22, %s4681_s8  ;;  %v3283_v16 = vor.u32 %v3282_v17, %v3279_v13  ;;  %v1965_v54 = vrot.slane %v1963_v32, 4  ;;  %v583_v3 = vmax.f32 %v5325_v44, 0.0  ;;  %v1482_v38 = vrot.slane %v1480_v2, 4  ;;  %2059 = vst.msk [vmem:[#allocation3] sm:$0xff] %vm2058_vm14, %v2011_v4  ;;  %v2629_v17 = vld [vmem:[#allocation2 + $0x58] sm:$0xf] }
 0x1ce   : > { %v2385_v36 = vsel %vm1368_vm7, %v2376_v31, %v2384_v45  ;;  %v586_v56 = vmax.f32 %v504_v51, 0.0  ;;  %v1485_v5 = vrot.slane %v1483_v15, 5  ;;  %v584_v21 = vmax.f32 %v496_v19, 0.0  ;;  %v1660_v11 = vpop.permute.xlu1 %1659  ;;  %2236 = vst.msk [vmem:[#allocation3] sm:$0xff] %vm2235_vm15, %v5212_v8 }
 0x1cf   : > { %v3284_v12 = vsel %vm1368_vm7, %v3275_v34, %v3283_v16  ;;  %v1966_v49 = vor.u32 %v1965_v54, %v1962_v7  ;;  %v712_v23 = vsel %vm4899_vm4, 0, %v711_v37  ;;  %v2506_v9 = vshrl.u32 %v2278_v10, 16  ;;  %v2647_v34 = vld [vmem:[#allocation2 + $0xe8] sm:$0xf]  ;;  %1699 = vst.msk [vmem:[#allocation3 + $0x48] sm:$0xff] %vm1689_vm13, %v1660_v11 }
 0x1d0   : > { %2566 = vrot.lane.b32.xlu1 %v2385_v36, %s4684_s20  ;;  %v730_v44 = vpack.c.bf16 %v586_v56, %v585_v42  ;;  %v2509_v31 = vshll.u32 %v2278_v10, 16  ;;  %v1486_v19 = vor.u32 %v1485_v5, %v1482_v38  ;;  %v729_v40 = vpack.c.bf16 %v584_v21, %v583_v3  ;;  %713 = vst [vmem:[#allocation2 + $0xe8] sm:$0x10] %v712_v23  ;;  %v627_v42 = vld [vmem:[#allocation2 + $0x50] sm:$0x8] }
 0x1d1   : > { %3480 = vrot.lane.b32.xlu0 %v3284_v12, %s4682_s11  ;;  %v1975_v51 = vsel %vm667_vm3, %v1966_v49, %v1974_v14  ;;  %v2859_v35 = vshrl.u32 %v2646_v58, 16  ;;  %2068 = vst.msk [vmem:[#allocation3 + $0x48] sm:$0xff] %vm2058_vm14, %v5275_v61  ;;  %v2557_v62 = vpop.permute.xlu0 %2556  ;;  %v5366_v27 = vrot.slane %v2506_v9, 4  ;;  %v2862_v13 = vshll.u32 %v2646_v58, 16  ;;  %v1346_v12 = vld [vmem:[#allocation2 + $0x50] sm:$0xf0] }
 0x1d2   : > { %v762_v29 = vrot.slane %v730_v44, 4  ;;  %v5368_v6 = vrot.slane %v2509_v31, 5  ;;  %v1487_v18 = vsel %vm1368_vm7, %v1478_v47, %v1486_v19  ;;  %v761_v14 = vrot.slane %v729_v40, 4  ;;  %v5371_v32 = vpop.permute.xlu1 %2193  ;;  %v5391_v58 = vld [vmem:[#allocation2 + $0x58] sm:$0xf]  ;;  %2245 = vst.msk [vmem:[#allocation3 + $0x48] sm:$0xff] %vm2235_vm15, %v5207_v57 }
 0x1d3   : > { %v2861_v43 = vrot.slane %v2859_v35, 3  ;;  %v2867_v22 = vshrl.u32 %v2647_v34, 16  ;;  %v2864_v45 = vrot.slane %v2862_v13, 4  ;;  %v2870_v16 = vshll.u32 %v2647_v34, 16  ;;  %2605 = vst.msk [vmem:[#allocation3] sm:$0xff] %vm6241_vm2, %v2557_v62  ;;  %2614 = vst.msk [vmem:[#allocation3 + $0x48] sm:$0xff] %vm6241_vm2, %v5300_v25 }
 0x1d4   : > { %2036 = vrot.lane.b32.xlu1 %v1975_v51, %s4683_s18  ;;  %804 = vst.msk [vmem:[#allocation2 + $0x80] sm:$0xf0] %vm788_vm10, %v762_v29  ;;  %v2512_v61 = vor.u32 %v5368_v6, %v5366_v27  ;;  %v628_v47 = vsel %vm4905_vm8, 0, %v627_v42  ;;  %802 = vst.msk [vmem:[#allocation2 + $0x70] sm:$0xf0] %vm788_vm10, %v761_v14  ;;  %v2714_v37 = vshrl.u32 %v2629_v17, 16 }
 0x1d5   : > { %1653 = vrot.lane.b32.xlu0 %v1487_v18, %s4677_s12  ;;  %805 = vst.msk [vmem:[#allocation2 + $0x88] sm:$0xf] %vm790_vm11, %v762_v29  ;;  %803 = vst.msk [vmem:[#allocation2 + $0x78] sm:$0xf] %vm790_vm11, %v761_v14  ;;  %v2869_v2 = vrot.slane %v2867_v22, 3  ;;  %v2717_v4 = vshll.u32 %v2629_v17, 16  ;;  %v5385_v54 = vpop.permute.xlu0 %3486  ;;  %v2865_v15 = vor.u32 %v2864_v45, %v2861_v43 }
 0x1d6   : > { %629 = vst [vmem:[#allocation2 + $0x50] sm:$0x8] %v628_v47  ;;  %v685_v7 = vsel %vm4899_vm4, 0, %v684_v55  ;;  %v2872_v3 = vrot.slane %v2870_v16, 4  ;;  %v3252_v10 = vshrl.u32 %v3174_v0, 16  ;;  %v3255_v36 = vshll.u32 %v3174_v0, 16  ;;  %v5393_v49 = vpop.permute.xlu1 %1279 }
 0x1d7   : > { %686 = vst [vmem:[#allocation2 + $0x58] sm:$0x10] %v685_v7  ;;  %v5387_v38 = vrot.slane %v2714_v37, 3  ;;  %v5389_v56 = vrot.slane %v2717_v4, 4  ;;  %v2279_v5 = vld [vmem:[#allocation2 + $0xe8] sm:$0x1f] }
 0x1d8   : > { %v2873_v21 = vor.u32 %v2872_v3, %v2869_v2  ;;  %v5395_v11 = vrot.slane %v3252_v10, 4  ;;  %v5397_v44 = vrot.slane %v3255_v36, 5  ;;  %v2514_v23 = vshrl.u32 %v2279_v5, 16  ;;  %2975 = vst.msk [vmem:[#allocation3] sm:$0xff] %vm2974_vm5, %v5233_v46  ;;  %v5431_v55 = vld [vmem:[%s6233_s2] ss:$0 sm:$0xff] }
 0x1d9   : > { %v2517_v9 = vshll.u32 %v2279_v5, 16  ;;  %v2720_v31 = vor.u32 %v5389_v56, %v5387_v38  ;;  %v5412_v8 = vpop.permute.xlu0 %2026  ;;  %v1455_v34 = vshrl.u32 %v1346_v12, 16  ;;  %3152 = vst.msk [vmem:[#allocation3] sm:$0xff] %vm3151_vm6, %v5187_v39  ;;  %v1458_v24 = vshll.u32 %v1346_v12, 16  ;;  %v651_v56 = vld [vmem:[#allocation2 + $0xd0] sm:$0x8] }
 0x1da   : > { %v2874_v63 = vsel %vm667_vm3, %v2865_v15, %v2873_v21  ;;  %v3258_v57 = vor.u32 %v5397_v44, %v5395_v11  ;;  %v2516_v51 = vrot.slane %v2514_v23, 4  ;;  %v1815_v25 = vshrl.u32 %v5391_v58, 16  ;;  %v5423_v40 = vpop.permute.xlu1 %2209  ;;  %3521 = vst.msk [vmem:[#allocation3] sm:$0xff] %vm3520_vm0, %v5244_v26  ;;  %v2645_v21 = vld [vmem:[#allocation2 + $0xd8] sm:$0xf] }
 0x1db   : > { %v2519_v19 = vrot.slane %v2517_v9, 5  ;;  %2950 = vrot.lane.b32.xlu0 %v2874_v63, %s4681_s8  ;;  %v1457_v42 = vrot.slane %v1455_v34, 4  ;;  %v1818_v46 = vshll.u32 %v5391_v58, 16  ;;  %v5435_v39 = vadd.f32 %v5431_v55, %v5099_v20  ;;  %v2260_v63 = vld [vmem:[#allocation2 + $0x50] sm:$0xf0] }
 0x1dc   : > { %v5439_v62 = vadd.f32 %v5431_v55, %v5104_v30  ;;  %v5443_v14 = vadd.f32 %v5431_v55, %v5117_v33  ;;  %v1460_v45 = vrot.slane %v1458_v24, 5  ;;  %v1817_v6 = vrot.slane %v1815_v25, 3 }
 0x1dd   : > { %v2628_v35 = vld [vmem:[#allocation2 + $0x50] sm:$0xf8]  ;;  %v2520_v29 = vor.u32 %v2519_v19, %v2516_v51  ;;  %v5445_v43 = vpop.permute.xlu0 %2572  ;;  %v601_v5 = vmax.f32 %v5435_v39, 0.0  ;;  %v2853_v39 = vshll.u32 %v2645_v21, 16  ;;  %vm3580_vm2 = vcmask 293888  }
 0x1de   : > { %v2706_v13 = vshrl.u32 %v2628_v35, 16  ;;  %v2709_v17 = vshll.u32 %v2628_v35, 16  ;;  %v3175_v26 = vld [vmem:[#allocation2 + $0x58] sm:$0x1f]  ;;  %v1714_v16 = vld [vmem:[#allocation2 + $0x50] sm:$0xf8]  ;;  %v5451_v4 = vpop.permute.xlu1 %1295  ;;  %v1461_v15 = vor.u32 %v1460_v45, %v1457_v42 }
 0x1df   : > { %v1347_v18 = vld [vmem:[#allocation2 + $0x58] sm:$0x1f]  ;;  %v3260_v22 = vshrl.u32 %v3175_v26, 16  ;;  %v3263_v0 = vshll.u32 %v3175_v26, 16  ;;  %v2521_v30 = vsel %vm1368_vm7, %v2512_v61, %v2520_v29  ;;  %v1807_v12 = vshrl.u32 %v1714_v16, 16 }
 0x1e0   : > { %v1463_v20 = vshrl.u32 %v1347_v18, 16  ;;  %v2708_v47 = vrot.slane %v2706_v13, 3  ;;  %v2711_v2 = vrot.slane %v2709_v17, 4  ;;  %v1466_v37 = vshll.u32 %v1347_v18, 16  ;;  %2582 = vrot.lane.b32.xlu1 %v2521_v30, %s4684_s20  ;;  %v2261_v34 = vld [vmem:[#allocation2 + $0x58] sm:$0x1f] }
 0x1e1   : > { %v3262_v33 = vrot.slane %v3260_v22, 4  ;;  %v3265_v7 = vrot.slane %v3263_v0, 5  ;;  %v1810_v38 = vshll.u32 %v1714_v16, 16  ;;  %v5454_v58 = vpop.permute.xlu0 %3107  ;;  %v1820_v61 = vrot.slane %v1818_v46, 4  ;;  %v830_v18 = vld [vmem:[#allocation2 + $0x40] sm:$0xf8] }
 0x1e2   : > { %v1465_v3 = vrot.slane %v1463_v20, 4  ;;  %v2712_v10 = vor.u32 %v2711_v2, %v2708_v47  ;;  %v1468_v36 = vrot.slane %v1466_v37, 5  ;;  %v1809_v23 = vrot.slane %v1807_v12, 3  ;;  %v5458_v51 = vpop.permute.xlu1 %3105  ;;  %v831_v20 = vld [vmem:[#allocation2 + $0x48] sm:$0xf] }
 0x1e3   : > { %v3266_v27 = vor.u32 %v3265_v7, %v3262_v33  ;;  %v1812_v9 = vrot.slane %v1810_v38, 4  ;;  %v1821_v24 = vor.u32 %v1820_v61, %v1817_v6  ;;  %v599_v25 = vmax.f32 %v5439_v62, 0.0 }
 0x1e4   : > { %v2721_v11 = vsel %vm667_vm3, %v2712_v10, %v2720_v31  ;;  %v1469_v44 = vor.u32 %v1468_v36, %v1465_v3  ;;  %v652_v35 = vsel %vm4905_vm8, 0, %v651_v56  ;;  %v2850_v46 = vshrl.u32 %v2645_v21, 16 }
 0x1e5   : > { %2932 = vrot.lane.b32.xlu1 %v2721_v11, %s4681_s8  ;;  %v3267_v19 = vsel %vm1368_vm7, %v3258_v57, %v3266_v27  ;;  %v1813_v42 = vor.u32 %v1812_v9, %v1809_v23  ;;  %653 = vst [vmem:[#allocation2 + $0xd0] sm:$0x8] %v652_v35  ;;  %v5467_v29 = vpop.permute.xlu0 %3123  ;;  %v2353_v13 = vshrl.u32 %v2260_v63, 16  ;;  %v2356_v17 = vshll.u32 %v2260_v63, 16  ;;  %v1362_v27 = vld [vmem:[#allocation2 + $0xd0] sm:$0xf0] }
 0x1e6   : > { %3478 = vrot.lane.b32.xlu0 %v3267_v19, %s4682_s11  ;;  %v1470_v31 = vsel %vm1368_vm7, %v1461_v15, %v1469_v44  ;;  %v2361_v26 = vshrl.u32 %v2261_v34, 16  ;;  %v2364_v57 = vshll.u32 %v2261_v34, 16  ;;  %v5470_v22 = vrot.slane %v2850_v46, 3  ;;  %v5475_v16 = vpop.permute.xlu1 %1277  ;;  %v3190_v44 = vld [vmem:[#allocation2 + $0xd0] sm:$0xf0] }
 0x1e7   : > { %v1822_v62 = vsel %vm667_vm3, %v1813_v42, %v1821_v24  ;;  %v5472_v0 = vrot.slane %v2853_v39, 4  ;;  %v602_v45 = vmax.f32 %v5443_v14, 0.0  ;;  %v2355_v30 = vrot.slane %v2353_v13, 4  ;;  %v708_v14 = vld [vmem:[#allocation2 + $0xd8] sm:$0x10] }
 0x1e8   : > { %v2358_v47 = vrot.slane %v2356_v17, 5  ;;  %v2363_v2 = vrot.slane %v2361_v26, 4  ;;  %v2366_v37 = vrot.slane %v2364_v57, 5  ;;  %v560_v15 = vadd.f32 %v5431_v55, %v5120_v41  ;;  %v5497_v26 = vld [vmem:[#allocation2 + $0x88] sm:$0xf] }
 0x1e9   : > { %1651 = vrot.lane.b32.xlu1 %v1470_v31, %s4677_s12  ;;  %v2856_v33 = vor.u32 %v5472_v0, %v5470_v22  ;;  %v738_v7 = vpack.c.bf16 %v602_v45, %v601_v5  ;;  %v923_v3 = vshrl.u32 %v830_v18, 16  ;;  %v5483_v10 = vpop.permute.xlu0 %2191  ;;  %v926_v38 = vshll.u32 %v830_v18, 16  ;;  %v5493_v31 = vld [vmem:[#allocation2 + $0x80] sm:$0xf0] }
 0x1ea   : > { %2018 = vrot.lane.b32.xlu0 %v1822_v62, %s4683_s18  ;;  %v2359_v36 = vor.u32 %v2358_v47, %v2355_v30  ;;  %v2367_v12 = vor.u32 %v2366_v37, %v2363_v2  ;;  %v931_v56 = vshrl.u32 %v831_v20, 16  ;;  %v600_v61 = vmax.f32 %v560_v15, 0.0  ;;  %v5485_v23 = vpop.permute.xlu1 %3121  ;;  %v1731_v15 = vld [vmem:[#allocation2 + $0xd8] sm:$0xf] }
 0x1eb   : > { %v770_v6 = vrot.slane %v738_v7, 4  ;;  %v925_v21 = vrot.slane %v923_v3, 3  ;;  %v934_v11 = vshll.u32 %v831_v20, 16  ;;  %v928_v41 = vrot.slane %v926_v38, 4  ;;  %v3537_v20 = vld [vmem:[#allocation3] sm:$0xff] }
 0x1ec   : > { %v2644_v5 = vld [vmem:[#allocation2 + $0xd0] sm:$0xf8]  ;;  %v2368_v9 = vsel %vm1368_vm7, %v2359_v36, %v2367_v12  ;;  %v933_v55 = vrot.slane %v931_v56, 3  ;;  %v709_v63 = vsel %vm4899_vm4, 0, %v708_v14  ;;  %v737_v24 = vpack.c.bf16 %v600_v61, %v599_v25  ;;  %v846_v36 = vld [vmem:[#allocation2 + $0xc0] sm:$0xf8]  ;;  %4441 = vmatprep.mubr.msk.bf16.mxu1 %vm3580_vm2, %v3537_v20 }
 0x1ed   : > { %v2842_v34 = vshrl.u32 %v2644_v5, 16  ;;  %v2845_v19 = vshll.u32 %v2644_v5, 16  ;;  %820 = vst.msk [vmem:[#allocation2 + $0x100] sm:$0xf0] %vm788_vm10, %v770_v6  ;;  %v936_v35 = vrot.slane %v934_v11, 4  ;;  %v5495_v42 = vpop.permute.xlu0 %2207  ;;  %v929_v46 = vor.u32 %v928_v41, %v925_v21 }
 0x1ee   : > { %2564 = vrot.lane.b32.xlu0 %v2368_v9, %s4684_s20  ;;  %821 = vst.msk [vmem:[#allocation2 + $0x108] sm:$0xf] %vm790_vm11, %v770_v6  ;;  %710 = vst [vmem:[#allocation2 + $0xd8] sm:$0x10] %v709_v63  ;;  %v1591_v39 = vshrl.u32 %v1362_v27, 16  ;;  %v1594_v13 = vshll.u32 %v1362_v27, 16  ;;  %v5499_v47 = vpop.permute.xlu1 %1293 }
 0x1ef   : > { %v3388_v17 = vshrl.u32 %v3190_v44, 16  ;;  %v2844_v57 = vrot.slane %v2842_v34, 3  ;;  %v2847_v18 = vrot.slane %v2845_v19, 4  ;;  %v769_v62 = vrot.slane %v737_v24, 4  ;;  %v1730_v30 = vld [vmem:[#allocation2 + $0xd0] sm:$0xf8] }
 0x1f0   : > { %v937_v45 = vor.u32 %v936_v35, %v933_v55  ;;  %v5501_v25 = vrot.slane %v1591_v39, 4  ;;  %v5503_v2 = vrot.slane %v1594_v13, 5  ;;  %v3391_v7 = vshll.u32 %v3190_v44, 16  ;;  %v847_v24 = vld [vmem:[#allocation2 + $0xc8] sm:$0xf] }
 0x1f1   : > { %v5505_v37 = vrot.slane %v3388_v17, 4  ;;  %v2848_v3 = vor.u32 %v2847_v18, %v2844_v57  ;;  %818 = vst.msk [vmem:[#allocation2 + $0xf0] sm:$0xf0] %vm788_vm10, %v769_v62  ;;  %v5510_v12 = vpop.permute.xlu0 %2930  ;;  %v2160_v56 = vrot.slane %v5493_v31, 4  ;;  %v2161_v27 = vrot.slane %v5497_v26, 4 }
 0x1f2   : > { %819 = vst.msk [vmem:[#allocation2 + $0xf8] sm:$0xf] %vm790_vm11, %v769_v62  ;;  %v938_v14 = vsel %vm667_vm3, %v929_v46, %v937_v45  ;;  %v3393_v38 = vrot.slane %v3391_v7, 5  ;;  %v1943_v6 = vshrl.u32 %v1730_v30, 16  ;;  %v1946_v21 = vshll.u32 %v1730_v30, 16  ;;  %v5522_v5 = vpop.permute.xlu1 %2016 }
 0x1f3   : > { %1146 = vst.msk [vmem:[#allocation3 + $0x20] sm:$0xff] %vm603_vm1, %v938_v14  ;;  %v2857_v61 = vsel %vm667_vm3, %v2848_v3, %v2856_v33  ;;  %v1951_v11 = vshrl.u32 %v1731_v15, 16  ;;  %v1954_v44 = vshll.u32 %v1731_v15, 16  ;;  %v1597_v41 = vor.u32 %v5503_v2, %v5501_v25  ;;  %v1174_v17 = vld [vmem:[#allocation2 + $0x80] sm:$0xf0] }
 0x1f4   : > { %1324 = vst.msk [vmem:[#allocation3 + $0x20] sm:$0xff] %vm1319_vm12, %v5393_v49  ;;  %2948 = vrot.lane.b32.xlu1 %v2857_v61, %s4681_s8  ;;  %v3394_v63 = vor.u32 %v3393_v38, %v5505_v37  ;;  %v1945_v22 = vrot.slane %v1943_v6, 3  ;;  %v1059_v0 = vshrl.u32 %v846_v36, 16  ;;  %v1948_v31 = vrot.slane %v1946_v21, 4  ;;  %v1175_v45 = vld [vmem:[#allocation2 + $0x88] sm:$0xf] }
 0x1f5   : > { %v1363_v9 = vld [vmem:[#allocation2 + $0xd8] sm:$0x1f]  ;;  %v5528_v35 = vpop.permute.xlu0 %3476  ;;  %v1953_v46 = vrot.slane %v1951_v11, 3  ;;  %v1956_v39 = vrot.slane %v1954_v44, 4  ;;  %v1062_v2 = vshll.u32 %v846_v36, 16  ;;  %v1067_v37 = vshrl.u32 %v847_v24, 16 }
 0x1f6   : > { %v3191_v55 = vld [vmem:[#allocation2 + $0xd8] sm:$0x1f]  ;;  %v1599_v33 = vshrl.u32 %v1363_v9, 16  ;;  %v1602_v34 = vshll.u32 %v1363_v9, 16  ;;  %v1061_v13 = vrot.slane %v1059_v0, 3  ;;  %v5530_v20 = vpop.permute.xlu1 %2562  ;;  %v1949_v30 = vor.u32 %v1948_v31, %v1945_v22 }
 0x1f7   : > { %v3396_v19 = vshrl.u32 %v3191_v55, 16  ;;  %v3399_v49 = vshll.u32 %v3191_v55, 16  ;;  %v1957_v25 = vor.u32 %v1956_v39, %v1953_v46  ;;  %v2276_v7 = vld [vmem:[#allocation2 + $0xd0] sm:$0xf0]  ;;  %v2162_v14 = vsel %vm1222_vm9, %v2160_v56, %v2161_v27  ;;  %v2277_v6 = vld [vmem:[#allocation2 + $0xd8] sm:$0x1f] }
 0x1f8   : > { %v1601_v26 = vrot.slane %v1599_v33, 4  ;;  %v1604_v57 = vrot.slane %v1602_v34, 5  ;;  %v1070_v38 = vshll.u32 %v847_v24, 16  ;;  %v1064_v21 = vrot.slane %v1062_v2, 4  ;;  %v3001_v55 = vld [vmem:[#allocation2 + $0x70] sm:$0xf0] }
 0x1f9   : > { %v3398_v18 = vrot.slane %v3396_v19, 4  ;;  %v3401_v62 = vrot.slane %v3399_v49, 5  ;;  %v1650_v61 = vpop.permute.xlu0 %1649  ;;  %v1069_v11 = vrot.slane %v1067_v37, 3  ;;  %v1247_v44 = vrot.slane %v1174_v17, 4  ;;  %v828_v0 = vld [vmem:[#allocation2 + $0x30] sm:$0xf8] }
 0x1fa   : > { %v1605_v15 = vor.u32 %v1604_v57, %v1601_v26  ;;  %v1248_v9 = vrot.slane %v1175_v45, 4  ;;  %1694 = vst.msk [vmem:[#allocation3 + $0x20] sm:$0xff] %vm1689_vm13, %v1650_v61  ;;  %v1072_v33 = vrot.slane %v1070_v38, 4  ;;  %v2489_v34 = vshrl.u32 %v2276_v7, 16  ;;  %v3002_v19 = vld [vmem:[#allocation2 + $0x78] sm:$0xf]  ;;  %v5536_v56 = vpop.permute.xlu1 %2032 }
 0x1fb   : > { %v3402_v3 = vor.u32 %v3401_v62, %v3398_v18  ;;  %v829_v49 = vld [vmem:[#allocation2 + $0x38] sm:$0xf]  ;;  %v1958_v27 = vsel %vm667_vm3, %v1949_v30, %v1957_v25  ;;  %v1065_v24 = vor.u32 %v1064_v21, %v1061_v13  ;;  %v2492_v31 = vshll.u32 %v2276_v7, 16  ;;  %v3003_v39 = vld [vmem:[#allocation2 + $0x80] sm:$0xf0] }
 0x1fc   : > { %v1606_v22 = vsel %vm1368_vm7, %v1597_v41, %v1605_v15  ;;  %v2497_v46 = vshrl.u32 %v2277_v6, 16  ;;  %v3004_v17 = vld [vmem:[#allocation2 + $0x88] sm:$0xf]  ;;  %v1073_v41 = vor.u32 %v1072_v33, %v1069_v11  ;;  %v2491_v26 = vrot.slane %v2489_v34, 4  ;;  %v1172_v18 = vld [vmem:[#allocation2 + $0x70] sm:$0xf0] }
 0x1fd   : > { %v3403_v36 = vsel %vm1368_vm7, %v3394_v63, %v3402_v3  ;;  %1667 = vrot.lane.b32.xlu1 %v1606_v22, %s4677_s12  ;;  %v2500_v63 = vshll.u32 %v2277_v6, 16  ;;  %v3070_v57 = vrot.slane %v3001_v55, 4  ;;  %v5541_v62 = vpop.permute.xlu0 %2946  ;;  %v1249_v45 = vsel %vm1222_vm9, %v1247_v44, %v1248_v9  ;;  %v1173_v3 = vld [vmem:[#allocation2 + $0x78] sm:$0xf]  ;;  %v2087_v38 = vld [vmem:[#allocation2 + $0x70] sm:$0xf0] }
 0x1fe   : > { %3494 = vrot.lane.b32.xlu0 %v3403_v36, %s4682_s11  ;;  %v2494_v2 = vrot.slane %v2492_v31, 5  ;;  %v2499_v37 = vrot.slane %v2497_v46, 4  ;;  %v3071_v15 = vrot.slane %v3002_v19, 4  ;;  %v1074_v30 = vsel %vm667_vm3, %v1065_v24, %v1073_v41  ;;  %v5545_v61 = vpop.permute.xlu1 %2578  ;;  %v2088_v9 = vld [vmem:[#allocation2 + $0x78] sm:$0xf] }
 0x1ff   : > { %v2502_v13 = vrot.slane %v2500_v63, 5  ;;  %v3073_v25 = vrot.slane %v3003_v39, 4  ;;  %v906_v7 = vshrl.u32 %v828_v0, 16  ;;  %1154 = vst.msk [vmem:[#allocation3 + $0x60] sm:$0xff] %vm603_vm1, %v1074_v30  ;;  %v3074_v21 = vrot.slane %v3004_v17, 4 }
 0x200   : > { %v2495_v6 = vor.u32 %v2494_v2, %v2491_v26  ;;  %v909_v11 = vshll.u32 %v828_v0, 16  ;;  %v914_v44 = vshrl.u32 %v829_v49, 16  ;;  %v636_v55 = vld [vmem:[#allocation2 + $0x80] sm:$0x8]  ;;  %1332 = vst.msk [vmem:[#allocation3 + $0x60] sm:$0xff] %vm1319_vm12, %v5451_v4  ;;  %v3072_v36 = vsel %vm1222_vm9, %v3070_v57, %v3071_v15 }
 0x201   : > { %2201 = vrot.lane.b32.xlu1 %v2162_v14, %s4680_s9  ;;  %v2503_v22 = vor.u32 %v2502_v13, %v2499_v37  ;;  %v908_v33 = vrot.slane %v906_v7, 3  ;;  %v917_v34 = vshll.u32 %v829_v49, 16  ;;  %v3017_v19 = vld [vmem:[#allocation2 + $0xf0] sm:$0xf0]  ;;  %v2635_v14 = vld [vmem:[#allocation2 + $0x88] sm:$0xf]  ;;  %v5553_v24 = vpop.permute.xlu0 %3492  ;;  %v3075_v49 = vsel %vm1222_vm9, %v3073_v25, %v3074_v21 }
 0x202   : > { %2034 = vrot.lane.b32.xlu0 %v1958_v27, %s4683_s18  ;;  %v911_v27 = vrot.slane %v909_v11, 4  ;;  %v916_v31 = vrot.slane %v914_v44, 3  ;;  %v1244_v46 = vrot.slane %v1172_v18, 4  ;;  %v1245_v39 = vrot.slane %v1173_v3, 4  ;;  %v3018_v0 = vld [vmem:[#allocation2 + $0xf8] sm:$0xf]  ;;  %v2929_v2 = vpop.permute.xlu1 %2928 }
 0x203   : > { %v2504_v17 = vsel %vm1368_vm7, %v2495_v6, %v2503_v22  ;;  %v919_v41 = vrot.slane %v917_v34, 4  ;;  %v2157_v26 = vrot.slane %v2087_v38, 4  ;;  %v2158_v63 = vrot.slane %v2088_v9, 4  ;;  %v844_v4 = vld [vmem:[#allocation2 + $0xb0] sm:$0xf8]  ;;  %2976 = vst.msk [vmem:[#allocation3 + $0x8] sm:$0xff] %vm2974_vm5, %v2929_v2 }
 0x204   : > { %v912_v57 = vor.u32 %v911_v27, %v908_v33  ;;  %v1246_v37 = vsel %vm1222_vm9, %v1244_v46, %v1245_v39  ;;  %v3094_v15 = vrot.slane %v3017_v19, 4  ;;  %v845_v18 = vld [vmem:[#allocation2 + $0xb8] sm:$0xf]  ;;  %v3095_v30 = vrot.slane %v3018_v0, 4  ;;  %v1721_v38 = vld [vmem:[#allocation2 + $0x88] sm:$0xf] }
 0x205   : > { %1287 = vrot.lane.b32.xlu1 %v1249_v45, %s4678_s23  ;;  %v920_v3 = vor.u32 %v919_v41, %v916_v31  ;;  %v637_v13 = vsel %vm4905_vm8, 0, %v636_v55  ;;  %v2765_v7 = vshrl.u32 %v2635_v14, 16  ;;  %3153 = vst.msk [vmem:[#allocation3 + $0x8] sm:$0xff] %vm3151_vm6, %v5458_v51  ;;  %v1666_v45 = vpop.permute.xlu0 %1665  ;;  %v2159_v25 = vsel %vm1222_vm9, %v2157_v26, %v2158_v63  ;;  %v693_v44 = vld [vmem:[#allocation2 + $0x88] sm:$0x10] }
 0x206   : > { %2580 = vrot.lane.b32.xlu0 %v2504_v17, %s4684_s20  ;;  %638 = vst [vmem:[#allocation2 + $0x80] sm:$0x8] %v637_v13  ;;  %v2768_v6 = vshll.u32 %v2635_v14, 16  ;;  %v1042_v21 = vshrl.u32 %v844_v4, 16  ;;  %v1045_v11 = vshll.u32 %v844_v4, 16  ;;  %1702 = vst.msk [vmem:[#allocation3 + $0x60] sm:$0xff] %vm1689_vm13, %v1666_v45  ;;  %v3096_v26 = vsel %vm1222_vm9, %v3094_v15, %v3095_v30 }
 0x207   : > { %v921_v9 = vsel %vm667_vm3, %v912_v57, %v920_v3  ;;  %v5568_v22 = vrot.slane %v2765_v7, 3  ;;  %v1050_v55 = vshrl.u32 %v845_v18, 16  ;;  %v1053_v33 = vshll.u32 %v845_v18, 16  ;;  %v3180_v34 = vld [vmem:[#allocation2 + $0x80] sm:$0xf0] }
 0x208   : > { %1145 = vst.msk [vmem:[#allocation3 + $0x18] sm:$0xff] %vm603_vm1, %v921_v9  ;;  %v5573_v51 = vrot.slane %v2768_v6, 4  ;;  %v1044_v19 = vrot.slane %v1042_v21, 3  ;;  %v1047_v14 = vrot.slane %v1045_v11, 4  ;;  %v1866_v27 = vshrl.u32 %v1721_v38, 16 }
 0x209   : > { %3113 = vrot.lane.b32.xlu1 %v3072_v36, %s4679_s21  ;;  %v2266_v31 = vld [vmem:[#allocation2 + $0x80] sm:$0xf0]  ;;  %1323 = vst.msk [vmem:[#allocation3 + $0x18] sm:$0xff] %vm1319_vm12, %v5475_v16  ;;  %v1052_v46 = vrot.slane %v1050_v55, 3  ;;  %v1055_v39 = vrot.slane %v1053_v33, 4  ;;  %v1869_v0 = vshll.u32 %v1721_v38, 16  ;;  %v1648_v41 = vpop.permute.xlu1 %1647 }
 0x20a   : > { %3115 = vrot.lane.b32.xlu0 %v3075_v49, %s4679_s21  ;;  %v694_v17 = vsel %vm4899_vm4, 0, %v693_v44  ;;  %v1352_v36 = vld [vmem:[#allocation2 + $0x80] sm:$0xf0]  ;;  %v1048_v63 = vor.u32 %v1047_v14, %v1044_v19  ;;  %v5580_v4 = vrot.slane %v1866_v27, 3  ;;  %v3303_v2 = vshrl.u32 %v3180_v34, 16  ;;  %1693 = vst.msk [vmem:[#allocation3 + $0x18] sm:$0xff] %vm1689_vm13, %v1648_v41 }
 0x20b   : > { %695 = vst [vmem:[#allocation2 + $0x88] sm:$0x10] %v694_v17  ;;  %v1056_v49 = vor.u32 %v1055_v39, %v1052_v46  ;;  %v1871_v57 = vrot.slane %v1869_v0, 4  ;;  %v3306_v16 = vshll.u32 %v3180_v34, 16  ;;  %v2404_v18 = vshrl.u32 %v2266_v31, 16  ;;  %2062 = vst.msk [vmem:[#allocation3 + $0x18] sm:$0xff] %vm2058_vm14, %v5522_v5  ;;  %v3475_v7 = vpop.permute.xlu0 %3474 }
 0x20c   : > { %v5587_v3 = vrot.slane %v3303_v2, 4  ;;  %v2407_v15 = vshll.u32 %v2266_v31, 16  ;;  %v1506_v30 = vshrl.u32 %v1352_v36, 16  ;;  %v1509_v13 = vshll.u32 %v1352_v36, 16  ;;  %2239 = vst.msk [vmem:[#allocation3 + $0x18] sm:$0xff] %vm2235_vm15, %v5371_v32 }
 0x20d   : > { %1285 = vrot.lane.b32.xlu1 %v1246_v37, %s4678_s23  ;;  %v2634_v38 = vld [vmem:[#allocation2 + $0x80] sm:$0xf8]  ;;  %v2771_v45 = vor.u32 %v5573_v51, %v5568_v22  ;;  %v1057_v6 = vsel %vm667_vm3, %v1048_v63, %v1056_v49  ;;  %v5594_v21 = vrot.slane %v3306_v16, 5  ;;  %v5596_v37 = vrot.slane %v2404_v18, 4  ;;  %3522 = vst.msk [vmem:[#allocation3 + $0x8] sm:$0xff] %vm3520_vm0, %v3475_v7 }
 0x20e   : > { %2199 = vrot.lane.b32.xlu0 %v2159_v25, %s4680_s9  ;;  %v1720_v5 = vld [vmem:[#allocation2 + $0x80] sm:$0xf8]  ;;  %vm6251_vm10 = vcmask 195744   ;;  %v2757_v25 = vshrl.u32 %v2634_v38, 16  ;;  %v2760_v11 = vshll.u32 %v2634_v38, 16  ;;  %1153 = vst.msk [vmem:[#allocation3 + $0x58] sm:$0xff] %vm603_vm1, %v1057_v6  ;;  %v2945_v9 = vpop.permute.xlu1 %2944  ;;  %v1872_v22 = vor.u32 %v1871_v57, %v5580_v4 }
 0x20f   : > { %2608 = vst.msk [vmem:[#allocation3 + $0x18] sm:$0xff] %vm6251_vm10, %v5530_v20  ;;  %v1858_v32 = vshrl.u32 %v1720_v5, 16  ;;  %v1861_v44 = vshll.u32 %v1720_v5, 16  ;;  %v5605_v55 = vrot.slane %v2407_v15, 5  ;;  %v5607_v33 = vrot.slane %v1506_v30, 4  ;;  %vm6252_vm11 = vmmov %vm6251_vm10 }
 0x210   : > { %1331 = vst.msk [vmem:[#allocation3 + $0x58] sm:$0xff] %vm1319_vm12, %v5499_v47  ;;  %v5609_v34 = vrot.slane %v1509_v13, 5  ;;  %v2759_v20 = vrot.slane %v2757_v25, 3  ;;  %v2762_v51 = vrot.slane %v2760_v11, 4  ;;  %v3309_v27 = vor.u32 %v5594_v21, %v5587_v3  ;;  %v633_v63 = vld [vmem:[#allocation2 + $0x70] sm:$0x8] }
 0x211   : > { %2984 = vst.msk [vmem:[#allocation3 + $0x48] sm:$0xff] %vm2974_vm5, %v2945_v9  ;;  %3129 = vrot.lane.b32.xlu1 %v3096_v26, %s4679_s21  ;;  %v1860_v19 = vrot.slane %v1858_v32, 3  ;;  %v1863_v14 = vrot.slane %v1861_v44, 4  ;;  %v2410_v46 = vor.u32 %v5605_v55, %v5596_v37  ;;  %v2015_v0 = vpop.permute.xlu0 %2014  ;;  %v2633_v57 = vld [vmem:[#allocation2 + $0x78] sm:$0xf] }
 0x212   : > { %3161 = vst.msk [vmem:[#allocation3 + $0x48] sm:$0xff] %vm3151_vm6, %v5485_v23  ;;  %v3181_v47 = vld [vmem:[#allocation2 + $0x88] sm:$0x1f]  ;;  %v2763_v17 = vor.u32 %v2762_v51, %v2759_v20  ;;  %v690_v30 = vld [vmem:[#allocation2 + $0x78] sm:$0x10]  ;;  %v2751_v25 = vshll.u32 %v2633_v57, 16  ;;  %v1512_v20 = vor.u32 %v5609_v34, %v5607_v33 }
 0x213   : > { %v2267_v31 = vld [vmem:[#allocation2 + $0x88] sm:$0x1f]  ;;  %v1864_v36 = vor.u32 %v1863_v14, %v1860_v19  ;;  %v3311_v41 = vshrl.u32 %v3181_v47, 16  ;;  %v3314_v26 = vshll.u32 %v3181_v47, 16  ;;  %2061 = vst.msk [vmem:[#allocation3 + $0x10] sm:$0xff] %vm2058_vm14, %v2015_v0  ;;  %v691_v44 = vsel %vm4899_vm4, 0, %v690_v30 }
 0x214   : > { %v1353_v39 = vld [vmem:[#allocation2 + $0x88] sm:$0x1f]  ;;  %v2412_v4 = vshrl.u32 %v2267_v31, 16  ;;  %v2415_v2 = vshll.u32 %v2267_v31, 16  ;;  %2238 = vst.msk [vmem:[#allocation3 + $0x10] sm:$0xff] %vm2235_vm15, %v5483_v10  ;;  %v2772_v16 = vsel %vm667_vm3, %v2763_v17, %v2771_v45  ;;  %v634_v10 = vsel %vm4905_vm8, 0, %v633_v63 }
 0x215   : > { %v1514_v23 = vshrl.u32 %v1353_v39, 16  ;;  %v1517_v49 = vshll.u32 %v1353_v39, 16  ;;  %v1873_v18 = vsel %vm667_vm3, %v1864_v36, %v1872_v22  ;;  %v3313_v3 = vrot.slane %v3311_v41, 4  ;;  %v3178_v13 = vld [vmem:[#allocation2 + $0x70] sm:$0xf0]  ;;  %2938 = vrot.lane.b32.xlu0 %v2772_v16, %s4681_s8  ;;  %v1664_v21 = vpop.permute.xlu1 %1663 }
 0x216   : > { %v3316_v15 = vrot.slane %v3314_v26, 5  ;;  %2024 = vrot.lane.b32.xlu1 %v1873_v18, %s4683_s18  ;;  %v2414_v7 = vrot.slane %v2412_v4, 4  ;;  %v2417_v38 = vrot.slane %v2415_v2, 5  ;;  %v2748_v45 = vshrl.u32 %v2633_v57, 16  ;;  %v1350_v11 = vld [vmem:[#allocation2 + $0x70] sm:$0xf0] }
 0x217   : > { %v1516_v6 = vrot.slane %v1514_v23, 4  ;;  %v1519_v5 = vrot.slane %v1517_v49, 5  ;;  %1701 = vst.msk [vmem:[#allocation3 + $0x58] sm:$0xff] %vm1689_vm13, %v1664_v21  ;;  %635 = vst [vmem:[#allocation2 + $0x70] sm:$0x8] %v634_v10  ;;  %v3286_v9 = vshrl.u32 %v3178_v13, 16 }
 0x218   : > { %v3317_v37 = vor.u32 %v3316_v15, %v3313_v3  ;;  %v2418_v32 = vor.u32 %v2417_v38, %v2414_v7  ;;  %v1719_v22 = vld [vmem:[#allocation2 + $0x78] sm:$0xf]  ;;  %2070 = vst.msk [vmem:[#allocation3 + $0x58] sm:$0xff] %vm2058_vm14, %v5536_v56  ;;  %692 = vst [vmem:[#allocation2 + $0x78] sm:$0x10] %v691_v44  ;;  %v3289_v19 = vshll.u32 %v3178_v13, 16  ;;  %v2561_v31 = vpop.permute.xlu0 %2560 }
 0x219   : > { %v1520_v51 = vor.u32 %v1519_v5, %v1516_v6  ;;  %v1186_v14 = vld [vmem:[#allocation2 + $0xe0] sm:$0xf0]  ;;  %v1187_v47 = vld [vmem:[#allocation2 + $0xe8] sm:$0xf]  ;;  %2247 = vst.msk [vmem:[#allocation3 + $0x58] sm:$0xff] %vm2235_vm15, %v5423_v40  ;;  %v5640_v0 = vrot.slane %v2748_v45, 3  ;;  %v5647_v33 = vpop.permute.xlu1 %2197 }
 0x21a   : > { %v3318_v55 = vsel %vm1368_vm7, %v3309_v27, %v3317_v37  ;;  %v2419_v39 = vsel %vm1368_vm7, %v2410_v46, %v2418_v32  ;;  %v5642_v56 = vrot.slane %v2751_v25, 4  ;;  %v1489_v27 = vshrl.u32 %v1350_v11, 16  ;;  %v2264_v17 = vld [vmem:[#allocation2 + $0x70] sm:$0xf0]  ;;  %2607 = vst.msk [vmem:[#allocation3 + $0x10] sm:$0xff] %vm6252_vm11, %v2561_v31  ;;  %vm6253_vm11 = vmmov %vm6251_vm10 }
 0x21b   : > { %3484 = vrot.lane.b32.xlu0 %v3318_v55, %s4682_s11  ;;  %2616 = vst.msk [vmem:[#allocation3 + $0x58] sm:$0xff] %vm6251_vm10, %v5545_v61  ;;  %2570 = vrot.lane.b32.xlu1 %v2419_v39, %s4684_s20  ;;  %v5650_v40 = vrot.slane %v3286_v9, 4  ;;  %v5652_v34 = vrot.slane %v3289_v19, 5  ;;  %v1492_v46 = vshll.u32 %v1350_v11, 16  ;;  %v1849_v36 = vshrl.u32 %v1719_v22, 16 }
 0x21c   : > { %v5654_v41 = vld [vmem:[#allocation2 + $0xf0] sm:$0xf0]  ;;  %2977 = vst.msk [vmem:[#allocation3 + $0x10] sm:$0xff] %vm2974_vm5, %v5510_v12  ;;  %v5658_v26 = vrot.slane %v1489_v27, 4  ;;  %v1852_v63 = vshll.u32 %v1719_v22, 16  ;;  %v1265_v4 = vrot.slane %v1186_v14, 4  ;;  %v1521_v23 = vsel %vm1368_vm7, %v1512_v20, %v1520_v51  ;;  %v3491_v16 = vpop.permute.xlu0 %3490 }
 0x21d   : > { %v1266_v61 = vrot.slane %v1187_v47, 4  ;;  %v5660_v2 = vld [vmem:[#allocation2 + $0xf8] sm:$0xf]  ;;  %3154 = vst.msk [vmem:[#allocation3 + $0x10] sm:$0xff] %vm3151_vm6, %v5454_v58  ;;  %v5665_v49 = vrot.slane %v1492_v46, 5  ;;  %v2387_v57 = vshrl.u32 %v2264_v17, 16  ;;  %v5676_v58 = vpop.permute.xlu1 %1283  ;;  %v2754_v13 = vor.u32 %v5642_v56, %v5640_v0 }
 0x21e   : > { %3523 = vst.msk [vmem:[#allocation3 + $0x10] sm:$0xff] %vm3520_vm0, %v5528_v35  ;;  %v5670_v12 = vrot.slane %v1849_v36, 3  ;;  %v5672_v18 = vrot.slane %v1852_v63, 4  ;;  %v2390_v3 = vshll.u32 %v2264_v17, 16  ;;  %v1268_v15 = vrot.slane %v5654_v41, 4  ;;  %3530 = vst.msk [vmem:[#allocation3 + $0x48] sm:$0xff] %vm3520_vm0, %v3491_v16 }
 0x21f   : > { %1657 = vrot.lane.b32.xlu0 %v1521_v23, %s4677_s12  ;;  %v2632_v30 = vld [vmem:[#allocation2 + $0x70] sm:$0xf8]  ;;  %v3292_v35 = vor.u32 %v5652_v34, %v5650_v40  ;;  %v5682_v38 = vrot.slane %v2387_v57, 4  ;;  %v1269_v6 = vrot.slane %v5660_v2, 4  ;;  %v3179_v37 = vld [vmem:[#allocation2 + $0x78] sm:$0x1f]  ;;  %v1495_v45 = vor.u32 %v5665_v49, %v5658_v26 }
 0x220   : > { %v1718_v7 = vld [vmem:[#allocation2 + $0x70] sm:$0xf8]  ;;  %v2740_v5 = vshrl.u32 %v2632_v30, 16  ;;  %v2743_v21 = vshll.u32 %v2632_v30, 16  ;;  %v1351_v10 = vld [vmem:[#allocation2 + $0x78] sm:$0x1f]  ;;  %v5688_v25 = vsel %vm1222_vm9, %v1265_v4, %v1266_v61  ;;  %v1855_v23 = vor.u32 %v5672_v18, %v5670_v12 }
 0x221   : > { %v3294_v11 = vshrl.u32 %v3179_v37, 16  ;;  %v3297_v32 = vshll.u32 %v3179_v37, 16  ;;  %v1497_v44 = vshrl.u32 %v1351_v10, 16  ;;  %v1500_v9 = vshll.u32 %v1351_v10, 16  ;;  %v2265_v19 = vld [vmem:[#allocation2 + $0x78] sm:$0x1f]  ;;  %v2031_v14 = vpop.permute.xlu0 %2030  ;;  %v5691_v56 = vpop.permute.xlu1 %2213 }
 0x222   : > { %v2742_v22 = vrot.slane %v2740_v5, 3  ;;  %v2745_v55 = vrot.slane %v2743_v21, 4  ;;  %v1841_v20 = vshrl.u32 %v1718_v7, 16  ;;  %v1844_v51 = vshll.u32 %v1718_v7, 16  ;;  %2069 = vst.msk [vmem:[#allocation3 + $0x50] sm:$0xff] %vm2058_vm14, %v2031_v14 }
 0x223   : > { %v3296_v47 = vrot.slane %v3294_v11, 4  ;;  %v3299_v31 = vrot.slane %v3297_v32, 5  ;;  %v1499_v39 = vrot.slane %v1497_v44, 4  ;;  %v1502_v0 = vrot.slane %v1500_v9, 5  ;;  %2246 = vst.msk [vmem:[#allocation3 + $0x50] sm:$0xff] %vm2235_vm15, %v5495_v42 }
 0x224   : > { %v2746_v27 = vor.u32 %v2745_v55, %v2742_v22  ;;  %v1843_v17 = vrot.slane %v1841_v20, 3  ;;  %v1846_v40 = vrot.slane %v1844_v51, 4  ;;  %v5693_v34 = vrot.slane %v2390_v3, 5  ;;  %v3192_v63 = vld [vmem:[#allocation2 + $0xe0] sm:$0xf0] }
 0x225   : > { %v3300_v46 = vor.u32 %v3299_v31, %v3296_v47  ;;  %v1503_v36 = vor.u32 %v1502_v0, %v1499_v39  ;;  %v2395_v41 = vshrl.u32 %v2265_v19, 16  ;;  %v2398_v26 = vshll.u32 %v2265_v19, 16  ;;  %v3193_v4 = vld [vmem:[#allocation2 + $0xe8] sm:$0x1f]  ;;  %v660_v57 = vld [vmem:[#allocation2 + $0x100] sm:$0x8] }
 0x226   : > { %v2755_v61 = vsel %vm667_vm3, %v2746_v27, %v2754_v13  ;;  %v1847_v2 = vor.u32 %v1846_v40, %v1843_v17  ;;  %v2393_v49 = vor.u32 %v5693_v34, %v5682_v38  ;;  %v1737_v16 = vld [vmem:[#allocation2 + $0x108] sm:$0xf]  ;;  %v5705_v7 = vsel %vm1222_vm9, %v1268_v15, %v1269_v6  ;;  %v1364_v5 = vld [vmem:[#allocation2 + $0xe0] sm:$0xf0]  ;;  %v717_v31 = vld [vmem:[#allocation2 + $0x108] sm:$0x10] }
 0x227   : > { %2936 = vrot.lane.b32.xlu1 %v2755_v61, %s4681_s8  ;;  %v3301_v42 = vsel %vm1368_vm7, %v3292_v35, %v3300_v46  ;;  %v2397_v3 = vrot.slane %v2395_v41, 4  ;;  %v2400_v30 = vrot.slane %v2398_v26, 5  ;;  %v1504_v13 = vsel %vm1368_vm7, %v1495_v45, %v1503_v36  ;;  %v4572_v38 = vld [vmem:[%s6234_s3 + $0x10] ss:$0 sps:$4 sm:$0x33]  }
 0x228   : > { %3482 = vrot.lane.b32.xlu0 %v3301_v42, %s4682_s11  ;;  %v3405_v12 = vshrl.u32 %v3192_v63, 16  ;;  %v3408_v18 = vshll.u32 %v3192_v63, 16  ;;  %v3413_v21 = vshrl.u32 %v3193_v4, 16  ;;  %v3416_v10 = vshll.u32 %v3193_v4, 16  ;;  %v1365_v15 = vld [vmem:[#allocation2 + $0xe8] sm:$0x1f]  ;;  %v2577_v6 = vpop.permute.xlu0 %2576  ;;  %v5714_v32 = vpop.permute.xlu1 %3109 }
 0x229   : > { %v2401_v37 = vor.u32 %v2400_v30, %v2397_v3  ;;  %v661_v35 = vsel %vm4905_vm8, 0, %v660_v57  ;;  %v2002_v11 = vshrl.u32 %v1737_v16, 16  ;;  %v2005_v22 = vshll.u32 %v1737_v16, 16  ;;  %v2105_v55 = vld [vmem:[#allocation2 + $0x100] sm:$0xf0]  ;;  %2615 = vst.msk [vmem:[#allocation3 + $0x50] sm:$0xff] %vm6253_vm11, %v2577_v6 }
 0x22a   : > { %v3407_v44 = vrot.slane %v3405_v12, 4  ;;  %v3410_v9 = vrot.slane %v3408_v18, 5  ;;  %v3415_v45 = vrot.slane %v3413_v21, 4  ;;  %662 = vst [vmem:[#allocation2 + $0x100] sm:$0x8] %v661_v35  ;;  %v1856_v20 = vsel %vm667_vm3, %v1847_v2, %v1855_v23  ;;  %2985 = vst.msk [vmem:[#allocation3 + $0x50] sm:$0xff] %vm2974_vm5, %v5541_v62 }
 0x22b   : > { %1655 = vrot.lane.b32.xlu1 %v1504_v13, %s4677_s12  ;;  %v3418_v51 = vrot.slane %v3416_v10, 5  ;;  %v5719_v19 = vrot.slane %v2002_v11, 3  ;;  %v1608_v14 = vshrl.u32 %v1364_v5, 16  ;;  %v2106_v47 = vld [vmem:[#allocation2 + $0x108] sm:$0xf]  ;;  %v5724_v0 = vrot.slane %v2005_v22, 4 }
 0x22c   : > { %2022 = vrot.lane.b32.xlu0 %v1856_v20, %s4683_s18  ;;  %v3411_v39 = vor.u32 %v3410_v9, %v3407_v44  ;;  %v1611_v27 = vshll.u32 %v1364_v5, 16  ;;  %v1616_v17 = vshrl.u32 %v1365_v15, 16  ;;  %v2103_v40 = vld [vmem:[#allocation2 + $0xf0] sm:$0xf0]  ;;  %3162 = vst.msk [vmem:[#allocation3 + $0x50] sm:$0xff] %vm3151_vm6, %v5467_v29  ;;  %v1619_v36 = vshll.u32 %v1365_v15, 16  ;;  %v5730_v62 = vpop.permute.xlu0 %3111  ;;  %v5739_v42 = vpop.permute.xlu1 %1281 }
 0x22d   : > { %v3419_v34 = vor.u32 %v3418_v51, %v3415_v45  ;;  %v1610_v46 = vrot.slane %v1608_v14, 4  ;;  %vm3629_vm10 = vcmask 1041408   ;;  %v2104_v41 = vld [vmem:[#allocation2 + $0xf8] sm:$0xf]  ;;  %3531 = vst.msk [vmem:[#allocation3 + $0x50] sm:$0xff] %vm3520_vm0, %v5553_v24  ;;  %v2402_v26 = vsel %vm1368_vm7, %v2393_v49, %v2401_v37  ;;  %v3538_v16 = vld [vmem:[#allocation3 + $0x8] sm:$0xff] }
 0x22e   : > { %v1613_v63 = vrot.slane %v1611_v27, 5  ;;  %v1618_v4 = vrot.slane %v1616_v17, 4  ;;  %4509 = vmatprep.subr.msk.bf16.mxu1 %vm3629_vm10, %v4572_v38  ;;  %v3631_v61 = vsel %vm3629_vm10, %v4572_v38, 0  ;;  %v2282_v2 = vld [vmem:[#allocation2 + $0x100] sm:$0xf0]  ;;  %v2008_v29 = vor.u32 %v5724_v0, %v5719_v19  ;;  %v3539_v13 = vld [vmem:[#allocation3 + $0x10] sm:$0xff] }
 0x22f   : > { %1299 = vrot.lane.b32.xlu1 %v5688_v25, %s4678_s23  ;;  %v1621_v23 = vrot.slane %v1619_v36, 5  ;;  %4440 = vmatpush3.bf16.msra.mxu1 %v3631_v61  ;;  %v2184_v24 = vrot.slane %v2105_v55, 4  ;;  %v2185_v57 = vrot.slane %v2106_v47, 4  ;;  %v3420_v49 = vsel %vm1368_vm7, %v3411_v39, %v3419_v34  ;;  %v2651_v25 = vld [vmem:[#allocation2 + $0x108] sm:$0xf] }
 0x230   : > { %2568 = vrot.lane.b32.xlu0 %v2402_v26, %s4684_s20  ;;  %v2181_v3 = vrot.slane %v2103_v40, 4  ;;  %v2182_v30 = vrot.slane %v2104_v41, 4  ;;  %v718_v5 = vsel %vm4899_vm4, 0, %v717_v31  ;;  %v1614_v18 = vor.u32 %v1613_v63, %v1610_v46  ;;  %v5745_v35 = vpop.permute.xlu0 %3127  ;;  %v663_v9 = vld [vmem:[#allocation2 + $0x110] sm:$0x8]  ;;  %v5765_v34 = vpop.permute.xlu1 %3125 }
 0x231   : > { %v1736_v12 = vld [vmem:[#allocation2 + $0x100] sm:$0xf8]  ;;  %v1622_v21 = vor.u32 %v1621_v23, %v1618_v4  ;;  %719 = vst [vmem:[#allocation2 + $0x108] sm:$0x10] %v718_v5  ;;  %v2540_v38 = vshrl.u32 %v2282_v2, 16  ;;  %v2543_v37 = vshll.u32 %v2282_v2, 16  ;;  %v5748_v6 = vsel %vm1222_vm9, %v2184_v24, %v2185_v57 }
 0x232   : > { %v2650_v10 = vld [vmem:[#allocation2 + $0x100] sm:$0xf8]  ;;  %v1994_v11 = vshrl.u32 %v1736_v12, 16  ;;  %v1997_v15 = vshll.u32 %v1736_v12, 16  ;;  %4442 = vmatmul.mubr.msk.bf16.vlgmr.msra.gmra.mrb[16].mxu1 %vm3580_vm2, %v3538_v16  ;;  %v2183_v45 = vsel %vm1222_vm9, %v2181_v3, %v2182_v30  ;;  %v2653_v51 = vld [vmem:[#allocation2 + $0x118] sm:$0xf] }
 0x233   : > { %v2893_v44 = vshrl.u32 %v2650_v10, 16  ;;  %1301 = vrot.lane.b32.xlu1 %v5705_v7, %s4678_s23  ;;  %v5754_v22 = vrot.slane %v2540_v38, 4  ;;  %v5756_v55 = vrot.slane %v2543_v37, 5  ;;  %v2896_v20 = vshll.u32 %v2650_v10, 16  ;;  %4445 = vmatprep.mubr.msk.bf16.mxu1 %vm3580_vm2, %v3539_v13  ;;  %v5760_v39 = vld [vmem:[#allocation2 + $0x100] sm:$0xf0] }
 0x234   : > { %3496 = vrot.lane.b32.xlu0 %v3420_v49, %s4682_s11  ;;  %v1996_v19 = vrot.slane %v1994_v11, 3  ;;  %v1999_v14 = vrot.slane %v1997_v15, 4  ;;  %v2901_v31 = vshrl.u32 %v2651_v25, 16  ;;  %v1623_v7 = vsel %vm1368_vm7, %v1614_v18, %v1622_v21  ;;  %v834_v40 = vld [vmem:[#allocation2 + $0x60] sm:$0xf8]  ;;  %v5767_v46 = vpop.permute.xlu0 %2195 }
 0x235   : > { %v2895_v47 = vrot.slane %v2893_v44, 3  ;;  %v2898_v0 = vrot.slane %v2896_v20, 4  ;;  %v2904_v27 = vshll.u32 %v2651_v25, 16  ;;  %v664_v17 = vsel %vm4905_vm8, 0, %v663_v9  ;;  %v5769_v4 = vld [vmem:[#allocation2 + $0x108] sm:$0xf] }
 0x236   : > { %v2000_v36 = vor.u32 %v1999_v14, %v1996_v19  ;;  %v2903_v41 = vrot.slane %v2901_v31, 3  ;;  %665 = vst [vmem:[#allocation2 + $0x110] sm:$0x8] %v664_v17  ;;  %v2918_v26 = vshrl.u32 %v2653_v51, 16  ;;  %v2921_v63 = vshll.u32 %v2653_v51, 16  ;;  %v5787_v19 = vpop.permute.xlu1 %1297 }
 0x237   : > { %v2546_v61 = vor.u32 %v5756_v55, %v5754_v22  ;;  %v2899_v2 = vor.u32 %v2898_v0, %v2895_v47  ;;  %v2906_v23 = vrot.slane %v2904_v27, 4  ;;  %v3097_v24 = vrot.slane %v5760_v39, 4  ;;  %v835_v57 = vld [vmem:[#allocation2 + $0x68] sm:$0xf]  ;;  %v657_v16 = vld [vmem:[#allocation2 + $0xf0] sm:$0x8] }
 0x238   : > { %v2009_v49 = vsel %vm667_vm3, %v2000_v36, %v2008_v29  ;;  %1669 = vrot.lane.b32.xlu0 %v1623_v7, %s4677_s12  ;;  %v2283_v3 = vld [vmem:[#allocation2 + $0x108] sm:$0x1f]  ;;  %v5776_v30 = vrot.slane %v2918_v26, 3  ;;  %v5778_v5 = vrot.slane %v2921_v63, 4  ;;  %v957_v25 = vshrl.u32 %v834_v40, 16  ;;  %v5782_v37 = vpop.permute.xlu0 %2211 }
 0x239   : > { %2040 = vrot.lane.b32.xlu1 %v2009_v49, %s4683_s18  ;;  %v2548_v13 = vshrl.u32 %v2283_v3, 16  ;;  %v2551_v12 = vshll.u32 %v2283_v3, 16  ;;  %v2907_v18 = vor.u32 %v2906_v23, %v2903_v41  ;;  %v3098_v21 = vrot.slane %v5769_v4, 4  ;;  %v2649_v38 = vld [vmem:[#allocation2 + $0xf8] sm:$0xf] }
 0x23a   : > { %v2924_v29 = vor.u32 %v5778_v5, %v5776_v30  ;;  %v959_v10 = vrot.slane %v957_v25, 3  ;;  %v960_v11 = vshll.u32 %v834_v40, 16  ;;  %v965_v15 = vshrl.u32 %v835_v57, 16  ;;  %v714_v44 = vld [vmem:[#allocation2 + $0xf8] sm:$0x10] }
 0x23b   : > { %v2550_v9 = vrot.slane %v2548_v13, 4  ;;  %v2553_v22 = vrot.slane %v2551_v12, 5  ;;  %v2908_v55 = vsel %vm667_vm3, %v2899_v2, %v2907_v18  ;;  %v968_v20 = vshll.u32 %v835_v57, 16  ;;  %v3194_v51 = vld [vmem:[#allocation2 + $0xf0] sm:$0xf0] }
 0x23c   : > { %2215 = vrot.lane.b32.xlu0 %v2183_v45, %s4680_s9  ;;  %v962_v14 = vrot.slane %v960_v11, 4  ;;  %v967_v47 = vrot.slane %v965_v15, 3  ;;  %v658_v31 = vsel %vm4905_vm8, 0, %v657_v16  ;;  %v2884_v39 = vshrl.u32 %v2649_v38, 16  ;;  %v1366_v7 = vld [vmem:[#allocation2 + $0xf0] sm:$0xf0] }
 0x23d   : > { %2217 = vrot.lane.b32.xlu1 %v5748_v6, %s4680_s9  ;;  %v2554_v0 = vor.u32 %v2553_v22, %v2550_v9  ;;  %v2652_v27 = vld [vmem:[#allocation2 + $0x110] sm:$0xf8]  ;;  %v970_v17 = vrot.slane %v968_v20, 4  ;;  %659 = vst [vmem:[#allocation2 + $0xf0] sm:$0x8] %v658_v31  ;;  %v2887_v40 = vshll.u32 %v2649_v38, 16  ;;  %v3099_v25 = vsel %vm1222_vm9, %v3097_v24, %v3098_v21 }
 0x23e   : > { %v715_v36 = vsel %vm4899_vm4, 0, %v714_v44  ;;  %v2910_v41 = vshrl.u32 %v2652_v27, 16  ;;  %v2913_v45 = vshll.u32 %v2652_v27, 16  ;;  %v963_v26 = vor.u32 %v962_v14, %v959_v10  ;;  %v1735_v23 = vld [vmem:[#allocation2 + $0xf8] sm:$0xf]  ;;  %v5811_v38 = vpop.permute.xlu1 %2020 }
 0x23f   : > { %v5796_v63 = vrot.slane %v2884_v39, 3  ;;  %716 = vst [vmem:[#allocation2 + $0xf8] sm:$0x10] %v715_v36  ;;  %v2555_v60 = vsel %vm1368_vm7, %v2546_v61, %v2554_v0  ;;  %v971_v4 = vor.u32 %v970_v17, %v967_v47  ;;  %v5799_v2 = vrot.slane %v2887_v40, 4  ;;  %v5801_v57 = vpop.permute.xlu0 %2934  ;;  %v2280_v5 = vld [vmem:[#allocation2 + $0xf0] sm:$0xf0] }
 0x240   : > { %v3422_v6 = vshrl.u32 %v3194_v51, 16  ;;  %2954 = vrot.lane.b32.xlu0 %v2908_v55, %s4681_s8  ;;  %v2912_v16 = vrot.slane %v2910_v41, 3  ;;  %v2915_v49 = vrot.slane %v2913_v45, 4  ;;  %v3425_v3 = vshll.u32 %v3194_v51, 16  ;;  %v5809_v18 = vld [vmem:[#allocation2 + $0x110] sm:$0xf0] }
 0x241   : > { %v1625_v30 = vshrl.u32 %v1366_v7, 16  ;;  %2586 = vrot.lane.b32.xlu1 %v2555_v60, %s4684_s20  ;;  %v972_v61 = vsel %vm667_vm3, %v963_v26, %v971_v4  ;;  %v1628_v12 = vshll.u32 %v1366_v7, 16  ;;  %v1985_v44 = vshrl.u32 %v1735_v23, 16 }
 0x242   : > { %v5807_v13 = vrot.slane %v3422_v6, 4  ;;  %v2916_v10 = vor.u32 %v2915_v49, %v2912_v16  ;;  %1148 = vst.msk [vmem:[#allocation3 + $0x30] sm:$0xff] %vm603_vm1, %v972_v61  ;;  %v3427_v11 = vrot.slane %v3425_v3, 5  ;;  %v1988_v24 = vshll.u32 %v1735_v23, 16 }
 0x243   : > { %v1627_v15 = vrot.slane %v1625_v30, 4  ;;  %1326 = vst.msk [vmem:[#allocation3 + $0x30] sm:$0xff] %vm1319_vm12, %v5676_v58  ;;  %v1630_v9 = vrot.slane %v1628_v12, 5  ;;  %v2523_v21 = vshrl.u32 %v2280_v5, 16  ;;  %v2526_v22 = vshll.u32 %v2280_v5, 16  ;;  %v5816_v55 = vpop.permute.xlu0 %3480 }
 0x244   : > { %v2925_v20 = vsel %vm667_vm3, %v2916_v10, %v2924_v29  ;;  %3131 = vrot.lane.b32.xlu0 %v3099_v25, %s4679_s21  ;;  %v2648_v51 = vld [vmem:[#allocation2 + $0xf0] sm:$0xf8]  ;;  %v2890_v14 = vor.u32 %v5799_v2, %v5796_v63  ;;  %v1987_v31 = vrot.slane %v1985_v44, 3  ;;  %v3100_v39 = vrot.slane %v5809_v18, 4  ;;  %v5825_v2 = vpop.permute.xlu1 %2566 }
 0x245   : > { %v1734_v47 = vld [vmem:[#allocation2 + $0xf0] sm:$0xf8]  ;;  %2956 = vrot.lane.b32.xlu1 %v2925_v20, %s4681_s8  ;;  %v2876_v58 = vshrl.u32 %v2648_v51, 16  ;;  %v2879_v7 = vshll.u32 %v2648_v51, 16  ;;  %v3428_v27 = vor.u32 %v3427_v11, %v5807_v13  ;;  %v1631_v40 = vor.u32 %v1630_v9, %v1627_v15  ;;  %v3022_v15 = vld [vmem:[#allocation2 + $0x118] sm:$0xf] }
 0x246   : > { %v3195_v0 = vld [vmem:[#allocation2 + $0xf8] sm:$0x1f]  ;;  %v1977_v63 = vshrl.u32 %v1734_v47, 16  ;;  %v1980_v4 = vshll.u32 %v1734_v47, 16  ;;  %v1990_v13 = vrot.slane %v1988_v24, 4  ;;  %v2525_v10 = vrot.slane %v2523_v21, 4 }
 0x247   : > { %v1367_v17 = vld [vmem:[#allocation2 + $0xf8] sm:$0x1f]  ;;  %v3430_v29 = vshrl.u32 %v3195_v0, 16  ;;  %v3433_v36 = vshll.u32 %v3195_v0, 16  ;;  %v2878_v26 = vrot.slane %v2876_v58, 3  ;;  %v2881_v60 = vrot.slane %v2879_v7, 4  ;;  %v1654_v6 = vpop.permute.xlu0 %1653 }
 0x248   : > { %v1633_v41 = vshrl.u32 %v1367_v17, 16  ;;  %v1636_v45 = vshll.u32 %v1367_v17, 16  ;;  %v2281_v30 = vld [vmem:[#allocation2 + $0xf8] sm:$0x1f]  ;;  %1696 = vst.msk [vmem:[#allocation3 + $0x30] sm:$0xff] %vm1689_vm13, %v1654_v6  ;;  %v1979_v25 = vrot.slane %v1977_v63, 3  ;;  %v1991_v51 = vor.u32 %v1990_v13, %v1987_v31 }
 0x249   : > { %v3432_v23 = vrot.slane %v3430_v29, 4  ;;  %v3435_v16 = vrot.slane %v3433_v36, 5  ;;  %v2882_v5 = vor.u32 %v2881_v60, %v2878_v26  ;;  %v1982_v61 = vrot.slane %v1980_v4, 4  ;;  %v832_v44 = vld [vmem:[#allocation2 + $0x50] sm:$0xf8] }
 0x24a   : > { %v1635_v49 = vrot.slane %v1633_v41, 4  ;;  %v1638_v3 = vrot.slane %v1636_v45, 5  ;;  %v2528_v11 = vrot.slane %v2526_v22, 5  ;;  %v2531_v47 = vshrl.u32 %v2281_v30, 16  ;;  %v833_v58 = vld [vmem:[#allocation2 + $0x58] sm:$0xf]  ;;  %v5834_v41 = vpop.permute.xlu1 %2036 }
 0x24b   : > { %v3436_v12 = vor.u32 %v3435_v16, %v3432_v23  ;;  %v2891_v9 = vsel %vm667_vm3, %v2882_v5, %v2890_v14  ;;  %v1983_v20 = vor.u32 %v1982_v61, %v1979_v25  ;;  %v2534_v24 = vshll.u32 %v2281_v30, 16  ;;  %v3196_v29 = vld [vmem:[#allocation2 + $0x100] sm:$0xf0]  ;;  %v3197_v63 = vld [vmem:[#allocation2 + $0x108] sm:$0x1f] }
 0x24c   : > { %v1639_v18 = vor.u32 %v1638_v3, %v1635_v49  ;;  %2952 = vrot.lane.b32.xlu1 %v2891_v9, %s4681_s8  ;;  %v2529_v17 = vor.u32 %v2528_v11, %v2525_v10  ;;  %v2533_v22 = vrot.slane %v2531_v47, 4  ;;  %v3101_v36 = vrot.slane %v3022_v15, 4  ;;  %v720_v23 = vld [vmem:[#allocation2 + $0x118] sm:$0x10]  ;;  %v3198_v5 = vld [vmem:[#allocation2 + $0x110] sm:$0xf0] }
 0x24d   : > { %v3437_v7 = vsel %vm1368_vm7, %v3428_v27, %v3436_v12  ;;  %v1992_v21 = vsel %vm667_vm3, %v1983_v20, %v1991_v51  ;;  %v940_v14 = vshrl.u32 %v832_v44, 16  ;;  %v2536_v31 = vrot.slane %v2534_v24, 5  ;;  %v5842_v9 = vpop.permute.xlu0 %2950 }
 0x24e   : > { %v1640_v0 = vsel %vm1368_vm7, %v1631_v40, %v1639_v18  ;;  %3498 = vrot.lane.b32.xlu0 %v3437_v7, %s4682_s11  ;;  %v943_v45 = vshll.u32 %v832_v44, 16  ;;  %v948_v26 = vshrl.u32 %v833_v58, 16  ;;  %v951_v60 = vshll.u32 %v833_v58, 16  ;;  %v848_v18 = vld [vmem:[#allocation2 + $0xd0] sm:$0xf8] }
 0x24f   : > { %v3102_v27 = vsel %vm1222_vm9, %v3100_v39, %v3101_v36  ;;  %v942_v40 = vrot.slane %v940_v14, 3  ;;  %v3439_v4 = vshrl.u32 %v3196_v29, 16  ;;  %v3442_v6 = vshll.u32 %v3196_v29, 16  ;;  %v849_v44 = vld [vmem:[#allocation2 + $0xd8] sm:$0xf] }
 0x250   : > { %1671 = vrot.lane.b32.xlu1 %v1640_v0, %s4677_s12  ;;  %v2537_v16 = vor.u32 %v2536_v31, %v2533_v22  ;;  %v945_v49 = vrot.slane %v943_v45, 4  ;;  %v950_v3 = vrot.slane %v948_v26, 3  ;;  %v953_v30 = vrot.slane %v951_v60, 4  ;;  %v838_v0 = vld [vmem:[#allocation2 + $0x80] sm:$0xf8] }
 0x251   : > { %v3441_v25 = vrot.slane %v3439_v4, 4  ;;  %v3444_v61 = vrot.slane %v3442_v6, 5  ;;  %v3447_v13 = vshrl.u32 %v3197_v63, 16  ;;  %v3450_v12 = vshll.u32 %v3197_v63, 16  ;;  %v839_v31 = vld [vmem:[#allocation2 + $0x88] sm:$0xf] }
 0x252   : > { %2038 = vrot.lane.b32.xlu0 %v1992_v21, %s4683_s18  ;;  %v2538_v39 = vsel %vm1368_vm7, %v2529_v17, %v2537_v16  ;;  %v946_v10 = vor.u32 %v945_v49, %v942_v40  ;;  %v954_v11 = vor.u32 %v953_v30, %v950_v3  ;;  %v721_v15 = vsel %vm4899_vm4, 0, %v720_v23  ;;  %v5844_v7 = vpop.permute.xlu1 %2582  ;;  %v837_v49 = vld [vmem:[#allocation2 + $0x78] sm:$0xf]  ;;  %vm6254_vm4 = vmmov %vm6253_vm11 }
 0x253   : > { %v3445_v20 = vor.u32 %v3444_v61, %v3441_v25  ;;  %v3449_v51 = vrot.slane %v3447_v13, 4  ;;  %v3452_v47 = vrot.slane %v3450_v12, 5  ;;  %722 = vst [vmem:[#allocation2 + $0x118] sm:$0x10] %v721_v15  ;;  %v3456_v58 = vshrl.u32 %v3198_v5, 16  ;;  %vm6255_vm8 = vmmov %vm6254_vm4 }
 0x254   : > { %3133 = vrot.lane.b32.xlu1 %v3102_v27, %s4679_s21  ;;  %v955_v17 = vsel %vm667_vm3, %v946_v10, %v954_v11  ;;  %v3459_v24 = vshll.u32 %v3198_v5, 16  ;;  %v1076_v29 = vshrl.u32 %v848_v18, 16  ;;  %v1079_v21 = vshll.u32 %v848_v18, 16  ;;  %v836_v27 = vld [vmem:[#allocation2 + $0x70] sm:$0xf8]  ;;  %s4685_s21 = smov [#allocation7]  }
 0x255   : > { %1147 = vst.msk [vmem:[#allocation3 + $0x28] sm:$0xff] %vm603_vm1, %v955_v17  ;;  %v3453_v50 = vor.u32 %v3452_v47, %v3449_v51  ;;  %v5850_v22 = vrot.slane %v3456_v58, 4  ;;  %v1084_v36 = vshrl.u32 %v849_v44, 16  ;;  %v1087_v14 = vshll.u32 %v849_v44, 16  ;;  %s4609_s9 = sshll.u32 %s4685_s21, 4  ;;  %s4610_s9 = int_to_ptr.vmem [resolvable:$false] %s4609_s9 }
 0x256   : > { %2584 = vrot.lane.b32.xlu0 %v2538_v39, %s4684_s20  ;;  %1325 = vst.msk [vmem:[#allocation3 + $0x28] sm:$0xff] %vm1319_vm12, %v5739_v42  ;;  %v5854_v45 = vrot.slane %v3459_v24, 5  ;;  %v1078_v26 = vrot.slane %v1076_v29, 3  ;;  %v1081_v60 = vrot.slane %v1079_v21, 4  ;;  %v991_v63 = vshrl.u32 %v838_v0, 16  ;;  %s6057_s20 = scalar_lea.vmem [#allocation7], %s4284_s17 }
 0x257   : > { %v3454_v40 = vsel %vm1368_vm7, %v3445_v20, %v3453_v50  ;;  %v1086_v4 = vrot.slane %v1084_v36, 3  ;;  %v1089_v6 = vrot.slane %v1087_v14, 4  ;;  %v2933_v23 = vpop.permute.xlu1 %2932  ;;  %v994_v16 = vshll.u32 %v838_v0, 16  ;;  %v850_v39 = vld [vmem:[#allocation2 + $0xe0] sm:$0xf8]  ;;  %s4347_s17 = sshll.u32 %s4748_s28, 12 }
 0x258   : > { %v3462_v3 = vor.u32 %v5854_v45, %v5850_v22  ;;  %v1082_v30 = vor.u32 %v1081_v60, %v1078_v26  ;;  %2978 = vst.msk [vmem:[#allocation3 + $0x18] sm:$0xff] %vm2974_vm5, %v2933_v23  ;;  %v3479_v42 = vpop.permute.xlu0 %3478  ;;  %v993_v5 = vrot.slane %v991_v63, 3  ;;  %v999_v25 = vshrl.u32 %v839_v31, 16  ;;  %v851_v24 = vld [vmem:[#allocation2 + $0xe8] sm:$0xf]  ;;  %s4204_s29 = sshll.u32 %s6057_s20, 4  ;;  %s6178_s23 = scalar_lea.hbm %s6238_s7, %s4347_s17  ;;  %s6182_s29 = int_to_ptr.vmem [resolvable:$true] %s4204_s29 }
 0x259   : > { %v1090_v61 = vor.u32 %v1089_v6, %v1086_v4  ;;  %3155 = vst.msk [vmem:[#allocation3 + $0x18] sm:$0xff] %vm3151_vm6, %v5714_v32  ;;  %v996_v13 = vrot.slane %v994_v16, 4  ;;  %v1002_v12 = vshll.u32 %v839_v31, 16  ;;  %v974_v18 = vshrl.u32 %v836_v27, 16  ;;  %v852_v26 = vld [vmem:[#allocation2 + $0xf0] sm:$0xf8]  ;;  %p4612_p8 = scmp.lt.s32.totalorder %s6182_s29, %s4610_s9 }
 0x25a   : > { %3500 = vrot.lane.b32.xlu0 %v3454_v40, %s4682_s11  ;;  %v3199_v10 = vld [vmem:[#allocation2 + $0x118] sm:$0x1f]  ;;  %3524 = vst.msk [vmem:[#allocation3 + $0x18] sm:$0xff] %vm3520_vm0, %v3479_v42  ;;  %v1001_v11 = vrot.slane %v999_v25, 3  ;;  %v977_v15 = vshll.u32 %v836_v27, 16  ;;  %v982_v44 = vshrl.u32 %v837_v49, 16 }
 0x25b   : > { %v985_v20 = vshll.u32 %v837_v49, 16  ;;  %v3464_v51 = vshrl.u32 %v3199_v10, 16  ;;  %v3467_v47 = vshll.u32 %v3199_v10, 16  ;;  %v1091_v58 = vsel %vm667_vm3, %v1082_v30, %v1090_v61  ;;  %v1652_v0 = vpop.permute.xlu1 %1651  ;;  %v853_v23 = vld [vmem:[#allocation2 + $0xf8] sm:$0xf]  ;;  %s4191_s28 = scalar_lea.sflag [#allocation6], %s4831_s16 }
 0x25c   : > { %v997_v17 = vor.u32 %v996_v13, %v993_v5  ;;  %1155 = vst.msk [vmem:[#allocation3 + $0x68] sm:$0xff] %vm603_vm1, %v1091_v58  ;;  %v2019_v32 = vpop.permute.xlu0 %2018  ;;  %v1004_v29 = vrot.slane %v1002_v12, 4  ;;  %v976_v21 = vrot.slane %v974_v18, 3  ;;  %v979_v50 = vrot.slane %v977_v15, 4  ;;  %s4611_s8 = scalar_lea.vmem %s4610_s9, 8192 }
 0x25d   : > { %1695 = vst.msk [vmem:[#allocation3 + $0x28] sm:$0xff] %vm1689_vm13, %v1652_v0  ;;  %v984_v22 = vrot.slane %v982_v44, 3  ;;  %v3466_v36 = vrot.slane %v3464_v51, 4  ;;  %v3469_v14 = vrot.slane %v3467_v47, 5  ;;  %v987_v31 = vrot.slane %v985_v20, 4 }
 0x25e   : > { %1333 = vst.msk [vmem:[#allocation3 + $0x68] sm:$0xff] %vm1319_vm12, %v5787_v19  ;;  %v1093_v45 = vshrl.u32 %v850_v39, 16  ;;  %v1005_v60 = vor.u32 %v1004_v29, %v1001_v11  ;;  %v980_v63 = vor.u32 %v979_v50, %v976_v21  ;;  %v1096_v27 = vshll.u32 %v850_v39, 16 }
 0x25f   : > { %2064 = vst.msk [vmem:[#allocation3 + $0x28] sm:$0xff] %vm2058_vm14, %v5811_v38  ;;  %2063 = vst.msk [vmem:[#allocation3 + $0x20] sm:$0xff] %vm2058_vm14, %v2019_v32  ;;  %v1101_v40 = vshrl.u32 %v851_v24, 16  ;;  %v3470_v4 = vor.u32 %v3469_v14, %v3466_v36  ;;  %v988_v19 = vor.u32 %v987_v31, %v984_v22  ;;  %v1104_v6 = vshll.u32 %v851_v24, 16  ;;  %v3842_v22 = vld [vmem:[%s6236_s5] sm:$0x3] }
 0x260   : > { %2241 = vst.msk [vmem:[#allocation3 + $0x28] sm:$0xff] %vm2235_vm15, %v5647_v33  ;;  %2240 = vst.msk [vmem:[#allocation3 + $0x20] sm:$0xff] %vm2235_vm15, %v5767_v46  ;;  %v1095_v38 = vrot.slane %v1093_v45, 3  ;;  %v2565_v16 = vpop.permute.xlu0 %2564  ;;  %v1006_v49 = vsel %vm667_vm3, %v997_v17, %v1005_v60  ;;  %v1098_v30 = vrot.slane %v1096_v27, 4  ;;  %v1110_v42 = vshrl.u32 %v852_v26, 16  ;;  %4510 = vmatprep.subr.msk.bf16.mxu0 %vm3629_vm10, %v3842_v22 }
 0x261   : > { %2610 = vst.msk [vmem:[#allocation3 + $0x28] sm:$0xff] %vm6254_vm4, %v5825_v2  ;;  %v1103_v33 = vrot.slane %v1101_v40, 3  ;;  %v3471_v46 = vsel %vm1368_vm7, %v3462_v3, %v3470_v4  ;;  %v3540_v5 = vld [vmem:[#allocation3 + $0x18] sm:$0xff]  ;;  %v989_v25 = vsel %vm667_vm3, %v980_v63, %v988_v19  ;;  %v1106_v2 = vrot.slane %v1104_v6, 4  ;;  %v3546_v19 = vld [vmem:[#allocation3 + $0x48] sm:$0xff] }
 0x262   : > { %2609 = vst.msk [vmem:[#allocation3 + $0x20] sm:$0xff] %vm6255_vm8, %v2565_v16  ;;  %v1113_v61 = vshll.u32 %v852_v26, 16  ;;  %3502 = vrot.lane.b32.xlu1 %v3471_v46, %s4682_s11  ;;  %4446 = vmatmul.mubr.msk.bf16.gmra.mrb[20].mxu1 %vm3580_vm2, %v3540_v5  ;;  %v1099_v13 = vor.u32 %v1098_v30, %v1095_v38  ;;  %v1112_v3 = vrot.slane %v1110_v42, 3  ;;  %v1118_v12 = vshrl.u32 %v853_v23, 16  ;;  %v3547_v38 = vld [vmem:[#allocation3 + $0x50] sm:$0xff] }
 0x263   : > { %1150 = vst.msk [vmem:[#allocation3 + $0x40] sm:$0xff] %vm603_vm1, %v1006_v49  ;;  %1149 = vst.msk [vmem:[#allocation3 + $0x38] sm:$0xff] %vm603_vm1, %v989_v25  ;;  %v1121_v18 = vshll.u32 %v853_v23, 16  ;;  %v1107_v39 = vor.u32 %v1106_v2, %v1103_v33 }
 0x264   : > { %2979 = vst.msk [vmem:[#allocation3 + $0x20] sm:$0xff] %vm2974_vm5, %v5801_v57  ;;  %v1115_v10 = vrot.slane %v1113_v61, 4  ;;  %v1120_v11 = vrot.slane %v1118_v12, 3 }
 0x265   : > { %3156 = vst.msk [vmem:[#allocation3 + $0x20] sm:$0xff] %vm3151_vm6, %v5730_v62  ;;  %v1123_v15 = vrot.slane %v1121_v18, 4  ;;  %v1108_v57 = vsel %vm667_vm3, %v1099_v13, %v1107_v39  ;;  %v5992_v18 = vld [vmem:[%s6235_s4] ss:$0 sm:$0xff] }
 0x266   : > { %3525 = vst.msk [vmem:[#allocation3 + $0x20] sm:$0xff] %vm3520_vm0, %v5816_v55  ;;  %v1116_v44 = vor.u32 %v1115_v10, %v1112_v3  ;;  %v2949_v51 = vpop.permute.xlu1 %2948 }
 0x267   : > { %1156 = vst.msk [vmem:[#allocation3 + $0x70] sm:$0xff] %vm603_vm1, %v1108_v57  ;;  %v1124_v20 = vor.u32 %v1123_v15, %v1120_v11 }
 0x268   : > { %2986 = vst.msk [vmem:[#allocation3 + $0x58] sm:$0xff] %vm2974_vm5, %v2949_v51 }
 0x269   : > { %v1125_v47 = vsel %vm667_vm3, %v1116_v44, %v1124_v20  ;;  %3163 = vst.msk [vmem:[#allocation3 + $0x58] sm:$0xff] %vm3151_vm6, %v5765_v34  ;;  %vm6256_vm3 = vmmov %vm6254_vm4 }
 0x26a   : > { %1157 = vst.msk [vmem:[#allocation3 + $0x78] sm:$0xff] %vm603_vm1, %v1125_v47  ;;  %vm6257_vm7 = vmmov %vm6256_vm3 }
 0x26b   : > { %vm6258_vm9 = vmmov %vm6256_vm3 }
 0x26c   : > { %vm6259_vm11 = vmmov %vm6256_vm3 }
 0x26d   : > { %v3541_v62 = vld [vmem:[#allocation3 + $0x20] sm:$0xff]  ;;  %vm6262_vm4 = vmmov %vm6256_vm3 }
 0x26e   : > { %4449 = vmatprep.mubr.msk.bf16.mxu1 %vm3580_vm2, %v3541_v62 }
 0x26f   : > { %v1668_v55 = vpop.permute.xlu1 %1667 }
 0x270   : > { %v3495_v58 = vpop.permute.xlu0 %3494  ;;  %1703 = vst.msk [vmem:[#allocation3 + $0x68] sm:$0xff] %vm1689_vm13, %v1668_v55 }
 0x271   : > { %3532 = vst.msk [vmem:[#allocation3 + $0x58] sm:$0xff] %vm3520_vm0, %v3495_v58 }
 0x272   : > { %2072 = vst.msk [vmem:[#allocation3 + $0x68] sm:$0xff] %vm2058_vm14, %v5834_v41 }
 0x273   : > { %2249 = vst.msk [vmem:[#allocation3 + $0x68] sm:$0xff] %vm2235_vm15, %v5691_v56  ;;  %v2202_v34 = vpop.permute.xlu1 %2201 }
 0x274   : > { %2618 = vst.msk [vmem:[#allocation3 + $0x68] sm:$0xff] %vm6256_vm3, %v5844_v7  ;;  %v2035_v0 = vpop.permute.xlu0 %2034 }
 0x275   : > { %2071 = vst.msk [vmem:[#allocation3 + $0x60] sm:$0xff] %vm2058_vm14, %v2035_v0 }
 0x276   : > { %2248 = vst.msk [vmem:[#allocation3 + $0x60] sm:$0xff] %vm2235_vm15, %v5782_v37 }
 0x277   : > { %v1288_v17 = vpop.permute.xlu1 %1287 }
 0x278   : > { %v2581_v24 = vpop.permute.xlu0 %2580  ;;  %1328 = vst.msk [vmem:[#allocation3 + $0x40] sm:$0xff] %vm1319_vm12, %v1288_v17  ;;  %v3548_v49 = vld [vmem:[#allocation3 + $0x58] sm:$0xff] }
 0x279   : > { %2617 = vst.msk [vmem:[#allocation3 + $0x60] sm:$0xff] %vm6257_vm7, %v2581_v24 }
 0x27a   : > { %2987 = vst.msk [vmem:[#allocation3 + $0x60] sm:$0xff] %vm2974_vm5, %v5842_v9  ;;  %v3899_v9 = vsel %vm3629_vm10, %v3842_v22, 0  ;;  %vm6260_vm10 = vmmov %vm6256_vm3 }
 0x27b   : > { %3164 = vst.msk [vmem:[#allocation3 + $0x60] sm:$0xff] %vm3151_vm6, %v5745_v35  ;;  %v3114_v56 = vpop.permute.xlu1 %3113  ;;  %4474 = vmatpush3.bf16.msra.mxu0 %v3899_v9 }
 0x27c   : > { %v3116_v41 = vpop.permute.xlu0 %3115 }
 0x27f   : > { %v1286_v7 = vpop.permute.xlu1 %1285 }
 0x280   : > { %1327 = vst.msk [vmem:[#allocation3 + $0x38] sm:$0xff] %vm1319_vm12, %v1286_v7  ;;  %v2200_v32 = vpop.permute.xlu0 %2199 }
 0x283   : > { %v5918_v29 = vpop.permute.xlu1 %3129 }
 0x287   : > { %v2939_v37 = vpop.permute.xlu0 %2938 }
 0x288   : > { %v2025_v50 = vpop.permute.xlu1 %2024 }
 0x28d   : > { %v3485_v21 = vpop.permute.xlu0 %3484  ;;  %v2571_v36 = vpop.permute.xlu1 %2570 }
 0x291   : > { %v1658_v35 = vpop.permute.xlu0 %1657 }
 0x292   : > { %1698 = vst.msk [vmem:[#allocation3 + $0x40] sm:$0xff] %vm1689_vm13, %v1658_v35 }
 0x293   : > { %2067 = vst.msk [vmem:[#allocation3 + $0x40] sm:$0xff] %vm2058_vm14, %v5412_v8 }
 0x294   : > { %2244 = vst.msk [vmem:[#allocation3 + $0x40] sm:$0xff] %vm2235_vm15, %v5222_v59 }
 0x295   : > { %2613 = vst.msk [vmem:[#allocation3 + $0x40] sm:$0xff] %vm6258_vm9, %v5445_v43 }
 0x296   : > { %2983 = vst.msk [vmem:[#allocation3 + $0x40] sm:$0xff] %vm2974_vm5, %v5268_v53 }
 0x297   : > { %3160 = vst.msk [vmem:[#allocation3 + $0x40] sm:$0xff] %vm3151_vm6, %v5199_v48 }
 0x298   : > { %3529 = vst.msk [vmem:[#allocation3 + $0x40] sm:$0xff] %vm3520_vm0, %v5302_v28 }
 0x299   : > { %v2937_v14 = vpop.permute.xlu1 %2936 }
 0x29a   : > { %2980 = vst.msk [vmem:[#allocation3 + $0x28] sm:$0xff] %vm2974_vm5, %v2937_v14  ;;  %v3483_v8 = vpop.permute.xlu0 %3482 }
 0x29b   : > { %3157 = vst.msk [vmem:[#allocation3 + $0x28] sm:$0xff] %vm3151_vm6, %v3114_v56 }
 0x29c   : > { %3526 = vst.msk [vmem:[#allocation3 + $0x28] sm:$0xff] %vm3520_vm0, %v3483_v8 }
 0x29d   : > { %v1656_v59 = vpop.permute.xlu1 %1655 }
 0x29e   : > { %1697 = vst.msk [vmem:[#allocation3 + $0x38] sm:$0xff] %vm1689_vm13, %v1656_v59  ;;  %v2023_v43 = vpop.permute.xlu0 %2022 }
 0x29f   : > { %2066 = vst.msk [vmem:[#allocation3 + $0x38] sm:$0xff] %vm2058_vm14, %v2025_v50  ;;  %2065 = vst.msk [vmem:[#allocation3 + $0x30] sm:$0xff] %vm2058_vm14, %v2023_v43  ;;  %v3545_v27 = vld [vmem:[#allocation3 + $0x40] sm:$0xff] }
 0x2a0   : > { %2243 = vst.msk [vmem:[#allocation3 + $0x38] sm:$0xff] %vm2235_vm15, %v2202_v34  ;;  %2242 = vst.msk [vmem:[#allocation3 + $0x30] sm:$0xff] %vm2235_vm15, %v2200_v32 }
 0x2a1   : > { %2612 = vst.msk [vmem:[#allocation3 + $0x38] sm:$0xff] %vm6259_vm11, %v2571_v36  ;;  %v1300_v48 = vpop.permute.xlu1 %1299 }
 0x2a2   : > { %2982 = vst.msk [vmem:[#allocation3 + $0x38] sm:$0xff] %vm2974_vm5, %v5340_v1  ;;  %v2569_v53 = vpop.permute.xlu0 %2568 }
 0x2a3   : > { %1334 = vst.msk [vmem:[#allocation3 + $0x70] sm:$0xff] %vm1319_vm12, %v1300_v48  ;;  %v3542_v28 = vld [vmem:[#allocation3 + $0x28] sm:$0xff] }
 0x2a4   : > { %3159 = vst.msk [vmem:[#allocation3 + $0x38] sm:$0xff] %vm3151_vm6, %v5224_v52  ;;  %4450 = vmatmul.mubr.msk.bf16.gmra.mrb[24].mxu1 %vm3580_vm2, %v3542_v28 }
 0x2a5   : > { %2611 = vst.msk [vmem:[#allocation3 + $0x30] sm:$0xff] %vm6260_vm10, %v2569_v53  ;;  %v1302_v31 = vpop.permute.xlu1 %1301 }
 0x2a6   : > { %3528 = vst.msk [vmem:[#allocation3 + $0x38] sm:$0xff] %vm3520_vm0, %v5385_v54  ;;  %v3497_v1 = vpop.permute.xlu0 %3496 }
 0x2a7   : > { %2981 = vst.msk [vmem:[#allocation3 + $0x30] sm:$0xff] %vm2974_vm5, %v2939_v37 }
 0x2a8   : > { %3158 = vst.msk [vmem:[#allocation3 + $0x30] sm:$0xff] %vm3151_vm6, %v3116_v41 }
 0x2a9   : > { %3527 = vst.msk [vmem:[#allocation3 + $0x30] sm:$0xff] %vm3520_vm0, %v3485_v21  ;;  %3533 = vst.msk [vmem:[#allocation3 + $0x60] sm:$0xff] %vm3520_vm0, %v3497_v1 }
 0x2aa   : > { %1335 = vst.msk [vmem:[#allocation3 + $0x78] sm:$0xff] %vm1319_vm12, %v1302_v31  ;;  %v1670_v52 = vpop.permute.xlu0 %1669  ;;  %vm6261_vm12 = vmmov %vm6256_vm3 }
 0x2ab   : > { %v2041_v45 = vpop.permute.xlu1 %2040  ;;  %1704 = vst.msk [vmem:[#allocation3 + $0x70] sm:$0xff] %vm1689_vm13, %v1670_v52 }
 0x2ad   : > { %v3544_v60 = vld [vmem:[#allocation3 + $0x38] sm:$0xff] }
 0x2ae   : > { %v2216_v54 = vpop.permute.xlu0 %2215 }
 0x2af   : > { %v2218_v63 = vpop.permute.xlu1 %2217 }
 0x2b0   : > { %v3543_v26 = vld [vmem:[#allocation3 + $0x30] sm:$0xff]  ;;  %v3549_v33 = vld [vmem:[#allocation3 + $0x60] sm:$0xff] }
 0x2b1   : > { %4453 = vmatprep.mubr.msk.bf16.mxu1 %vm3580_vm2, %v3543_v26 }
 0x2b2   : > { %4454 = vmatmul.mubr.msk.bf16.gmra.mrb[28].mxu1 %vm3580_vm2, %v3544_v60  ;;  %v2955_v4 = vpop.permute.xlu0 %2954 }
 0x2b3   : > { %4457 = vmatprep.mubr.msk.bf16.mxu1 %vm3580_vm2, %v3545_v27  ;;  %v2587_v40 = vpop.permute.xlu1 %2586 }
 0x2b6   : > { %v3132_v23 = vpop.permute.xlu0 %3131 }
 0x2b7   : > { %v2957_v6 = vpop.permute.xlu1 %2956 }
 0x2ba   : > { %4458 = vmatmul.mubr.msk.bf16.gmra.mrb[32].mxu1 %vm3580_vm2, %v3546_v19 }
 0x2bb   : > { %4461 = vmatprep.mubr.msk.bf16.mxu1 %vm3580_vm2, %v3547_v38 }
 0x2be   : > { %v2953_v16 = vpop.permute.xlu1 %2952 }
 0x2bf   : > { %2988 = vst.msk [vmem:[#allocation3 + $0x68] sm:$0xff] %vm2974_vm5, %v2953_v16 }
 0x2c0   : > { %v3499_v30 = vpop.permute.xlu0 %3498  ;;  %3165 = vst.msk [vmem:[#allocation3 + $0x68] sm:$0xff] %vm3151_vm6, %v5918_v29 }
 0x2c1   : > { %3534 = vst.msk [vmem:[#allocation3 + $0x68] sm:$0xff] %vm3520_vm0, %v3499_v30 }
 0x2c2   : > { %4462 = vmatmul.mubr.msk.bf16.gmra.mrb[36].mxu1 %vm3580_vm2, %v3548_v49  ;;  %v1672_v42 = vpop.permute.xlu1 %1671 }
 0x2c3   : > { %4465 = vmatprep.mubr.msk.bf16.mxu1 %vm3580_vm2, %v3549_v33  ;;  %1705 = vst.msk [vmem:[#allocation3 + $0x78] sm:$0xff] %vm1689_vm13, %v1672_v42 }
 0x2c4   : > { %v2039_v46 = vpop.permute.xlu0 %2038  ;;  %2074 = vst.msk [vmem:[#allocation3 + $0x78] sm:$0xff] %vm2058_vm14, %v2041_v45 }
 0x2c5   : > { %2073 = vst.msk [vmem:[#allocation3 + $0x70] sm:$0xff] %vm2058_vm14, %v2039_v46 }
 0x2c6   : > { %2251 = vst.msk [vmem:[#allocation3 + $0x78] sm:$0xff] %vm2235_vm15, %v2218_v63  ;;  %2250 = vst.msk [vmem:[#allocation3 + $0x70] sm:$0xff] %vm2235_vm15, %v2216_v54  ;;  %v3134_v5 = vpop.permute.xlu1 %3133 }
 0x2c7   : > { %2620 = vst.msk [vmem:[#allocation3 + $0x78] sm:$0xff] %vm6261_vm12, %v2587_v40 }
 0x2c8   : > { %2990 = vst.msk [vmem:[#allocation3 + $0x78] sm:$0xff] %vm2974_vm5, %v2957_v6  ;;  %v2585_v25 = vpop.permute.xlu0 %2584  ;;  %v3550_v2 = vld [vmem:[#allocation3 + $0x68] sm:$0xff] }
 0x2c9   : > { %2619 = vst.msk [vmem:[#allocation3 + $0x70] sm:$0xff] %vm6262_vm4, %v2585_v25 }
 0x2ca   : > { %3167 = vst.msk [vmem:[#allocation3 + $0x78] sm:$0xff] %vm3151_vm6, %v3134_v5  ;;  %4466 = vmatmul.mubr.msk.bf16.gmra.mrb[40].mxu1 %vm3580_vm2, %v3550_v2 }
 0x2cb   : > { %2989 = vst.msk [vmem:[#allocation3 + $0x70] sm:$0xff] %vm2974_vm5, %v2955_v4 }
 0x2cc   : > { %3166 = vst.msk [vmem:[#allocation3 + $0x70] sm:$0xff] %vm3151_vm6, %v3132_v23  ;;  %v3501_v61 = vpop.permute.xlu0 %3500 }
 0x2cd   : > { %3535 = vst.msk [vmem:[#allocation3 + $0x70] sm:$0xff] %vm3520_vm0, %v3501_v61 }
 0x2d4   : > { %v3551_v13 = vld [vmem:[#allocation3 + $0x70] sm:$0xff]  ;;  %v3503_v3 = vpop.permute.xlu1 %3502 }
 0x2d5   : > { %4469 = vmatprep.mubr.msk.bf16.mxu1 %vm3580_vm2, %v3551_v13  ;;  %3536 = vst.msk [vmem:[#allocation3 + $0x78] sm:$0xff] %vm3520_vm0, %v3503_v3  ;;  %vm6263_vm0 = vcmask 130048  }
 0x2d6   : > { %vm6265_vm13 = vmmov %vm6263_vm0 }
 0x2d7   : > { %vm6266_vm14 = vmmov %vm6263_vm0 }
 0x2d8   : > { %vm6267_vm15 = vmmov %vm6263_vm0 }
 0x2d9   : > { %vm6269_vm5 = vmmov %vm6263_vm0 }
 0x2da   : > { %vm6270_vm6 = vmmov %vm6263_vm0 }
 0x2db   : > { %vm6271_vm8 = vmmov %vm6263_vm0 }
 0x2dc   : > { %v3552_v12 = vld [vmem:[#allocation3 + $0x78] sm:$0xff]  ;;  %vm6272_vm3 = vmmov %vm6263_vm0 }
 0x2dd   : > { %4470 = vmatmul.mubr.msk.bf16.gmra.mrb[44].mxu1 %vm3580_vm2, %v3552_v12  ;;  %vm6268_vm2 = vmmov %vm6263_vm0 }
 0x2de   : > { %vm6273_vm7 = vmmov %vm6263_vm0 }
 0x2df   : > { %vm6274_vm9 = vmmov %vm6263_vm0 }
 0x2e0   : > { %vm6275_vm11 = vmmov %vm6263_vm0 }
 0x2e1   : > { %vm6276_vm10 = vmmov %vm6263_vm0 }
 0x2e2   : > { %vm6277_vm12 = vmmov %vm6263_vm0 }
 0x2e3   : > { %vm6278_vm4 = vmmov %vm6263_vm0 }
 0x305   : > { %v4443_v39 = vpop.f32.mrb[16].mxu1 }
 0x306   : > { %v3676_v10 = vadd.f32 %v4443_v39, %v5992_v18  ;;  %v3667_v11 = vpop.f32.mrb[17].mxu1 }
 0x307   : > { %v3668_v15 = vadd.f32 %v5992_v18, %v3667_v11  ;;  %v4444_v57 = vpop.f32.mrb[18].mxu1 }
 0x308   : > { %v3679_v44 = vadd.f32 %v4444_v57, %v5992_v18  ;;  %v3670_v20 = vpop.f32.mrb[19].mxu1  ;;  %v3796_v47 = vmax.f32 %v3676_v10, 0.0 }
 0x309   : > { %v3671_v51 = vadd.f32 %v5992_v18, %v3670_v20  ;;  %v3794_v55 = vmax.f32 %v3668_v15, 0.0 }
 0x30a   : > { %v3797_v62 = vmax.f32 %v3679_v44, 0.0 }
 0x30b   : > { %v3795_v58 = vmax.f32 %v3671_v51, 0.0 }
 0x30c   : > { %v3827_v34 = vpack.c.bf16 %v3797_v62, %v3796_v47 }
 0x30d   : > { %v3826_v0 = vpack.c.bf16 %v3795_v58, %v3794_v55 }
 0x30f   : > { %4475 = vmatprep.mubr.msk.bf16.mxu0 %vm603_vm1, %v3826_v0 }
 0x310   : > { %4476 = vmatmul.mubr.msk.bf16.vlgmr.msra.gmra.mrb[16].mxu0 %vm603_vm1, %v3827_v34 }
 0x335   : > { %v4447_v17 = vpop.f32.mrb[20].mxu1 }
 0x336   : > { %v3692_v24 = vadd.f32 %v4447_v17, %v5992_v18  ;;  %v3683_v56 = vpop.f32.mrb[21].mxu1 }
 0x337   : > { %v3684_v41 = vadd.f32 %v5992_v18, %v3683_v56  ;;  %v4448_v7 = vpop.f32.mrb[22].mxu1 }
 0x338   : > { %v3695_v32 = vadd.f32 %v4448_v7, %v5992_v18  ;;  %v3686_v29 = vpop.f32.mrb[23].mxu1  ;;  %v3800_v21 = vmax.f32 %v3692_v24, 0.0 }
 0x339   : > { %v3687_v37 = vadd.f32 %v5992_v18, %v3686_v29  ;;  %v3798_v22 = vmax.f32 %v3684_v41, 0.0 }
 0x33a   : > { %v3801_v50 = vmax.f32 %v3695_v32, 0.0 }
 0x33b   : > { %v3799_v9 = vmax.f32 %v3687_v37, 0.0 }
 0x33c   : > { %v3829_v35 = vpack.c.bf16 %v3801_v50, %v3800_v21 }
 0x33d   : > { %v3828_v36 = vpack.c.bf16 %v3799_v9, %v3798_v22 }
 0x33f   : > { %4479 = vmatprep.mubr.msk.bf16.mxu0 %vm603_vm1, %v3828_v36 }
 0x340   : > { %4480 = vmatmul.mubr.msk.bf16.gmra.mrb[20].mxu0 %vm603_vm1, %v3829_v35 }
 0x377   : > { %v4451_v14 = vpop.f32.mrb[24].mxu1 }
 0x378   : > { %v3708_v8 = vadd.f32 %v4451_v14, %v5992_v18  ;;  %v3699_v59 = vpop.f32.mrb[25].mxu1 }
 0x379   : > { %v3700_v43 = vadd.f32 %v5992_v18, %v3699_v59  ;;  %v4452_v48 = vpop.f32.mrb[26].mxu1 }
 0x37a   : > { %v3711_v53 = vadd.f32 %v4452_v48, %v5992_v18  ;;  %v3702_v28 = vpop.f32.mrb[27].mxu1  ;;  %v3804_v1 = vmax.f32 %v3708_v8, 0.0 }
 0x37b   : > { %v3703_v31 = vadd.f32 %v5992_v18, %v3702_v28  ;;  %v3802_v45 = vmax.f32 %v3700_v43, 0.0 }
 0x37c   : > { %v3805_v52 = vmax.f32 %v3711_v53, 0.0 }
 0x37d   : > { %v3803_v26 = vmax.f32 %v3703_v31, 0.0 }
 0x37e   : > { %v3831_v54 = vpack.c.bf16 %v3805_v52, %v3804_v1 }
 0x37f   : > { %v3830_v60 = vpack.c.bf16 %v3803_v26, %v3802_v45 }
 0x381   : > { %4483 = vmatprep.mubr.msk.bf16.mxu0 %vm603_vm1, %v3830_v60 }
 0x382   : > { %4484 = vmatmul.mubr.msk.bf16.gmra.mrb[24].mxu0 %vm603_vm1, %v3831_v54 }
 0x385   : > { %v4455_v63 = vpop.f32.mrb[28].mxu1 }
 0x386   : > { %v3724_v27 = vadd.f32 %v4455_v63, %v5992_v18  ;;  %v3715_v40 = vpop.f32.mrb[29].mxu1 }
 0x387   : > { %v3716_v4 = vadd.f32 %v5992_v18, %v3715_v40  ;;  %v4456_v19 = vpop.f32.mrb[30].mxu1 }
 0x388   : > { %v3727_v38 = vadd.f32 %v4456_v19, %v5992_v18  ;;  %v3718_v6 = vpop.f32.mrb[31].mxu1  ;;  %v3808_v16 = vmax.f32 %v3724_v27, 0.0 }
 0x389   : > { %v3719_v23 = vadd.f32 %v5992_v18, %v3718_v6  ;;  %v3806_v30 = vmax.f32 %v3716_v4, 0.0 }
 0x38a   : > { %v3809_v49 = vmax.f32 %v3727_v38, 0.0 }
 0x38b   : > { %v3807_v33 = vmax.f32 %v3719_v23, 0.0  ;;  %v6045_v23 = vld [vmem:[%s6237_s6] ss:$0 sm:$0xff] }
 0x38c   : > { %v3833_v42 = vpack.c.bf16 %v3809_v49, %v3808_v16  ;;  %v4064_v49 = vld [vmem:[%s4837_s15 + $0x10] sm:$0xff] }
 0x38d   : > { %v3832_v46 = vpack.c.bf16 %v3807_v33, %v3806_v30  ;;  %v4459_v5 = vpop.f32.mrb[32].mxu1  ;;  %v4062_v33 = vld [vmem:[%s4837_s15] sm:$0xff] }
 0x38e   : > { %v3740_v25 = vadd.f32 %v4459_v5, %v5992_v18  ;;  %v3731_v2 = vpop.f32.mrb[33].mxu1  ;;  %v4065_v5 = vld [vmem:[%s4837_s15 + $0x18] sm:$0xff] }
 0x38f   : > { %v3732_v61 = vadd.f32 %v5992_v18, %v3731_v2  ;;  %v4460_v13 = vpop.f32.mrb[34].mxu1  ;;  %4487 = vmatprep.mubr.msk.bf16.mxu0 %vm603_vm1, %v3832_v46 }
 0x390   : > { %v3743_v3 = vadd.f32 %v4460_v13, %v5992_v18  ;;  %v3734_v12 = vpop.f32.mrb[35].mxu1  ;;  %4488 = vmatmul.mubr.msk.bf16.gmra.mrb[28].mxu0 %vm603_vm1, %v3833_v42  ;;  %v3812_v10 = vmax.f32 %v3740_v25, 0.0  ;;  %v4063_v13 = vld [vmem:[%s4837_s15 + $0x8] sm:$0xff] }
 0x391   : > { %v3735_v39 = vadd.f32 %v5992_v18, %v3734_v12  ;;  %v3810_v15 = vmax.f32 %v3732_v61, 0.0 }
 0x392   : > { %v3813_v11 = vmax.f32 %v3743_v3, 0.0 }
 0x393   : > { %v3811_v57 = vmax.f32 %v3735_v39, 0.0 }
 0x394   : > { %v3835_v44 = vpack.c.bf16 %v3813_v11, %v3812_v10 }
 0x395   : > { %v3834_v20 = vpack.c.bf16 %v3811_v57, %v3810_v15  ;;  %v4463_v51 = vpop.f32.mrb[36].mxu1 }
 0x396   : > { %v3756_v47 = vadd.f32 %v4463_v51, %v5992_v18  ;;  %v3747_v62 = vpop.f32.mrb[37].mxu1  ;;  %v4068_v51 = vld [vmem:[%s4837_s15 + $0x30] sm:$0xff] }
 0x397   : > { %v3748_v55 = vadd.f32 %v5992_v18, %v3747_v62  ;;  %v4464_v58 = vpop.f32.mrb[38].mxu1  ;;  %4491 = vmatprep.mubr.msk.bf16.mxu0 %vm603_vm1, %v3834_v20 }
 0x398   : > { %v3759_v34 = vadd.f32 %v4464_v58, %v5992_v18  ;;  %v3750_v0 = vpop.f32.mrb[39].mxu1  ;;  %4492 = vmatmul.mubr.msk.bf16.gmra.mrb[32].mxu0 %vm603_vm1, %v3835_v44  ;;  %v3816_v24 = vmax.f32 %v3756_v47, 0.0 }
 0x399   : > { %v3751_v17 = vadd.f32 %v5992_v18, %v3750_v0  ;;  %v3814_v41 = vmax.f32 %v3748_v55, 0.0  ;;  %v4066_v55 = vld [vmem:[%s4837_s15 + $0x20] sm:$0xff]  ;;  %v4069_v0 = vld [vmem:[%s4837_s15 + $0x38] sm:$0xff] }
 0x39a   : > { %v3817_v56 = vmax.f32 %v3759_v34, 0.0 }
 0x39b   : > { %v3815_v7 = vmax.f32 %v3751_v17, 0.0 }
 0x39c   : > { %v3837_v32 = vpack.c.bf16 %v3817_v56, %v3816_v24 }
 0x39d   : > { %v3836_v29 = vpack.c.bf16 %v3815_v7, %v3814_v41  ;;  %v4467_v37 = vpop.f32.mrb[40].mxu1  ;;  %v4067_v41 = vld [vmem:[%s4837_s15 + $0x28] sm:$0xff] }
 0x39e   : > { %v3772_v21 = vadd.f32 %v4467_v37, %v5992_v18  ;;  %v3763_v50 = vpop.f32.mrb[41].mxu1 }
 0x39f   : > { %4495 = vmatprep.mubr.msk.bf16.mxu0 %vm603_vm1, %v3836_v29  ;;  %v3764_v22 = vadd.f32 %v5992_v18, %v3763_v50  ;;  %v4468_v9 = vpop.f32.mrb[42].mxu1 }
 0x3a0   : > { %4496 = vmatmul.mubr.msk.bf16.gmra.mrb[36].mxu0 %vm603_vm1, %v3837_v32  ;;  %v3775_v35 = vadd.f32 %v4468_v9, %v5992_v18  ;;  %v3766_v36 = vpop.f32.mrb[43].mxu1  ;;  %v3820_v8 = vmax.f32 %v3772_v21, 0.0 }
 0x3a1   : > { %v3767_v14 = vadd.f32 %v5992_v18, %v3766_v36  ;;  %v3818_v43 = vmax.f32 %v3764_v22, 0.0  ;;  %v4072_v36 = vld [vmem:[%s4837_s15 + $0x50] sm:$0xff] }
 0x3a2   : > { %v3821_v59 = vmax.f32 %v3775_v35, 0.0 }
 0x3a3   : > { %v3819_v48 = vmax.f32 %v3767_v14, 0.0 }
 0x3a4   : > { %v3839_v53 = vpack.c.bf16 %v3821_v59, %v3820_v8  ;;  %v4070_v59 = vld [vmem:[%s4837_s15 + $0x40] sm:$0xff] }
 0x3a5   : > { %v3838_v28 = vpack.c.bf16 %v3819_v48, %v3818_v43 }
 0x3a7   : > { %4499 = vmatprep.mubr.msk.bf16.mxu0 %vm603_vm1, %v3838_v28 }
 0x3a8   : > { %4500 = vmatmul.mubr.msk.bf16.gmra.mrb[40].mxu0 %vm603_vm1, %v3839_v53  ;;  %v4073_v53 = vld [vmem:[%s4837_s15 + $0x58] sm:$0xff] }
 0x3b0   : > { %v4471_v31 = vpop.f32.mrb[44].mxu1 }
 0x3b1   : > { %v3788_v1 = vadd.f32 %v4471_v31, %v5992_v18  ;;  %v3779_v52 = vpop.f32.mrb[45].mxu1 }
 0x3b2   : > { %v3780_v45 = vadd.f32 %v5992_v18, %v3779_v52  ;;  %v4472_v26 = vpop.f32.mrb[46].mxu1  ;;  %v4071_v52 = vld [vmem:[%s4837_s15 + $0x48] sm:$0xff] }
 0x3b3   : > { %v3791_v54 = vadd.f32 %v4472_v26, %v5992_v18  ;;  %v3782_v60 = vpop.f32.mrb[47].mxu1  ;;  %v3824_v27 = vmax.f32 %v3788_v1, 0.0 }
 0x3b4   : > { %v3783_v63 = vadd.f32 %v5992_v18, %v3782_v60  ;;  %v3822_v4 = vmax.f32 %v3780_v45, 0.0 }
 0x3b5   : > { %v3825_v40 = vmax.f32 %v3791_v54, 0.0 }
 0x3b6   : > { %v3823_v19 = vmax.f32 %v3783_v63, 0.0 }
 0x3b7   : > { %v3841_v38 = vpack.c.bf16 %v3825_v40, %v3824_v27 }
 0x3b8   : > { %v3840_v6 = vpack.c.bf16 %v3823_v19, %v3822_v4 }
 0x3ba   : > { %4503 = vmatprep.mubr.msk.bf16.mxu0 %vm603_vm1, %v3840_v6 }
 0x3bb   : > { %4504 = vmatmul.mubr.msk.bf16.gmra.mrb[44].mxu0 %vm603_vm1, %v3841_v38  ;;  %vm6264_vm1 = vmmov %vm6263_vm0  ;;  %v4076_v38 = vld [vmem:[%s4837_s15 + $0x70] sm:$0xff] }
 0x3e3   : > { %v4477_v16 = vpop.f32.mrb[16].mxu0 }
 0x3e4   : > { %v3944_v18 = vadd.f32 %v4477_v16, %v6045_v23  ;;  %v3935_v30 = vpop.f32.mrb[17].mxu0 }
 0x3e5   : > { %v3936_v42 = vadd.f32 %v6045_v23, %v3935_v30  ;;  %v4478_v46 = vpop.f32.mrb[18].mxu0 }
 0x3e6   : > { %v4096_v25 = vadd.f32 %v4064_v49, %v3944_v18  ;;  %v3947_v2 = vadd.f32 %v4478_v46, %v6045_v23  ;;  %v3938_v61 = vpop.f32.mrb[19].mxu0  ;;  %v4074_v49 = vld [vmem:[%s4837_s15 + $0x60] sm:$0xff] }
 0x3e7   : > { %v4094_v3 = vadd.f32 %v4062_v33, %v3936_v42  ;;  %v3939_v12 = vadd.f32 %v6045_v23, %v3938_v61  ;;  %v4077_v33 = vld [vmem:[%s4837_s15 + $0x78] sm:$0xff] }
 0x3e8   : > { %v4128_v39 = vmax.f32 %v4096_v25, 0.0  ;;  %v4097_v10 = vadd.f32 %v4065_v5, %v3947_v2  ;;  %v4075_v25 = vld [vmem:[%s4837_s15 + $0x68] sm:$0xff] }
 0x3e9   : > { %v4126_v11 = vmax.f32 %v4094_v3, 0.0  ;;  %v4095_v15 = vadd.f32 %v4063_v13, %v3939_v12 }
 0x3ea   : > { %4160 = vst.msk [vmem:[%s6057_s20 + $0x10] sm:$0xff] %vm6263_vm0, %v4128_v39  ;;  %v4129_v57 = vmax.f32 %v4097_v10, 0.0 }
 0x3eb   : > { %4158 = vst.msk [vmem:[%s6057_s20] sm:$0xff] %vm6264_vm1, %v4126_v11  ;;  %v4127_v44 = vmax.f32 %v4095_v15, 0.0  ;;  %vm6279_vm1 = vmmov %vm6263_vm0 }
 0x3ec   : > { %4161 = vst.msk [vmem:[%s6057_s20 + $0x18] sm:$0xff] %vm6265_vm13, %v4129_v57  ;;  %v4080_v57 = vld [vmem:[%s4837_s15 + $0x90] sm:$0xff]  ;;  %vm6280_vm13 = vmmov %vm6263_vm0 }
 0x3ed   : > { %4159 = vst.msk [vmem:[%s6057_s20 + $0x8] sm:$0xff] %vm6266_vm14, %v4127_v44  ;;  %vm6281_vm14 = vmmov %vm6263_vm0 }
 0x413   : > { %v4481_v20 = vpop.f32.mrb[20].mxu0 }
 0x414   : > { %v3960_v47 = vadd.f32 %v4481_v20, %v6045_v23  ;;  %v3951_v62 = vpop.f32.mrb[21].mxu0 }
 0x415   : > { %v3952_v58 = vadd.f32 %v6045_v23, %v3951_v62  ;;  %v4482_v34 = vpop.f32.mrb[22].mxu0 }
 0x416   : > { %v4100_v17 = vadd.f32 %v4068_v51, %v3960_v47  ;;  %v3963_v24 = vadd.f32 %v4482_v34, %v6045_v23  ;;  %v3954_v56 = vpop.f32.mrb[23].mxu0  ;;  %v4078_v51 = vld [vmem:[%s4837_s15 + $0x80] sm:$0xff] }
 0x417   : > { %v4098_v7 = vadd.f32 %v4066_v55, %v3952_v58  ;;  %v3955_v32 = vadd.f32 %v6045_v23, %v3954_v56  ;;  %v4081_v55 = vld [vmem:[%s4837_s15 + $0x98] sm:$0xff] }
 0x418   : > { %v4132_v29 = vmax.f32 %v4100_v17, 0.0  ;;  %v4101_v37 = vadd.f32 %v4069_v0, %v3963_v24  ;;  %v4079_v17 = vld [vmem:[%s4837_s15 + $0x88] sm:$0xff] }
 0x419   : > { %v4130_v21 = vmax.f32 %v4098_v7, 0.0  ;;  %v4099_v50 = vadd.f32 %v4067_v41, %v3955_v32 }
 0x41a   : > { %4164 = vst.msk [vmem:[%s6057_s20 + $0x30] sm:$0xff] %vm6267_vm15, %v4132_v29  ;;  %v4133_v22 = vmax.f32 %v4101_v37, 0.0  ;;  %vm6282_vm15 = vmmov %vm6263_vm0 }
 0x41b   : > { %4162 = vst.msk [vmem:[%s6057_s20 + $0x20] sm:$0xff] %vm6268_vm2, %v4130_v21  ;;  %v4131_v9 = vmax.f32 %v4099_v50, 0.0  ;;  %vm6283_vm2 = vmmov %vm6263_vm0 }
 0x41c   : > { %4165 = vst.msk [vmem:[%s6057_s20 + $0x38] sm:$0xff] %vm6269_vm5, %v4133_v22  ;;  %v4084_v22 = vld [vmem:[%s4837_s15 + $0xb0] sm:$0xff]  ;;  %vm6284_vm5 = vmmov %vm6263_vm0 }
 0x41d   : > { %4163 = vst.msk [vmem:[%s6057_s20 + $0x28] sm:$0xff] %vm6270_vm6, %v4131_v9  ;;  %vm6285_vm6 = vmmov %vm6263_vm0 }
 0x455   : > { %v4485_v35 = vpop.f32.mrb[24].mxu0 }
 0x456   : > { %v3976_v14 = vadd.f32 %v4485_v35, %v6045_v23  ;;  %v3967_v8 = vpop.f32.mrb[25].mxu0 }
 0x457   : > { %v3968_v43 = vadd.f32 %v6045_v23, %v3967_v8  ;;  %v4486_v48 = vpop.f32.mrb[26].mxu0 }
 0x458   : > { %v4104_v28 = vadd.f32 %v4072_v36, %v3976_v14  ;;  %v3979_v31 = vadd.f32 %v4486_v48, %v6045_v23  ;;  %v3970_v1 = vpop.f32.mrb[27].mxu0  ;;  %v4082_v36 = vld [vmem:[%s4837_s15 + $0xa0] sm:$0xff] }
 0x459   : > { %v4102_v45 = vadd.f32 %v4070_v59, %v3968_v43  ;;  %v3971_v26 = vadd.f32 %v6045_v23, %v3970_v1  ;;  %v4085_v59 = vld [vmem:[%s4837_s15 + $0xb8] sm:$0xff] }
 0x45a   : > { %v4136_v54 = vmax.f32 %v4104_v28, 0.0  ;;  %v4105_v60 = vadd.f32 %v4073_v53, %v3979_v31  ;;  %v4083_v28 = vld [vmem:[%s4837_s15 + $0xa8] sm:$0xff] }
 0x45b   : > { %v4134_v63 = vmax.f32 %v4102_v45, 0.0  ;;  %v4103_v27 = vadd.f32 %v4071_v52, %v3971_v26 }
 0x45c   : > { %4168 = vst.msk [vmem:[%s6057_s20 + $0x50] sm:$0xff] %vm6271_vm8, %v4136_v54  ;;  %v4137_v40 = vmax.f32 %v4105_v60, 0.0  ;;  %vm6286_vm8 = vmmov %vm6263_vm0 }
 0x45d   : > { %4166 = vst.msk [vmem:[%s6057_s20 + $0x40] sm:$0xff] %vm6272_vm3, %v4134_v63  ;;  %v4135_v4 = vmax.f32 %v4103_v27, 0.0  ;;  %vm6287_vm3 = vmmov %vm6263_vm0 }
 0x45e   : > { %4169 = vst.msk [vmem:[%s6057_s20 + $0x58] sm:$0xff] %vm6273_vm7, %v4137_v40  ;;  %v4088_v40 = vld [vmem:[%s4837_s15 + $0xd0] sm:$0xff]  ;;  %vm6288_vm7 = vmmov %vm6263_vm0 }
 0x45f   : > { %4167 = vst.msk [vmem:[%s6057_s20 + $0x48] sm:$0xff] %vm6274_vm9, %v4135_v4  ;;  %vm6289_vm9 = vmmov %vm6263_vm0 }
 0x463   : > { %v4489_v19 = vpop.f32.mrb[28].mxu0 }
 0x464   : > { %v3992_v6 = vadd.f32 %v4489_v19, %v6045_v23  ;;  %v3983_v16 = vpop.f32.mrb[29].mxu0 }
 0x465   : > { %v3984_v18 = vadd.f32 %v6045_v23, %v3983_v16  ;;  %v4490_v30 = vpop.f32.mrb[30].mxu0 }
 0x466   : > { %v4108_v42 = vadd.f32 %v4076_v38, %v3992_v6  ;;  %v3995_v46 = vadd.f32 %v4490_v30, %v6045_v23  ;;  %v3986_v5 = vpop.f32.mrb[31].mxu0  ;;  %v4086_v38 = vld [vmem:[%s4837_s15 + $0xc0] sm:$0xff] }
 0x467   : > { %v4106_v2 = vadd.f32 %v4074_v49, %v3984_v18  ;;  %v3987_v61 = vadd.f32 %v6045_v23, %v3986_v5  ;;  %v4089_v49 = vld [vmem:[%s4837_s15 + $0xd8] sm:$0xff] }
 0x468   : > { %v4140_v13 = vmax.f32 %v4108_v42, 0.0  ;;  %v4109_v3 = vadd.f32 %v4077_v33, %v3995_v46  ;;  %v4087_v42 = vld [vmem:[%s4837_s15 + $0xc8] sm:$0xff] }
 0x469   : > { %v4138_v12 = vmax.f32 %v4106_v2, 0.0  ;;  %v4107_v39 = vadd.f32 %v4075_v25, %v3987_v61 }
 0x46a   : > { %4172 = vst.msk [vmem:[%s6057_s20 + $0x70] sm:$0xff] %vm6275_vm11, %v4140_v13  ;;  %v4141_v10 = vmax.f32 %v4109_v3, 0.0  ;;  %vm6290_vm11 = vmmov %vm6263_vm0 }
 0x46b   : > { %4170 = vst.msk [vmem:[%s6057_s20 + $0x60] sm:$0xff] %vm6276_vm10, %v4138_v12  ;;  %v4139_v11 = vmax.f32 %v4107_v39, 0.0  ;;  %v4493_v15 = vpop.f32.mrb[32].mxu0  ;;  %vm6291_vm10 = vmmov %vm6263_vm0 }
 0x46c   : > { %4173 = vst.msk [vmem:[%s6057_s20 + $0x78] sm:$0xff] %vm6277_vm12, %v4141_v10  ;;  %v4008_v44 = vadd.f32 %v4493_v15, %v6045_v23  ;;  %v3999_v20 = vpop.f32.mrb[33].mxu0  ;;  %v4092_v10 = vld [vmem:[%s4837_s15 + $0xf0] sm:$0xff]  ;;  %vm6292_vm12 = vmmov %vm6263_vm0 }
 0x46d   : > { %4171 = vst.msk [vmem:[%s6057_s20 + $0x68] sm:$0xff] %vm6278_vm4, %v4139_v11  ;;  %v4000_v47 = vadd.f32 %v6045_v23, %v3999_v20  ;;  %v4494_v62 = vpop.f32.mrb[34].mxu0  ;;  %vm6293_vm4 = vmmov %vm6263_vm0 }
 0x46e   : > { %v4112_v58 = vadd.f32 %v4080_v57, %v4008_v44  ;;  %v4011_v34 = vadd.f32 %v4494_v62, %v6045_v23  ;;  %v4002_v0 = vpop.f32.mrb[35].mxu0  ;;  %v4090_v57 = vld [vmem:[%s4837_s15 + $0xe0] sm:$0xff] }
 0x46f   : > { %v4110_v24 = vadd.f32 %v4078_v51, %v4000_v47  ;;  %v4003_v56 = vadd.f32 %v6045_v23, %v4002_v0  ;;  %v4093_v51 = vld [vmem:[%s4837_s15 + $0xf8] sm:$0xff] }
 0x470   : > { %v4144_v41 = vmax.f32 %v4112_v58, 0.0  ;;  %v4113_v7 = vadd.f32 %v4081_v55, %v4011_v34  ;;  %v4091_v58 = vld [vmem:[%s4837_s15 + $0xe8] sm:$0xff]  ;;  %s4605_s15 = scalar_lea.vmem %s6182_s29, 4096 }
 0x471   : > { %v4142_v32 = vmax.f32 %v4110_v24, 0.0  ;;  %v4111_v29 = vadd.f32 %v4079_v17, %v4003_v56  ;;  %p4606_p6 = scmp.ne.s32.totalorder %s6182_s29, %s4605_s15  ;;  %p4613_p10 = scmp.lt.s32.totalorder %s4611_s8, %s4605_s15 }
 0x472   : > { %4176 = vst.msk [vmem:[%s6057_s20 + $0x90] sm:$0xff] %vm6263_vm0, %v4144_v41  ;;  %v4145_v37 = vmax.f32 %v4113_v7, 0.0 }
 0x473   : > { %4174 = vst.msk [vmem:[%s6057_s20 + $0x80] sm:$0xff] %vm6279_vm1, %v4142_v32  ;;  %v4143_v21 = vmax.f32 %v4111_v29, 0.0  ;;  %v4497_v50 = vpop.f32.mrb[36].mxu0  ;;  %p4607_p12 = pnand %p4606_p6, %p6294_p11  ;;  %p4614_p0 = por %p4613_p10, %p4612_p8 }
 0x474   : > { %4177 = vst.msk [vmem:[%s6057_s20 + $0x98] sm:$0xff] %vm6280_vm13, %v4145_v37  ;;  %v4024_v9 = vadd.f32 %v4497_v50, %v6045_v23  ;;  %v4015_v35 = vpop.f32.mrb[37].mxu0 }
 0x475   : > { %4175 = vst.msk [vmem:[%s6057_s20 + $0x88] sm:$0xff] %vm6281_vm14, %v4143_v21  ;;  %v4016_v14 = vadd.f32 %v6045_v23, %v4015_v35  ;;  %v4498_v8 = vpop.f32.mrb[38].mxu0  ;;  %p4608_p13 = pneg %p4607_p12 }
 0x476   : > { %v4116_v43 = vadd.f32 %v4084_v22, %v4024_v9  ;;  %v4027_v48 = vadd.f32 %v4498_v8, %v6045_v23  ;;  %v4018_v53 = vpop.f32.mrb[39].mxu0 }
 0x477   : > { %v4114_v31 = vadd.f32 %v4082_v36, %v4016_v14  ;;  %v4019_v1 = vadd.f32 %v6045_v23, %v4018_v53  ;;  %p4615_p2 = pnand %p4614_p0, %p4608_p13 }
 0x478   : > { %v4148_v52 = vmax.f32 %v4116_v43, 0.0  ;;  %v4117_v45 = vadd.f32 %v4085_v59, %v4027_v48 }
 0x479   : > { %v4146_v26 = vmax.f32 %v4114_v31, 0.0  ;;  %v4115_v54 = vadd.f32 %v4083_v28, %v4019_v1 }
 0x47a   : > { %4180 = vst.msk [vmem:[%s6057_s20 + $0xb0] sm:$0xff] %vm6282_vm15, %v4148_v52  ;;  %v4149_v60 = vmax.f32 %v4117_v45, 0.0 }
 0x47b   : > { %4178 = vst.msk [vmem:[%s6057_s20 + $0xa0] sm:$0xff] %vm6283_vm2, %v4146_v26  ;;  %v4147_v63 = vmax.f32 %v4115_v54, 0.0  ;;  %v4501_v27 = vpop.f32.mrb[40].mxu0 }
 0x47c   : > { %4181 = vst.msk [vmem:[%s6057_s20 + $0xb8] sm:$0xff] %vm6284_vm5, %v4149_v60  ;;  %v4040_v4 = vadd.f32 %v4501_v27, %v6045_v23  ;;  %v4031_v19 = vpop.f32.mrb[41].mxu0 }
 0x47d   : > { %4179 = vst.msk [vmem:[%s6057_s20 + $0xa8] sm:$0xff] %vm6285_vm6, %v4147_v63  ;;  %v4032_v6 = vadd.f32 %v6045_v23, %v4031_v19  ;;  %v4502_v16 = vpop.f32.mrb[42].mxu0 }
 0x47e   : > { %v4120_v18 = vadd.f32 %v4088_v40, %v4040_v4  ;;  %v4043_v30 = vadd.f32 %v4502_v16, %v6045_v23  ;;  %v4034_v33 = vpop.f32.mrb[43].mxu0 }
 0x47f   : > { %v4118_v46 = vadd.f32 %v4086_v38, %v4032_v6  ;;  %v4035_v5 = vadd.f32 %v6045_v23, %v4034_v33 }
 0x480   : > { %v4152_v25 = vmax.f32 %v4120_v18, 0.0  ;;  %v4121_v2 = vadd.f32 %v4089_v49, %v4043_v30 }
 0x481   : > { %v4150_v61 = vmax.f32 %v4118_v46, 0.0  ;;  %v4119_v13 = vadd.f32 %v4087_v42, %v4035_v5 }
 0x482   : > { %4184 = vst.msk [vmem:[%s6057_s20 + $0xd0] sm:$0xff] %vm6286_vm8, %v4152_v25  ;;  %v4153_v3 = vmax.f32 %v4121_v2, 0.0 }
 0x483   : > { %4182 = vst.msk [vmem:[%s6057_s20 + $0xc0] sm:$0xff] %vm6287_vm3, %v4150_v61  ;;  %v4151_v12 = vmax.f32 %v4119_v13, 0.0 }
 0x484   : > { %4185 = vst.msk [vmem:[%s6057_s20 + $0xd8] sm:$0xff] %vm6288_vm7, %v4153_v3 }
 0x485   : > { %4183 = vst.msk [vmem:[%s6057_s20 + $0xc8] sm:$0xff] %vm6289_vm9, %v4151_v12 }
 0x48e   : > { %v4505_v39 = vpop.f32.mrb[44].mxu0 }
 0x48f   : > { %v4056_v11 = vadd.f32 %v4505_v39, %v6045_v23  ;;  %v4047_v15 = vpop.f32.mrb[45].mxu0 }
 0x490   : > { %v4048_v44 = vadd.f32 %v6045_v23, %v4047_v15  ;;  %v4506_v20 = vpop.f32.mrb[46].mxu0 }
 0x491   : > { %v4124_v47 = vadd.f32 %v4092_v10, %v4056_v11  ;;  %v4059_v62 = vadd.f32 %v4506_v20, %v6045_v23  ;;  %v4050_v55 = vpop.f32.mrb[47].mxu0 }
 0x492   : > { %v4122_v34 = vadd.f32 %v4090_v57, %v4048_v44  ;;  %v4051_v0 = vadd.f32 %v6045_v23, %v4050_v55 }
 0x493   : > { %v4156_v17 = vmax.f32 %v4124_v47, 0.0  ;;  %v4125_v24 = vadd.f32 %v4093_v51, %v4059_v62 }
 0x494   : > { %v4154_v56 = vmax.f32 %v4122_v34, 0.0  ;;  %v4123_v41 = vadd.f32 %v4091_v58, %v4051_v0 }
 0x495   : > { %4188 = vst.msk [vmem:[%s6057_s20 + $0xf0] sm:$0xff] %vm6290_vm11, %v4156_v17  ;;  %v4157_v7 = vmax.f32 %v4125_v24, 0.0 }
 0x496   : > { %4186 = vst.msk [vmem:[%s6057_s20 + $0xe0] sm:$0xff] %vm6291_vm10, %v4154_v56  ;;  %v4155_v32 = vmax.f32 %v4123_v41, 0.0 }
 0x497   : > { %4189 = vst.msk [vmem:[%s6057_s20 + $0xf8] sm:$0xff] %vm6292_vm12, %v4157_v7 }
 0x498   : > { %4187 = vst.msk [vmem:[%s6057_s20 + $0xe8] sm:$0xff] %vm6293_vm4, %v4155_v32 }
 0x499   : > { %4618 = shalt.err (!%p4615_p2)
}
 0x49a   : > { %s4619_s11 = scalar_lea.hbm %s6178_s23, 4096  ;;  %s4623_s17 = scalar_lea.hbm %s6238_s7, 8192 }
 0x49b   : > { %p4620_p4 = scmp.ne.s32.totalorder %s6178_s23, %s4619_s11  ;;  %p4624_p9 = scmp.lt.u32.totalorder %s6178_s23, %s6238_s7 }
 0x49c   : > { %p4625_p1 = scmp.lt.u32.totalorder %s4623_s17, %s4619_s11  ;;  %p4627_p6 = scmp.lt.u32.totalorder %s4619_s11, %s6178_s23 }
 0x49d   : > { %p4621_p5 = pnand %p4620_p4, %p6294_p11 }
 0x49e   : > { %p4626_p3 = por %p4625_p1, %p4624_p9 }
 0x49f   : > { %p4622_p7 = pneg %p4621_p5 }
 0x4a0   : > { %p4628_p12 = por %p4627_p6, %p4626_p3 }
 0x4a2   : > { %p4629_p13 = pnand %p4628_p12, %p4622_p7 }
 0x4a4   : > { %4632 = shalt.err (!%p4629_p13)
}
 0x4a5   : > { %s4686_s15 = smov 128  }
 0x4a6   : > { %4513 = dma.vmem_to_hbm [thread:$0]  (%p6294_p11), %s6182_s29, 4096, %s6178_s23, %s4191_s28, %s4686_s15, %s4686_s15, %s4677_s12  }
 0x4a7 PF: > { %s4219_s21 = sand.u32 1, %s4659_s24   ;;  %p6295_p8 = scmp.ne.s32.totalorder %s6245_s14, 0 }
 0x4a8   : > { %p6296_p10 = scmp.ge.s32.totalorder %s4671_s27, 2  ;;  %s4220_s9 = scalar_lea.sflag [#allocation6], %s4219_s21 }
 0x4aa   : > { %p4520_p0 = pnand %p6296_p10, %p6295_p8 }
 0x4ac   : > { %4654 = dma.done.wait (!%p4520_p0), %s4220_s9, 4096  }
 0x4ad   : > { %4656 = vsyncadd (!%p4520_p0), %s4220_s9, 4294963200  ;;  %p20_p2 = scmp.ge.s32.totalorder %s4752_s30, 4   ;;  %s6297_s24 = smov %s4663_s25 }
 0x4ae   : > { %s6298_s25 = smov %s4667_s26  ;;  %s6299_s26 = smov %s4764_s10 }
 0x4af   : > { %s6300_s27 = smov %s4752_s30  ;;  %22 = sbr.rel (!%p20_p2) target bundleno = 5 (0x5), region = 96 }
 0x4b6   :  { %4225 = vsyncpa [#allocation5], 1 }
 0x4b7   :  { %4227 = vsyncpa [#allocation5 + $0x1], 1 }
 0x4b8   :  { %4228 = vsyncpa [#allocation6], 1 }
 0x4b9   :  { %4230 = vsyncpa [#allocation6 + $0x1], 1 }

</bundles_post_ra>
